<compile_context>
chip_gen: v7x
topology: tpu7x:2x2x1
jax: 0.10.0
libtpu: 0.0.40
codegen_flags: <defaults>
</compile_context>

<pallas_src>
import math

import jax
import jax.numpy as jnp
from jax.experimental import pallas as pl
from jax.experimental.pallas import tpu as pltpu


def _slstm_kernel(x_ref, w_ref, b_ref, u_ref, out_ref, h_sc, c_sc):
    """Grid = (batch_tiles [parallel], time_chunks [arbitrary, sequential]).

    x_ref  : (tc, b_tile, F)    input chunk (matmul dtype, e.g. bf16)
    w_ref  : (F, 4*Hp)          fused input weights (matmul dtype)
    b_ref  : (1, 4*Hp)          fused bias (f32)
    u_ref  : (Hp, 4*Hp)         fused recurrent weights (matmul dtype)
    out_ref: (tc, b_tile, Hp)   hidden states for this chunk
    h_sc/c_sc: (b_tile, Hp) f32 recurrent carries (persist across time chunks)
    """
    # New batch tile -> reset the recurrent state (time axis restarts at 0).
    @pl.when(pl.program_id(1) == 0)
    def _():
        h_sc[...] = jnp.zeros_like(h_sc)
        c_sc[...] = jnp.zeros_like(c_sc)

    w = w_ref[...]                      # resident across the chunk
    u = u_ref[...]
    b = b_ref[...]                      # (1, 4*Hp), sublane-broadcast on add
    t_chunk = x_ref.shape[0]
    hp = h_sc.shape[-1]

    def step(i, carry):
        h, c = carry
        # Fused gate pre-activation: tiny (b,F)x(F,4Hp) x-proj + one (b,Hp)x(Hp,4Hp)
        # recurrent matmul, both with f32 accumulation; bias folded in here.
        gates = (jnp.dot(x_ref[i], w, preferred_element_type=jnp.float32)
                 + jnp.dot(h.astype(u.dtype), u,
                           preferred_element_type=jnp.float32)
                 + b)
        ft = jax.nn.sigmoid(gates[:, 0 * hp:1 * hp])
        it = jax.nn.sigmoid(gates[:, 1 * hp:2 * hp])
        ot = gates[:, 2 * hp:3 * hp]            # NOTE: no sigmoid, as in the module
        cb = jnp.tanh(gates[:, 3 * hp:4 * hp])
        c_new = ft * c + it * cb
        h_new = ot * (jnp.tanh(c_new) + 1.0)    # == ot*tanh(c) + ot, one op less
        out_ref[i] = h_new.astype(out_ref.dtype)
        return h_new, c_new

    h_out, c_out = jax.lax.fori_loop(
        0, t_chunk, step, (h_sc[...], c_sc[...]), unroll=True)
    h_sc[...] = h_out
    c_sc[...] = c_out


def _round_up(n, m):
    return ((n + m - 1) // m) * m


def nas_slstm_forward(x, params, *, t_chunk=16, b_tile_max=256,
                      matmul_dtype=jnp.bfloat16, output_layout="bht"):
    """x: [batch, input_size, seqlen] -> [batch, hidden_size, seqlen] (default).

    matmul_dtype: dtype of the matmul inputs (accumulation is always f32).
                  bfloat16 (default) is ~3x faster on the MXU and halves the
                  weight VMEM; float32 reproduces the module's math exactly.
    output_layout: "bht" (module semantics) or "tbh" (skip the final transpose).
    """
    B, F, T = x.shape
    H = params["Wf"].shape[1]
    f32 = jnp.float32

    # ---- padding / tiling ----------------------------------------------------
    Hp = _round_up(H, 128)
    B8 = _round_up(max(B, 8), 8)
    b_tile = B8 if B8 <= b_tile_max else b_tile_max     # parallel batch tile
    Bp = _round_up(B8, b_tile)
    tc = max(1, min(t_chunk, T))                        # sweepable; 16 default
    Tp = _round_up(T, tc)
    n_bt, n_tc = Bp // b_tile, Tp // tc

    # ---- fused, padded parameters (gate order f, i, o, c) --------------------
    def pad_w(wm):   # (F, H) -> (F, Hp)
        return jnp.pad(wm.astype(f32), ((0, 0), (0, Hp - H)))

    def pad_u(um):   # (H, H) -> (Hp, Hp)
        return jnp.pad(um.astype(f32), ((0, Hp - H), (0, Hp - H)))

    def pad_b(bv):   # (H,) -> (Hp,)
        return jnp.pad(bv.astype(f32), (0, Hp - H))

    w_cat = jnp.concatenate([pad_w(params["Wf"]), pad_w(params["Wi"]),
                             pad_w(params["Wo"]), pad_w(params["Wc"])],
                            axis=1).astype(matmul_dtype)
    u_cat = jnp.concatenate([pad_u(params["Uf"]), pad_u(params["Ui"]),
                             pad_u(params["Uo"]), pad_u(params["Uc"])],
                            axis=1).astype(matmul_dtype)
    b_cat = jnp.concatenate([pad_b(params["bf"]), pad_b(params["bi"]),
                             pad_b(params["bo"]), pad_b(params["bc"])])[None, :]

    # [B, F, T] -> [T, B, F], pad time/batch. No xw intermediate is materialized.
    x_tbf = jnp.transpose(x, (2, 0, 1)).astype(matmul_dtype)
    x_tbf = jnp.pad(x_tbf, ((0, Tp - T), (0, Bp - B), (0, 0)))

    # ---- explicit VMEM budget (stay within v7x's 64 MiB, v5e's scoped default)
    mm_bytes = jnp.dtype(matmul_dtype).itemsize
    out_bytes = jnp.dtype(x.dtype).itemsize
    vmem_needed = (
        2 * tc * b_tile * F * mm_bytes        # x blocks (double-buffered)
        + 2 * tc * b_tile * Hp * out_bytes    # out blocks (double-buffered)
        + 2 * F * 4 * Hp * mm_bytes           # W_cat
        + 2 * 4 * Hp * 4                      # bias
        + 2 * Hp * 4 * Hp * mm_bytes          # U_cat (budget as if double-buffered)
        + 2 * b_tile * Hp * 4                 # h / c carries
    )
    vmem_limit = int(min(64 * 1024 * 1024,
                         max(16 * 1024 * 1024,
                             int(vmem_needed * 1.5) + (2 << 20))))

    compiler_params = pltpu.CompilerParams(
        dimension_semantics=("parallel", "arbitrary"),   # batch || , time sequential
        vmem_limit_bytes=vmem_limit,
    )

    def run(u_spec):
        return pl.pallas_call(
            _slstm_kernel,
            out_shape=jax.ShapeDtypeStruct((Tp, Bp, Hp), x.dtype),
            grid_spec=pltpu.PrefetchScalarGridSpec(
                num_scalar_prefetch=0,
                grid=(n_bt, n_tc),
                in_specs=[
                    pl.BlockSpec((tc, b_tile, F), lambda bi, ti: (ti, bi, 0)),
                    pl.BlockSpec((F, 4 * Hp), lambda bi, ti: (0, 0)),
                    pl.BlockSpec((1, 4 * Hp), lambda bi, ti: (0, 0)),
                    u_spec,
                ],
                out_specs=pl.BlockSpec((tc, b_tile, Hp),
                                       lambda bi, ti: (ti, bi, 0)),
                scratch_shapes=[
                    pltpu.VMEM((b_tile, Hp), jnp.float32),   # h carry
                    pltpu.VMEM((b_tile, Hp), jnp.float32),   # c carry
                ],
            ),
            compiler_params=compiler_params,
        )(x_tbf, w_cat, b_cat, u_cat)

    u_index_map = lambda bi, ti: (0, 0)
    try:
        # Single-buffer the resident recurrent weights (constant index_map).
        out = run(pl.BlockSpec((Hp, 4 * Hp), u_index_map,
                               pipeline_mode=pl.Buffered(1)))
    except Exception:
        # Fallback if this Pallas build rejects pipeline_mode on pallas_call
        # specs; default double-buffering is correct (just uses 2x U VMEM).
        out = run(pl.BlockSpec((Hp, 4 * Hp), u_index_map))

    out = out[:T, :B, :H]                    # drop padding; [T, B, H]
    if output_layout == "tbh":
        return out                           # skip the extra HBM round-trip
    return jnp.transpose(out, (1, 2, 0))     # == output[0].permute(1, 2, 0)


def init_params(key, input_size, hidden_size):
    """kaiming_uniform-style init matching the module's parameter shapes."""
    def kaiming_uniform(k, shape):
        fan_in = shape[1]                    # torch fan_in for a 2-D tensor
        bound = math.sqrt(6.0 / fan_in)      # kaiming_uniform_ (a=0) bound
        return jax.random.uniform(k, shape, jnp.float32, -bound, bound)

    ks = jax.random.split(key, 8)
    return {
        "Wf": kaiming_uniform(ks[0], (input_size, hidden_size)),
        "Wi": kaiming_uniform(ks[1], (input_size, hidden_size)),
        "Wc": kaiming_uniform(ks[2], (input_size, hidden_size)),
        "Wo": kaiming_uniform(ks[3], (input_size, hidden_size)),
        "Uf": kaiming_uniform(ks[4], (hidden_size, hidden_size)),
        "Ui": kaiming_uniform(ks[5], (hidden_size, hidden_size)),
        "Uc": kaiming_uniform(ks[6], (hidden_size, hidden_size)),
        "Uo": kaiming_uniform(ks[7], (hidden_size, hidden_size)),
        "bf": jnp.zeros((hidden_size,), jnp.float32),
        "bi": jnp.zeros((hidden_size,), jnp.float32),
        "bc": jnp.zeros((hidden_size,), jnp.float32),
        "bo": jnp.zeros((hidden_size,), jnp.float32),
    }


def _reference_forward(x, params, matmul_dtype=jnp.float32):
    """Pure-JAX reference of the PyTorch forward.

    matmul_dtype=float32  -> exact module math (HIGHEST-precision f32 matmuls).
    matmul_dtype=bfloat16 -> same mixed precision as the kernel's default path
                             (bf16 matmul inputs, f32 accumulate / elementwise).
    """
    B, F, T = x.shape
    H = params["Wf"].shape[1]
    if matmul_dtype == jnp.float32:
        mm = lambda a, b: jnp.dot(a, b, precision=jax.lax.Precision.HIGHEST)
    else:
        mm = lambda a, b: jnp.dot(a.astype(matmul_dtype), b.astype(matmul_dtype),
                                  preferred_element_type=jnp.float32)
    h = jnp.zeros((B, H), jnp.float32)
    c = jnp.zeros((B, H), jnp.float32)
    hs = []
    for i in range(T):
        xt = x[:, :, i]
        ft = jax.nn.sigmoid(mm(xt, params["Wf"]) + mm(h, params["Uf"]) + params["bf"])
        it = jax.nn.sigmoid(mm(xt, params["Wi"]) + mm(h, params["Ui"]) + params["bi"])
        ot = mm(xt, params["Wo"]) + mm(h, params["Uo"]) + params["bo"]
        c_bar = jnp.tanh(mm(xt, params["Wc"]) + mm(h, params["Uc"]) + params["bc"])
        c = ft * c + it * c_bar
        h = ot * jnp.tanh(c) + ot
        hs.append(h)
    return jnp.transpose(jnp.stack(hs), (1, 2, 0))


if __name__ == "__main__":
    key = jax.random.PRNGKey(0)
    k_param, k_x = jax.random.split(key)

    batch, input_size, hidden_size, seqlen = 2, 4, 32, 8
    params = init_params(k_param, input_size, hidden_size)
    x = jax.random.normal(k_x, (batch, input_size, seqlen), jnp.float32)

    # Default fast path: bf16 matmul inputs, f32 accumulation.  Check against a
    # pure-JAX reference using the SAME mixed precision (tight tolerance).
    out = jax.block_until_ready(nas_slstm_forward(x, params))
    assert out.shape == (batch, hidden_size, seqlen)
    ref_bf16 = _reference_forward(x, params, jnp.bfloat16)
    assert jnp.allclose(out, ref_bf16, rtol=2e-3, atol=2e-3), (
        f"bf16 path mismatch: max abs err {jnp.max(jnp.abs(out - ref_bf16))}")

    # Exact-precision path: f32 matmuls everywhere; tight check against the
    # true (HIGHEST-precision) module math.
    out_f32 = jax.block_until_ready(
        nas_slstm_forward(x, params, matmul_dtype=jnp.float32))
    ref_f32 = _reference_forward(x, params, jnp.float32)
    assert jnp.allclose(out_f32, ref_f32, rtol=2e-3, atol=2e-3), (
        f"f32 path mismatch: max abs err {jnp.max(jnp.abs(out_f32 - ref_f32))}")

    print("KERNEL_OK")
</pallas_src>

<mosaic_0001>
module attributes {stable_mosaic.version = 11 : i64} {
  func.func @_slstm_kernel(%arg0: i32, %arg1: i32, %arg2: memref<8x8x4xbf16, #tpu.memory_space<vmem>>, %arg3: memref<4x512xbf16, #tpu.memory_space<vmem>>, %arg4: memref<1x512xf32, #tpu.memory_space<vmem>>, %arg5: memref<128x512xbf16, #tpu.memory_space<vmem>>, %arg6: memref<8x8x128xf32, #tpu.memory_space<vmem>>, %arg7: memref<8x128xf32, #tpu.memory_space<vmem>>, %arg8: memref<8x128xf32, #tpu.memory_space<vmem>>) attributes {dimension_semantics = [#tpu.dimension_semantics<parallel>, #tpu.dimension_semantics<arbitrary>], iteration_bounds = array<i64: 1, 1>, scalar_prefetch = 0 : i64, scratch_operands = 2 : i64, tpu.core_type = #tpu.core_type<tc>, window_params = [{transform_indices = @transform_0, window_bounds = array<i64: 8, 8, 4>}, {pipeline_mode = #tpu.pipeline_mode<synchronous>, transform_indices = @transform_1, window_bounds = array<i64: 4, 512>}, {pipeline_mode = #tpu.pipeline_mode<synchronous>, transform_indices = @transform_2, window_bounds = array<i64: 1, 512>}, {pipeline_mode = #tpu.pipeline_mode<synchronous>, transform_indices = @transform_3, window_bounds = array<i64: 128, 512>}, {transform_indices = @transform_4, window_bounds = array<i64: 8, 8, 128>}]} {
    %c0_i32 = arith.constant 0 : i32
    %0 = arith.cmpi eq, %arg1, %c0_i32 : i32
    %1 = arith.extui %0 : i1 to i32
    %c0_i32_0 = arith.constant 0 : i32
    %2 = arith.cmpi ne, %1, %c0_i32_0 : i32
    scf.if %2 {
      %cst_86 = arith.constant 0.000000e+00 : f32
      %290 = vector.broadcast %cst_86 : f32 to vector<8x128xf32>
      %c0_87 = arith.constant 0 : index
      %c0_88 = arith.constant 0 : index
      %291 = vector.load %arg7[%c0_87, %c0_88] : memref<8x128xf32, #tpu.memory_space<vmem>>, vector<8x128xf32>
      tpu.vector_store %arg7[%c0_87, %c0_88], %290 {strides = array<i32>} : memref<8x128xf32, #tpu.memory_space<vmem>>, vector<8x128xf32>,
      %cst_89 = arith.constant 0.000000e+00 : f32
      %292 = vector.broadcast %cst_89 : f32 to vector<8x128xf32>
      %c0_90 = arith.constant 0 : index
      %c0_91 = arith.constant 0 : index
      %293 = vector.load %arg8[%c0_90, %c0_91] : memref<8x128xf32, #tpu.memory_space<vmem>>, vector<8x128xf32>
      tpu.vector_store %arg8[%c0_90, %c0_91], %292 {strides = array<i32>} : memref<8x128xf32, #tpu.memory_space<vmem>>, vector<8x128xf32>,
    } else {
    }
    %c0 = arith.constant 0 : index
    %c0_1 = arith.constant 0 : index
    %3 = vector.load %arg3[%c0, %c0_1] : memref<4x512xbf16, #tpu.memory_space<vmem>>, vector<4x512xbf16>
    %c0_2 = arith.constant 0 : index
    %c0_3 = arith.constant 0 : index
    %4 = vector.load %arg5[%c0_2, %c0_3] : memref<128x512xbf16, #tpu.memory_space<vmem>>, vector<128x512xbf16>
    %c0_4 = arith.constant 0 : index
    %c0_5 = arith.constant 0 : index
    %5 = vector.load %arg4[%c0_4, %c0_5] : memref<1x512xf32, #tpu.memory_space<vmem>>, vector<1x512xf32>
    %c0_6 = arith.constant 0 : index
    %c0_7 = arith.constant 0 : index
    %6 = vector.load %arg7[%c0_6, %c0_7] : memref<8x128xf32, #tpu.memory_space<vmem>>, vector<8x128xf32>
    %c0_8 = arith.constant 0 : index
    %c0_9 = arith.constant 0 : index
    %7 = vector.load %arg8[%c0_8, %c0_9] : memref<8x128xf32, #tpu.memory_space<vmem>>, vector<8x128xf32>
    %c0_i32_10 = arith.constant 0 : i32
    %8 = arith.index_cast %c0_i32_10 : i32 to index
    %c0_11 = arith.constant 0 : index
    %c0_12 = arith.constant 0 : index
    %9 = vector.load %arg2[%8, %c0_11, %c0_12] : memref<8x8x4xbf16, #tpu.memory_space<vmem>>, vector<1x8x4xbf16>
    %10 = vector.shape_cast %9 : vector<1x8x4xbf16> to vector<8x4xbf16>
    %cst = arith.constant dense<0.000000e+00> : vector<8x512xf32>
    %11 = tpu.matmul %10, %3, %cst {dimension_numbers = #tpu.dot_dimension_numbers<[1], [0], [0], [1], [0, 0, 1, 1], [], []>} : vector<8x4xbf16>, vector<4x512xbf16>, vector<8x512xf32> -> vector<8x512xf32>
    %12 = arith.truncf %6 : vector<8x128xf32> to vector<8x128xbf16>
    %cst_13 = arith.constant dense<0.000000e+00> : vector<8x512xf32>
    %13 = tpu.matmul %12, %4, %cst_13 {dimension_numbers = #tpu.dot_dimension_numbers<[1], [0], [0], [1], [0, 0, 1, 1], [], []>} : vector<8x128xbf16>, vector<128x512xbf16>, vector<8x512xf32> -> vector<8x512xf32>
    %14 = arith.addf %11, %13 : vector<8x512xf32>
    %15 = vector.broadcast %5 : vector<1x512xf32> to vector<8x512xf32>
    %16 = arith.addf %14, %15 : vector<8x512xf32>
    %17 = vector.extract_strided_slice %16 {offsets = [0, 0], sizes = [8, 128], strides = [1, 1]} : vector<8x512xf32> to vector<8x128xf32>
    %18 = arith.negf %17 : vector<8x128xf32>
    %19 = math.exp %18 : vector<8x128xf32>
    %cst_14 = arith.constant 1.000000e+00 : f32
    %20 = vector.broadcast %cst_14 : f32 to vector<8x128xf32>
    %21 = arith.addf %20, %19 : vector<8x128xf32>
    %22 = arith.divf %20, %21 : vector<8x128xf32>
    %23 = vector.extract_strided_slice %16 {offsets = [0, 128], sizes = [8, 128], strides = [1, 1]} : vector<8x512xf32> to vector<8x128xf32>
    %24 = arith.negf %23 : vector<8x128xf32>
    %25 = math.exp %24 : vector<8x128xf32>
    %cst_15 = arith.constant 1.000000e+00 : f32
    %26 = vector.broadcast %cst_15 : f32 to vector<8x128xf32>
    %27 = arith.addf %26, %25 : vector<8x128xf32>
    %28 = arith.divf %26, %27 : vector<8x128xf32>
    %29 = vector.extract_strided_slice %16 {offsets = [0, 256], sizes = [8, 128], strides = [1, 1]} : vector<8x512xf32> to vector<8x128xf32>
    %30 = vector.extract_strided_slice %16 {offsets = [0, 384], sizes = [8, 128], strides = [1, 1]} : vector<8x512xf32> to vector<8x128xf32>
    %31 = math.tanh %30 : vector<8x128xf32>
    %32 = arith.mulf %22, %7 : vector<8x128xf32>
    %33 = arith.mulf %28, %31 : vector<8x128xf32>
    %34 = arith.addf %32, %33 : vector<8x128xf32>
    %35 = math.tanh %34 : vector<8x128xf32>
    %cst_16 = arith.constant 1.000000e+00 : f32
    %36 = vector.broadcast %cst_16 : f32 to vector<8x128xf32>
    %37 = arith.addf %35, %36 : vector<8x128xf32>
    %38 = arith.mulf %29, %37 : vector<8x128xf32>
    %39 = arith.index_cast %c0_i32_10 : i32 to index
    %c0_17 = arith.constant 0 : index
    %c0_18 = arith.constant 0 : index
    %40 = vector.load %arg6[%39, %c0_17, %c0_18] : memref<8x8x128xf32, #tpu.memory_space<vmem>>, vector<1x8x128xf32>
    %41 = vector.shape_cast %40 : vector<1x8x128xf32> to vector<8x128xf32>
    %42 = vector.shape_cast %38 : vector<8x128xf32> to vector<1x8x128xf32>
    tpu.vector_store %arg6[%39, %c0_17, %c0_18], %42 {strides = array<i32>} : memref<8x8x128xf32, #tpu.memory_space<vmem>>, vector<1x8x128xf32>,
    %c1_i32 = arith.constant 1 : i32
    %43 = arith.index_cast %c1_i32 : i32 to index
    %c0_19 = arith.constant 0 : index
    %c0_20 = arith.constant 0 : index
    %44 = vector.load %arg2[%43, %c0_19, %c0_20] : memref<8x8x4xbf16, #tpu.memory_space<vmem>>, vector<1x8x4xbf16>
    %45 = vector.shape_cast %44 : vector<1x8x4xbf16> to vector<8x4xbf16>
    %cst_21 = arith.constant dense<0.000000e+00> : vector<8x512xf32>
    %46 = tpu.matmul %45, %3, %cst_21 {dimension_numbers = #tpu.dot_dimension_numbers<[1], [0], [0], [1], [0, 0, 1, 1], [], []>} : vector<8x4xbf16>, vector<4x512xbf16>, vector<8x512xf32> -> vector<8x512xf32>
    %47 = arith.truncf %38 : vector<8x128xf32> to vector<8x128xbf16>
    %cst_22 = arith.constant dense<0.000000e+00> : vector<8x512xf32>
    %48 = tpu.matmul %47, %4, %cst_22 {dimension_numbers = #tpu.dot_dimension_numbers<[1], [0], [0], [1], [0, 0, 1, 1], [], []>} : vector<8x128xbf16>, vector<128x512xbf16>, vector<8x512xf32> -> vector<8x512xf32>
    %49 = arith.addf %46, %48 : vector<8x512xf32>
    %50 = vector.broadcast %5 : vector<1x512xf32> to vector<8x512xf32>
    %51 = arith.addf %49, %50 : vector<8x512xf32>
    %52 = vector.extract_strided_slice %51 {offsets = [0, 0], sizes = [8, 128], strides = [1, 1]} : vector<8x512xf32> to vector<8x128xf32>
    %53 = arith.negf %52 : vector<8x128xf32>
    %54 = math.exp %53 : vector<8x128xf32>
    %cst_23 = arith.constant 1.000000e+00 : f32
    %55 = vector.broadcast %cst_23 : f32 to vector<8x128xf32>
    %56 = arith.addf %55, %54 : vector<8x128xf32>
    %57 = arith.divf %55, %56 : vector<8x128xf32>
    %58 = vector.extract_strided_slice %51 {offsets = [0, 128], sizes = [8, 128], strides = [1, 1]} : vector<8x512xf32> to vector<8x128xf32>
    %59 = arith.negf %58 : vector<8x128xf32>
    %60 = math.exp %59 : vector<8x128xf32>
    %cst_24 = arith.constant 1.000000e+00 : f32
    %61 = vector.broadcast %cst_24 : f32 to vector<8x128xf32>
    %62 = arith.addf %61, %60 : vector<8x128xf32>
    %63 = arith.divf %61, %62 : vector<8x128xf32>
    %64 = vector.extract_strided_slice %51 {offsets = [0, 256], sizes = [8, 128], strides = [1, 1]} : vector<8x512xf32> to vector<8x128xf32>
    %65 = vector.extract_strided_slice %51 {offsets = [0, 384], sizes = [8, 128], strides = [1, 1]} : vector<8x512xf32> to vector<8x128xf32>
    %66 = math.tanh %65 : vector<8x128xf32>
    %67 = arith.mulf %57, %34 : vector<8x128xf32>
    %68 = arith.mulf %63, %66 : vector<8x128xf32>
    %69 = arith.addf %67, %68 : vector<8x128xf32>
    %70 = math.tanh %69 : vector<8x128xf32>
    %cst_25 = arith.constant 1.000000e+00 : f32
    %71 = vector.broadcast %cst_25 : f32 to vector<8x128xf32>
    %72 = arith.addf %70, %71 : vector<8x128xf32>
    %73 = arith.mulf %64, %72 : vector<8x128xf32>
    %74 = arith.index_cast %c1_i32 : i32 to index
    %c0_26 = arith.constant 0 : index
    %c0_27 = arith.constant 0 : index
    %75 = vector.load %arg6[%74, %c0_26, %c0_27] : memref<8x8x128xf32, #tpu.memory_space<vmem>>, vector<1x8x128xf32>
    %76 = vector.shape_cast %75 : vector<1x8x128xf32> to vector<8x128xf32>
    %77 = vector.shape_cast %73 : vector<8x128xf32> to vector<1x8x128xf32>
    tpu.vector_store %arg6[%74, %c0_26, %c0_27], %77 {strides = array<i32>} : memref<8x8x128xf32, #tpu.memory_space<vmem>>, vector<1x8x128xf32>,
    %c2_i32 = arith.constant 2 : i32
    %78 = arith.index_cast %c2_i32 : i32 to index
    %c0_28 = arith.constant 0 : index
    %c0_29 = arith.constant 0 : index
    %79 = vector.load %arg2[%78, %c0_28, %c0_29] : memref<8x8x4xbf16, #tpu.memory_space<vmem>>, vector<1x8x4xbf16>
    %80 = vector.shape_cast %79 : vector<1x8x4xbf16> to vector<8x4xbf16>
    %cst_30 = arith.constant dense<0.000000e+00> : vector<8x512xf32>
    %81 = tpu.matmul %80, %3, %cst_30 {dimension_numbers = #tpu.dot_dimension_numbers<[1], [0], [0], [1], [0, 0, 1, 1], [], []>} : vector<8x4xbf16>, vector<4x512xbf16>, vector<8x512xf32> -> vector<8x512xf32>
    %82 = arith.truncf %73 : vector<8x128xf32> to vector<8x128xbf16>
    %cst_31 = arith.constant dense<0.000000e+00> : vector<8x512xf32>
    %83 = tpu.matmul %82, %4, %cst_31 {dimension_numbers = #tpu.dot_dimension_numbers<[1], [0], [0], [1], [0, 0, 1, 1], [], []>} : vector<8x128xbf16>, vector<128x512xbf16>, vector<8x512xf32> -> vector<8x512xf32>
    %84 = arith.addf %81, %83 : vector<8x512xf32>
    %85 = vector.broadcast %5 : vector<1x512xf32> to vector<8x512xf32>
    %86 = arith.addf %84, %85 : vector<8x512xf32>
    %87 = vector.extract_strided_slice %86 {offsets = [0, 0], sizes = [8, 128], strides = [1, 1]} : vector<8x512xf32> to vector<8x128xf32>
    %88 = arith.negf %87 : vector<8x128xf32>
    %89 = math.exp %88 : vector<8x128xf32>
    %cst_32 = arith.constant 1.000000e+00 : f32
    %90 = vector.broadcast %cst_32 : f32 to vector<8x128xf32>
    %91 = arith.addf %90, %89 : vector<8x128xf32>
    %92 = arith.divf %90, %91 : vector<8x128xf32>
    %93 = vector.extract_strided_slice %86 {offsets = [0, 128], sizes = [8, 128], strides = [1, 1]} : vector<8x512xf32> to vector<8x128xf32>
    %94 = arith.negf %93 : vector<8x128xf32>
    %95 = math.exp %94 : vector<8x128xf32>
    %cst_33 = arith.constant 1.000000e+00 : f32
    %96 = vector.broadcast %cst_33 : f32 to vector<8x128xf32>
    %97 = arith.addf %96, %95 : vector<8x128xf32>
    %98 = arith.divf %96, %97 : vector<8x128xf32>
    %99 = vector.extract_strided_slice %86 {offsets = [0, 256], sizes = [8, 128], strides = [1, 1]} : vector<8x512xf32> to vector<8x128xf32>
    %100 = vector.extract_strided_slice %86 {offsets = [0, 384], sizes = [8, 128], strides = [1, 1]} : vector<8x512xf32> to vector<8x128xf32>
    %101 = math.tanh %100 : vector<8x128xf32>
    %102 = arith.mulf %92, %69 : vector<8x128xf32>
    %103 = arith.mulf %98, %101 : vector<8x128xf32>
    %104 = arith.addf %102, %103 : vector<8x128xf32>
    %105 = math.tanh %104 : vector<8x128xf32>
    %cst_34 = arith.constant 1.000000e+00 : f32
    %106 = vector.broadcast %cst_34 : f32 to vector<8x128xf32>
    %107 = arith.addf %105, %106 : vector<8x128xf32>
    %108 = arith.mulf %99, %107 : vector<8x128xf32>
    %109 = arith.index_cast %c2_i32 : i32 to index
    %c0_35 = arith.constant 0 : index
    %c0_36 = arith.constant 0 : index
    %110 = vector.load %arg6[%109, %c0_35, %c0_36] : memref<8x8x128xf32, #tpu.memory_space<vmem>>, vector<1x8x128xf32>
    %111 = vector.shape_cast %110 : vector<1x8x128xf32> to vector<8x128xf32>
    %112 = vector.shape_cast %108 : vector<8x128xf32> to vector<1x8x128xf32>
    tpu.vector_store %arg6[%109, %c0_35, %c0_36], %112 {strides = array<i32>} : memref<8x8x128xf32, #tpu.memory_space<vmem>>, vector<1x8x128xf32>,
    %c3_i32 = arith.constant 3 : i32
    %113 = arith.index_cast %c3_i32 : i32 to index
    %c0_37 = arith.constant 0 : index
    %c0_38 = arith.constant 0 : index
    %114 = vector.load %arg2[%113, %c0_37, %c0_38] : memref<8x8x4xbf16, #tpu.memory_space<vmem>>, vector<1x8x4xbf16>
    %115 = vector.shape_cast %114 : vector<1x8x4xbf16> to vector<8x4xbf16>
    %cst_39 = arith.constant dense<0.000000e+00> : vector<8x512xf32>
    %116 = tpu.matmul %115, %3, %cst_39 {dimension_numbers = #tpu.dot_dimension_numbers<[1], [0], [0], [1], [0, 0, 1, 1], [], []>} : vector<8x4xbf16>, vector<4x512xbf16>, vector<8x512xf32> -> vector<8x512xf32>
    %117 = arith.truncf %108 : vector<8x128xf32> to vector<8x128xbf16>
    %cst_40 = arith.constant dense<0.000000e+00> : vector<8x512xf32>
    %118 = tpu.matmul %117, %4, %cst_40 {dimension_numbers = #tpu.dot_dimension_numbers<[1], [0], [0], [1], [0, 0, 1, 1], [], []>} : vector<8x128xbf16>, vector<128x512xbf16>, vector<8x512xf32> -> vector<8x512xf32>
    %119 = arith.addf %116, %118 : vector<8x512xf32>
    %120 = vector.broadcast %5 : vector<1x512xf32> to vector<8x512xf32>
    %121 = arith.addf %119, %120 : vector<8x512xf32>
    %122 = vector.extract_strided_slice %121 {offsets = [0, 0], sizes = [8, 128], strides = [1, 1]} : vector<8x512xf32> to vector<8x128xf32>
    %123 = arith.negf %122 : vector<8x128xf32>
    %124 = math.exp %123 : vector<8x128xf32>
    %cst_41 = arith.constant 1.000000e+00 : f32
    %125 = vector.broadcast %cst_41 : f32 to vector<8x128xf32>
    %126 = arith.addf %125, %124 : vector<8x128xf32>
    %127 = arith.divf %125, %126 : vector<8x128xf32>
    %128 = vector.extract_strided_slice %121 {offsets = [0, 128], sizes = [8, 128], strides = [1, 1]} : vector<8x512xf32> to vector<8x128xf32>
    %129 = arith.negf %128 : vector<8x128xf32>
    %130 = math.exp %129 : vector<8x128xf32>
    %cst_42 = arith.constant 1.000000e+00 : f32
    %131 = vector.broadcast %cst_42 : f32 to vector<8x128xf32>
    %132 = arith.addf %131, %130 : vector<8x128xf32>
    %133 = arith.divf %131, %132 : vector<8x128xf32>
    %134 = vector.extract_strided_slice %121 {offsets = [0, 256], sizes = [8, 128], strides = [1, 1]} : vector<8x512xf32> to vector<8x128xf32>
    %135 = vector.extract_strided_slice %121 {offsets = [0, 384], sizes = [8, 128], strides = [1, 1]} : vector<8x512xf32> to vector<8x128xf32>
    %136 = math.tanh %135 : vector<8x128xf32>
    %137 = arith.mulf %127, %104 : vector<8x128xf32>
    %138 = arith.mulf %133, %136 : vector<8x128xf32>
    %139 = arith.addf %137, %138 : vector<8x128xf32>
    %140 = math.tanh %139 : vector<8x128xf32>
    %cst_43 = arith.constant 1.000000e+00 : f32
    %141 = vector.broadcast %cst_43 : f32 to vector<8x128xf32>
    %142 = arith.addf %140, %141 : vector<8x128xf32>
    %143 = arith.mulf %134, %142 : vector<8x128xf32>
    %144 = arith.index_cast %c3_i32 : i32 to index
    %c0_44 = arith.constant 0 : index
    %c0_45 = arith.constant 0 : index
    %145 = vector.load %arg6[%144, %c0_44, %c0_45] : memref<8x8x128xf32, #tpu.memory_space<vmem>>, vector<1x8x128xf32>
    %146 = vector.shape_cast %145 : vector<1x8x128xf32> to vector<8x128xf32>
    %147 = vector.shape_cast %143 : vector<8x128xf32> to vector<1x8x128xf32>
    tpu.vector_store %arg6[%144, %c0_44, %c0_45], %147 {strides = array<i32>} : memref<8x8x128xf32, #tpu.memory_space<vmem>>, vector<1x8x128xf32>,
    %c4_i32 = arith.constant 4 : i32
    %148 = arith.index_cast %c4_i32 : i32 to index
    %c0_46 = arith.constant 0 : index
    %c0_47 = arith.constant 0 : index
    %149 = vector.load %arg2[%148, %c0_46, %c0_47] : memref<8x8x4xbf16, #tpu.memory_space<vmem>>, vector<1x8x4xbf16>
    %150 = vector.shape_cast %149 : vector<1x8x4xbf16> to vector<8x4xbf16>
    %cst_48 = arith.constant dense<0.000000e+00> : vector<8x512xf32>
    %151 = tpu.matmul %150, %3, %cst_48 {dimension_numbers = #tpu.dot_dimension_numbers<[1], [0], [0], [1], [0, 0, 1, 1], [], []>} : vector<8x4xbf16>, vector<4x512xbf16>, vector<8x512xf32> -> vector<8x512xf32>
    %152 = arith.truncf %143 : vector<8x128xf32> to vector<8x128xbf16>
    %cst_49 = arith.constant dense<0.000000e+00> : vector<8x512xf32>
    %153 = tpu.matmul %152, %4, %cst_49 {dimension_numbers = #tpu.dot_dimension_numbers<[1], [0], [0], [1], [0, 0, 1, 1], [], []>} : vector<8x128xbf16>, vector<128x512xbf16>, vector<8x512xf32> -> vector<8x512xf32>
    %154 = arith.addf %151, %153 : vector<8x512xf32>
    %155 = vector.broadcast %5 : vector<1x512xf32> to vector<8x512xf32>
    %156 = arith.addf %154, %155 : vector<8x512xf32>
    %157 = vector.extract_strided_slice %156 {offsets = [0, 0], sizes = [8, 128], strides = [1, 1]} : vector<8x512xf32> to vector<8x128xf32>
    %158 = arith.negf %157 : vector<8x128xf32>
    %159 = math.exp %158 : vector<8x128xf32>
    %cst_50 = arith.constant 1.000000e+00 : f32
    %160 = vector.broadcast %cst_50 : f32 to vector<8x128xf32>
    %161 = arith.addf %160, %159 : vector<8x128xf32>
    %162 = arith.divf %160, %161 : vector<8x128xf32>
    %163 = vector.extract_strided_slice %156 {offsets = [0, 128], sizes = [8, 128], strides = [1, 1]} : vector<8x512xf32> to vector<8x128xf32>
    %164 = arith.negf %163 : vector<8x128xf32>
    %165 = math.exp %164 : vector<8x128xf32>
    %cst_51 = arith.constant 1.000000e+00 : f32
    %166 = vector.broadcast %cst_51 : f32 to vector<8x128xf32>
    %167 = arith.addf %166, %165 : vector<8x128xf32>
    %168 = arith.divf %166, %167 : vector<8x128xf32>
    %169 = vector.extract_strided_slice %156 {offsets = [0, 256], sizes = [8, 128], strides = [1, 1]} : vector<8x512xf32> to vector<8x128xf32>
    %170 = vector.extract_strided_slice %156 {offsets = [0, 384], sizes = [8, 128], strides = [1, 1]} : vector<8x512xf32> to vector<8x128xf32>
    %171 = math.tanh %170 : vector<8x128xf32>
    %172 = arith.mulf %162, %139 : vector<8x128xf32>
    %173 = arith.mulf %168, %171 : vector<8x128xf32>
    %174 = arith.addf %172, %173 : vector<8x128xf32>
    %175 = math.tanh %174 : vector<8x128xf32>
    %cst_52 = arith.constant 1.000000e+00 : f32
    %176 = vector.broadcast %cst_52 : f32 to vector<8x128xf32>
    %177 = arith.addf %175, %176 : vector<8x128xf32>
    %178 = arith.mulf %169, %177 : vector<8x128xf32>
    %179 = arith.index_cast %c4_i32 : i32 to index
    %c0_53 = arith.constant 0 : index
    %c0_54 = arith.constant 0 : index
    %180 = vector.load %arg6[%179, %c0_53, %c0_54] : memref<8x8x128xf32, #tpu.memory_space<vmem>>, vector<1x8x128xf32>
    %181 = vector.shape_cast %180 : vector<1x8x128xf32> to vector<8x128xf32>
    %182 = vector.shape_cast %178 : vector<8x128xf32> to vector<1x8x128xf32>
    tpu.vector_store %arg6[%179, %c0_53, %c0_54], %182 {strides = array<i32>} : memref<8x8x128xf32, #tpu.memory_space<vmem>>, vector<1x8x128xf32>,
    %c5_i32 = arith.constant 5 : i32
    %183 = arith.index_cast %c5_i32 : i32 to index
    %c0_55 = arith.constant 0 : index
    %c0_56 = arith.constant 0 : index
    %184 = vector.load %arg2[%183, %c0_55, %c0_56] : memref<8x8x4xbf16, #tpu.memory_space<vmem>>, vector<1x8x4xbf16>
    %185 = vector.shape_cast %184 : vector<1x8x4xbf16> to vector<8x4xbf16>
    %cst_57 = arith.constant dense<0.000000e+00> : vector<8x512xf32>
    %186 = tpu.matmul %185, %3, %cst_57 {dimension_numbers = #tpu.dot_dimension_numbers<[1], [0], [0], [1], [0, 0, 1, 1], [], []>} : vector<8x4xbf16>, vector<4x512xbf16>, vector<8x512xf32> -> vector<8x512xf32>
    %187 = arith.truncf %178 : vector<8x128xf32> to vector<8x128xbf16>
    %cst_58 = arith.constant dense<0.000000e+00> : vector<8x512xf32>
    %188 = tpu.matmul %187, %4, %cst_58 {dimension_numbers = #tpu.dot_dimension_numbers<[1], [0], [0], [1], [0, 0, 1, 1], [], []>} : vector<8x128xbf16>, vector<128x512xbf16>, vector<8x512xf32> -> vector<8x512xf32>
    %189 = arith.addf %186, %188 : vector<8x512xf32>
    %190 = vector.broadcast %5 : vector<1x512xf32> to vector<8x512xf32>
    %191 = arith.addf %189, %190 : vector<8x512xf32>
    %192 = vector.extract_strided_slice %191 {offsets = [0, 0], sizes = [8, 128], strides = [1, 1]} : vector<8x512xf32> to vector<8x128xf32>
    %193 = arith.negf %192 : vector<8x128xf32>
    %194 = math.exp %193 : vector<8x128xf32>
    %cst_59 = arith.constant 1.000000e+00 : f32
    %195 = vector.broadcast %cst_59 : f32 to vector<8x128xf32>
    %196 = arith.addf %195, %194 : vector<8x128xf32>
    %197 = arith.divf %195, %196 : vector<8x128xf32>
    %198 = vector.extract_strided_slice %191 {offsets = [0, 128], sizes = [8, 128], strides = [1, 1]} : vector<8x512xf32> to vector<8x128xf32>
    %199 = arith.negf %198 : vector<8x128xf32>
    %200 = math.exp %199 : vector<8x128xf32>
    %cst_60 = arith.constant 1.000000e+00 : f32
    %201 = vector.broadcast %cst_60 : f32 to vector<8x128xf32>
    %202 = arith.addf %201, %200 : vector<8x128xf32>
    %203 = arith.divf %201, %202 : vector<8x128xf32>
    %204 = vector.extract_strided_slice %191 {offsets = [0, 256], sizes = [8, 128], strides = [1, 1]} : vector<8x512xf32> to vector<8x128xf32>
    %205 = vector.extract_strided_slice %191 {offsets = [0, 384], sizes = [8, 128], strides = [1, 1]} : vector<8x512xf32> to vector<8x128xf32>
    %206 = math.tanh %205 : vector<8x128xf32>
    %207 = arith.mulf %197, %174 : vector<8x128xf32>
    %208 = arith.mulf %203, %206 : vector<8x128xf32>
    %209 = arith.addf %207, %208 : vector<8x128xf32>
    %210 = math.tanh %209 : vector<8x128xf32>
    %cst_61 = arith.constant 1.000000e+00 : f32
    %211 = vector.broadcast %cst_61 : f32 to vector<8x128xf32>
    %212 = arith.addf %210, %211 : vector<8x128xf32>
    %213 = arith.mulf %204, %212 : vector<8x128xf32>
    %214 = arith.index_cast %c5_i32 : i32 to index
    %c0_62 = arith.constant 0 : index
    %c0_63 = arith.constant 0 : index
    %215 = vector.load %arg6[%214, %c0_62, %c0_63] : memref<8x8x128xf32, #tpu.memory_space<vmem>>, vector<1x8x128xf32>
    %216 = vector.shape_cast %215 : vector<1x8x128xf32> to vector<8x128xf32>
    %217 = vector.shape_cast %213 : vector<8x128xf32> to vector<1x8x128xf32>
    tpu.vector_store %arg6[%214, %c0_62, %c0_63], %217 {strides = array<i32>} : memref<8x8x128xf32, #tpu.memory_space<vmem>>, vector<1x8x128xf32>,
    %c6_i32 = arith.constant 6 : i32
    %218 = arith.index_cast %c6_i32 : i32 to index
    %c0_64 = arith.constant 0 : index
    %c0_65 = arith.constant 0 : index
    %219 = vector.load %arg2[%218, %c0_64, %c0_65] : memref<8x8x4xbf16, #tpu.memory_space<vmem>>, vector<1x8x4xbf16>
    %220 = vector.shape_cast %219 : vector<1x8x4xbf16> to vector<8x4xbf16>
    %cst_66 = arith.constant dense<0.000000e+00> : vector<8x512xf32>
    %221 = tpu.matmul %220, %3, %cst_66 {dimension_numbers = #tpu.dot_dimension_numbers<[1], [0], [0], [1], [0, 0, 1, 1], [], []>} : vector<8x4xbf16>, vector<4x512xbf16>, vector<8x512xf32> -> vector<8x512xf32>
    %222 = arith.truncf %213 : vector<8x128xf32> to vector<8x128xbf16>
    %cst_67 = arith.constant dense<0.000000e+00> : vector<8x512xf32>
    %223 = tpu.matmul %222, %4, %cst_67 {dimension_numbers = #tpu.dot_dimension_numbers<[1], [0], [0], [1], [0, 0, 1, 1], [], []>} : vector<8x128xbf16>, vector<128x512xbf16>, vector<8x512xf32> -> vector<8x512xf32>
    %224 = arith.addf %221, %223 : vector<8x512xf32>
    %225 = vector.broadcast %5 : vector<1x512xf32> to vector<8x512xf32>
    %226 = arith.addf %224, %225 : vector<8x512xf32>
    %227 = vector.extract_strided_slice %226 {offsets = [0, 0], sizes = [8, 128], strides = [1, 1]} : vector<8x512xf32> to vector<8x128xf32>
    %228 = arith.negf %227 : vector<8x128xf32>
    %229 = math.exp %228 : vector<8x128xf32>
    %cst_68 = arith.constant 1.000000e+00 : f32
    %230 = vector.broadcast %cst_68 : f32 to vector<8x128xf32>
    %231 = arith.addf %230, %229 : vector<8x128xf32>
    %232 = arith.divf %230, %231 : vector<8x128xf32>
    %233 = vector.extract_strided_slice %226 {offsets = [0, 128], sizes = [8, 128], strides = [1, 1]} : vector<8x512xf32> to vector<8x128xf32>
    %234 = arith.negf %233 : vector<8x128xf32>
    %235 = math.exp %234 : vector<8x128xf32>
    %cst_69 = arith.constant 1.000000e+00 : f32
    %236 = vector.broadcast %cst_69 : f32 to vector<8x128xf32>
    %237 = arith.addf %236, %235 : vector<8x128xf32>
    %238 = arith.divf %236, %237 : vector<8x128xf32>
    %239 = vector.extract_strided_slice %226 {offsets = [0, 256], sizes = [8, 128], strides = [1, 1]} : vector<8x512xf32> to vector<8x128xf32>
    %240 = vector.extract_strided_slice %226 {offsets = [0, 384], sizes = [8, 128], strides = [1, 1]} : vector<8x512xf32> to vector<8x128xf32>
    %241 = math.tanh %240 : vector<8x128xf32>
    %242 = arith.mulf %232, %209 : vector<8x128xf32>
    %243 = arith.mulf %238, %241 : vector<8x128xf32>
    %244 = arith.addf %242, %243 : vector<8x128xf32>
    %245 = math.tanh %244 : vector<8x128xf32>
    %cst_70 = arith.constant 1.000000e+00 : f32
    %246 = vector.broadcast %cst_70 : f32 to vector<8x128xf32>
    %247 = arith.addf %245, %246 : vector<8x128xf32>
    %248 = arith.mulf %239, %247 : vector<8x128xf32>
    %249 = arith.index_cast %c6_i32 : i32 to index
    %c0_71 = arith.constant 0 : index
    %c0_72 = arith.constant 0 : index
    %250 = vector.load %arg6[%249, %c0_71, %c0_72] : memref<8x8x128xf32, #tpu.memory_space<vmem>>, vector<1x8x128xf32>
    %251 = vector.shape_cast %250 : vector<1x8x128xf32> to vector<8x128xf32>
    %252 = vector.shape_cast %248 : vector<8x128xf32> to vector<1x8x128xf32>
    tpu.vector_store %arg6[%249, %c0_71, %c0_72], %252 {strides = array<i32>} : memref<8x8x128xf32, #tpu.memory_space<vmem>>, vector<1x8x128xf32>,
    %c7_i32 = arith.constant 7 : i32
    %253 = arith.index_cast %c7_i32 : i32 to index
    %c0_73 = arith.constant 0 : index
    %c0_74 = arith.constant 0 : index
    %254 = vector.load %arg2[%253, %c0_73, %c0_74] : memref<8x8x4xbf16, #tpu.memory_space<vmem>>, vector<1x8x4xbf16>
    %255 = vector.shape_cast %254 : vector<1x8x4xbf16> to vector<8x4xbf16>
    %cst_75 = arith.constant dense<0.000000e+00> : vector<8x512xf32>
    %256 = tpu.matmul %255, %3, %cst_75 {dimension_numbers = #tpu.dot_dimension_numbers<[1], [0], [0], [1], [0, 0, 1, 1], [], []>} : vector<8x4xbf16>, vector<4x512xbf16>, vector<8x512xf32> -> vector<8x512xf32>
    %257 = arith.truncf %248 : vector<8x128xf32> to vector<8x128xbf16>
    %cst_76 = arith.constant dense<0.000000e+00> : vector<8x512xf32>
    %258 = tpu.matmul %257, %4, %cst_76 {dimension_numbers = #tpu.dot_dimension_numbers<[1], [0], [0], [1], [0, 0, 1, 1], [], []>} : vector<8x128xbf16>, vector<128x512xbf16>, vector<8x512xf32> -> vector<8x512xf32>
    %259 = arith.addf %256, %258 : vector<8x512xf32>
    %260 = vector.broadcast %5 : vector<1x512xf32> to vector<8x512xf32>
    %261 = arith.addf %259, %260 : vector<8x512xf32>
    %262 = vector.extract_strided_slice %261 {offsets = [0, 0], sizes = [8, 128], strides = [1, 1]} : vector<8x512xf32> to vector<8x128xf32>
    %263 = arith.negf %262 : vector<8x128xf32>
    %264 = math.exp %263 : vector<8x128xf32>
    %cst_77 = arith.constant 1.000000e+00 : f32
    %265 = vector.broadcast %cst_77 : f32 to vector<8x128xf32>
    %266 = arith.addf %265, %264 : vector<8x128xf32>
    %267 = arith.divf %265, %266 : vector<8x128xf32>
    %268 = vector.extract_strided_slice %261 {offsets = [0, 128], sizes = [8, 128], strides = [1, 1]} : vector<8x512xf32> to vector<8x128xf32>
    %269 = arith.negf %268 : vector<8x128xf32>
    %270 = math.exp %269 : vector<8x128xf32>
    %cst_78 = arith.constant 1.000000e+00 : f32
    %271 = vector.broadcast %cst_78 : f32 to vector<8x128xf32>
    %272 = arith.addf %271, %270 : vector<8x128xf32>
    %273 = arith.divf %271, %272 : vector<8x128xf32>
    %274 = vector.extract_strided_slice %261 {offsets = [0, 256], sizes = [8, 128], strides = [1, 1]} : vector<8x512xf32> to vector<8x128xf32>
    %275 = vector.extract_strided_slice %261 {offsets = [0, 384], sizes = [8, 128], strides = [1, 1]} : vector<8x512xf32> to vector<8x128xf32>
    %276 = math.tanh %275 : vector<8x128xf32>
    %277 = arith.mulf %267, %244 : vector<8x128xf32>
    %278 = arith.mulf %273, %276 : vector<8x128xf32>
    %279 = arith.addf %277, %278 : vector<8x128xf32>
    %280 = math.tanh %279 : vector<8x128xf32>
    %cst_79 = arith.constant 1.000000e+00 : f32
    %281 = vector.broadcast %cst_79 : f32 to vector<8x128xf32>
    %282 = arith.addf %280, %281 : vector<8x128xf32>
    %283 = arith.mulf %274, %282 : vector<8x128xf32>
    %284 = arith.index_cast %c7_i32 : i32 to index
    %c0_80 = arith.constant 0 : index
    %c0_81 = arith.constant 0 : index
    %285 = vector.load %arg6[%284, %c0_80, %c0_81] : memref<8x8x128xf32, #tpu.memory_space<vmem>>, vector<1x8x128xf32>
    %286 = vector.shape_cast %285 : vector<1x8x128xf32> to vector<8x128xf32>
    %287 = vector.shape_cast %283 : vector<8x128xf32> to vector<1x8x128xf32>
    tpu.vector_store %arg6[%284, %c0_80, %c0_81], %287 {strides = array<i32>} : memref<8x8x128xf32, #tpu.memory_space<vmem>>, vector<1x8x128xf32>,
    %c8_i32 = arith.constant 8 : i32
    %c0_82 = arith.constant 0 : index
    %c0_83 = arith.constant 0 : index
    %288 = vector.load %arg7[%c0_82, %c0_83] : memref<8x128xf32, #tpu.memory_space<vmem>>, vector<8x128xf32>
    tpu.vector_store %arg7[%c0_82, %c0_83], %283 {strides = array<i32>} : memref<8x128xf32, #tpu.memory_space<vmem>>, vector<8x128xf32>,
    %c0_84 = arith.constant 0 : index
    %c0_85 = arith.constant 0 : index
    %289 = vector.load %arg8[%c0_84, %c0_85] : memref<8x128xf32, #tpu.memory_space<vmem>>, vector<8x128xf32>
    tpu.vector_store %arg8[%c0_84, %c0_85], %279 {strides = array<i32>} : memref<8x128xf32, #tpu.memory_space<vmem>>, vector<8x128xf32>,
    return
  }
  func.func @transform_0(%arg0: i32, %arg1: i32) -> (i32, i32, i32) {
    %c0_i32 = arith.constant 0 : i32
    %c0_i32_0 = arith.constant 0 : i32
    return %arg1, %arg0, %c0_i32 : i32, i32, i32
  }
  func.func @transform_1(%arg0: i32, %arg1: i32) -> (i32, i32) {
    %c0_i32 = arith.constant 0 : i32
    %c0_i32_0 = arith.constant 0 : i32
    %c0_i32_1 = arith.constant 0 : i32
    return %c0_i32, %c0_i32_0 : i32, i32
  }
  func.func @transform_2(%arg0: i32, %arg1: i32) -> (i32, i32) {
    %c0_i32 = arith.constant 0 : i32
    %c0_i32_0 = arith.constant 0 : i32
    %c0_i32_1 = arith.constant 0 : i32
    return %c0_i32, %c0_i32_0 : i32, i32
  }
  func.func @transform_3(%arg0: i32, %arg1: i32) -> (i32, i32) {
    %c0_i32 = arith.constant 0 : i32
    %c0_i32_0 = arith.constant 0 : i32
    %c0_i32_1 = arith.constant 0 : i32
    return %c0_i32, %c0_i32_0 : i32, i32
  }
  func.func @transform_4(%arg0: i32, %arg1: i32) -> (i32, i32, i32) {
    %c0_i32 = arith.constant 0 : i32
    %c0_i32_0 = arith.constant 0 : i32
    return %arg1, %arg0, %c0_i32 : i32, i32, i32
  }
}

module attributes {stable_mosaic.version = 11 : i64} {
  func.func @_slstm_kernel(%arg0: i32, %arg1: i32, %arg2: memref<8x8x4xbf16, #tpu.memory_space<vmem>>, %arg3: memref<4x512xbf16, #tpu.memory_space<vmem>>, %arg4: memref<1x512xf32, #tpu.memory_space<vmem>>, %arg5: memref<128x512xbf16, #tpu.memory_space<vmem>>, %arg6: memref<8x8x128xf32, #tpu.memory_space<vmem>>, %arg7: memref<8x128xf32, #tpu.memory_space<vmem>>, %arg8: memref<8x128xf32, #tpu.memory_space<vmem>>) attributes {dimension_semantics = [#tpu.dimension_semantics<parallel>, #tpu.dimension_semantics<arbitrary>], iteration_bounds = array<i64: 1, 1>, scalar_prefetch = 0 : i64, scratch_operands = 2 : i64, tpu.core_type = #tpu.core_type<tc>, window_params = [{transform_indices = @transform_0, window_bounds = array<i64: 8, 8, 4>}, {pipeline_mode = #tpu.pipeline_mode<synchronous>, transform_indices = @transform_1, window_bounds = array<i64: 4, 512>}, {pipeline_mode = #tpu.pipeline_mode<synchronous>, transform_indices = @transform_2, window_bounds = array<i64: 1, 512>}, {pipeline_mode = #tpu.pipeline_mode<synchronous>, transform_indices = @transform_3, window_bounds = array<i64: 128, 512>}, {transform_indices = @transform_4, window_bounds = array<i64: 8, 8, 128>}]} {
    %c0_i32 = arith.constant 0 : i32
    %0 = arith.cmpi eq, %arg1, %c0_i32 : i32
    %1 = arith.extui %0 : i1 to i32
    %c0_i32_0 = arith.constant 0 : i32
    %2 = arith.cmpi ne, %1, %c0_i32_0 : i32
    scf.if %2 {
      %cst_86 = arith.constant 0.000000e+00 : f32
      %290 = vector.broadcast %cst_86 : f32 to vector<8x128xf32>
      %c0_87 = arith.constant 0 : index
      %c0_88 = arith.constant 0 : index
      %291 = vector.load %arg7[%c0_87, %c0_88] : memref<8x128xf32, #tpu.memory_space<vmem>>, vector<8x128xf32>
      tpu.vector_store %arg7[%c0_87, %c0_88], %290 {strides = array<i32>} : memref<8x128xf32, #tpu.memory_space<vmem>>, vector<8x128xf32>,
      %cst_89 = arith.constant 0.000000e+00 : f32
      %292 = vector.broadcast %cst_89 : f32 to vector<8x128xf32>
      %c0_90 = arith.constant 0 : index
      %c0_91 = arith.constant 0 : index
      %293 = vector.load %arg8[%c0_90, %c0_91] : memref<8x128xf32, #tpu.memory_space<vmem>>, vector<8x128xf32>
      tpu.vector_store %arg8[%c0_90, %c0_91], %292 {strides = array<i32>} : memref<8x128xf32, #tpu.memory_space<vmem>>, vector<8x128xf32>,
    } else {
    }
    %c0 = arith.constant 0 : index
    %c0_1 = arith.constant 0 : index
    %3 = vector.load %arg3[%c0, %c0_1] : memref<4x512xbf16, #tpu.memory_space<vmem>>, vector<4x512xbf16>
    %c0_2 = arith.constant 0 : index
    %c0_3 = arith.constant 0 : index
    %4 = vector.load %arg5[%c0_2, %c0_3] : memref<128x512xbf16, #tpu.memory_space<vmem>>, vector<128x512xbf16>
    %c0_4 = arith.constant 0 : index
    %c0_5 = arith.constant 0 : index
    %5 = vector.load %arg4[%c0_4, %c0_5] : memref<1x512xf32, #tpu.memory_space<vmem>>, vector<1x512xf32>
    %c0_6 = arith.constant 0 : index
    %c0_7 = arith.constant 0 : index
    %6 = vector.load %arg7[%c0_6, %c0_7] : memref<8x128xf32, #tpu.memory_space<vmem>>, vector<8x128xf32>
    %c0_8 = arith.constant 0 : index
    %c0_9 = arith.constant 0 : index
    %7 = vector.load %arg8[%c0_8, %c0_9] : memref<8x128xf32, #tpu.memory_space<vmem>>, vector<8x128xf32>
    %c0_i32_10 = arith.constant 0 : i32
    %8 = arith.index_cast %c0_i32_10 : i32 to index
    %c0_11 = arith.constant 0 : index
    %c0_12 = arith.constant 0 : index
    %9 = vector.load %arg2[%8, %c0_11, %c0_12] : memref<8x8x4xbf16, #tpu.memory_space<vmem>>, vector<1x8x4xbf16>
    %10 = vector.shape_cast %9 : vector<1x8x4xbf16> to vector<8x4xbf16>
    %cst = arith.constant dense<0.000000e+00> : vector<8x512xf32>
    %11 = tpu.matmul %10, %3, %cst {dimension_numbers = #tpu.dot_dimension_numbers<[1], [0], [0], [1], [0, 0, 1, 1], [], []>} : vector<8x4xbf16>, vector<4x512xbf16>, vector<8x512xf32> -> vector<8x512xf32>
    %12 = arith.truncf %6 : vector<8x128xf32> to vector<8x128xbf16>
    %cst_13 = arith.constant dense<0.000000e+00> : vector<8x512xf32>
    %13 = tpu.matmul %12, %4, %cst_13 {dimension_numbers = #tpu.dot_dimension_numbers<[1], [0], [0], [1], [0, 0, 1, 1], [], []>} : vector<8x128xbf16>, vector<128x512xbf16>, vector<8x512xf32> -> vector<8x512xf32>
    %14 = arith.addf %11, %13 : vector<8x512xf32>
    %15 = vector.broadcast %5 : vector<1x512xf32> to vector<8x512xf32>
    %16 = arith.addf %14, %15 : vector<8x512xf32>
    %17 = vector.extract_strided_slice %16 {offsets = [0, 0], sizes = [8, 128], strides = [1, 1]} : vector<8x512xf32> to vector<8x128xf32>
    %18 = arith.negf %17 : vector<8x128xf32>
    %19 = math.exp %18 : vector<8x128xf32>
    %cst_14 = arith.constant 1.000000e+00 : f32
    %20 = vector.broadcast %cst_14 : f32 to vector<8x128xf32>
    %21 = arith.addf %20, %19 : vector<8x128xf32>
    %22 = arith.divf %20, %21 : vector<8x128xf32>
    %23 = vector.extract_strided_slice %16 {offsets = [0, 128], sizes = [8, 128], strides = [1, 1]} : vector<8x512xf32> to vector<8x128xf32>
    %24 = arith.negf %23 : vector<8x128xf32>
    %25 = math.exp %24 : vector<8x128xf32>
    %cst_15 = arith.constant 1.000000e+00 : f32
    %26 = vector.broadcast %cst_15 : f32 to vector<8x128xf32>
    %27 = arith.addf %26, %25 : vector<8x128xf32>
    %28 = arith.divf %26, %27 : vector<8x128xf32>
    %29 = vector.extract_strided_slice %16 {offsets = [0, 256], sizes = [8, 128], strides = [1, 1]} : vector<8x512xf32> to vector<8x128xf32>
    %30 = vector.extract_strided_slice %16 {offsets = [0, 384], sizes = [8, 128], strides = [1, 1]} : vector<8x512xf32> to vector<8x128xf32>
    %31 = math.tanh %30 : vector<8x128xf32>
    %32 = arith.mulf %22, %7 : vector<8x128xf32>
    %33 = arith.mulf %28, %31 : vector<8x128xf32>
    %34 = arith.addf %32, %33 : vector<8x128xf32>
    %35 = math.tanh %34 : vector<8x128xf32>
    %cst_16 = arith.constant 1.000000e+00 : f32
    %36 = vector.broadcast %cst_16 : f32 to vector<8x128xf32>
    %37 = arith.addf %35, %36 : vector<8x128xf32>
    %38 = arith.mulf %29, %37 : vector<8x128xf32>
    %39 = arith.index_cast %c0_i32_10 : i32 to index
    %c0_17 = arith.constant 0 : index
    %c0_18 = arith.constant 0 : index
    %40 = vector.load %arg6[%39, %c0_17, %c0_18] : memref<8x8x128xf32, #tpu.memory_space<vmem>>, vector<1x8x128xf32>
    %41 = vector.shape_cast %40 : vector<1x8x128xf32> to vector<8x128xf32>
    %42 = vector.shape_cast %38 : vector<8x128xf32> to vector<1x8x128xf32>
    tpu.vector_store %arg6[%39, %c0_17, %c0_18], %42 {strides = array<i32>} : memref<8x8x128xf32, #tpu.memory_space<vmem>>, vector<1x8x128xf32>,
    %c1_i32 = arith.constant 1 : i32
    %43 = arith.index_cast %c1_i32 : i32 to index
    %c0_19 = arith.constant 0 : index
    %c0_20 = arith.constant 0 : index
    %44 = vector.load %arg2[%43, %c0_19, %c0_20] : memref<8x8x4xbf16, #tpu.memory_space<vmem>>, vector<1x8x4xbf16>
    %45 = vector.shape_cast %44 : vector<1x8x4xbf16> to vector<8x4xbf16>
    %cst_21 = arith.constant dense<0.000000e+00> : vector<8x512xf32>
    %46 = tpu.matmul %45, %3, %cst_21 {dimension_numbers = #tpu.dot_dimension_numbers<[1], [0], [0], [1], [0, 0, 1, 1], [], []>} : vector<8x4xbf16>, vector<4x512xbf16>, vector<8x512xf32> -> vector<8x512xf32>
    %47 = arith.truncf %38 : vector<8x128xf32> to vector<8x128xbf16>
    %cst_22 = arith.constant dense<0.000000e+00> : vector<8x512xf32>
    %48 = tpu.matmul %47, %4, %cst_22 {dimension_numbers = #tpu.dot_dimension_numbers<[1], [0], [0], [1], [0, 0, 1, 1], [], []>} : vector<8x128xbf16>, vector<128x512xbf16>, vector<8x512xf32> -> vector<8x512xf32>
    %49 = arith.addf %46, %48 : vector<8x512xf32>
    %50 = vector.broadcast %5 : vector<1x512xf32> to vector<8x512xf32>
    %51 = arith.addf %49, %50 : vector<8x512xf32>
    %52 = vector.extract_strided_slice %51 {offsets = [0, 0], sizes = [8, 128], strides = [1, 1]} : vector<8x512xf32> to vector<8x128xf32>
    %53 = arith.negf %52 : vector<8x128xf32>
    %54 = math.exp %53 : vector<8x128xf32>
    %cst_23 = arith.constant 1.000000e+00 : f32
    %55 = vector.broadcast %cst_23 : f32 to vector<8x128xf32>
    %56 = arith.addf %55, %54 : vector<8x128xf32>
    %57 = arith.divf %55, %56 : vector<8x128xf32>
    %58 = vector.extract_strided_slice %51 {offsets = [0, 128], sizes = [8, 128], strides = [1, 1]} : vector<8x512xf32> to vector<8x128xf32>
    %59 = arith.negf %58 : vector<8x128xf32>
    %60 = math.exp %59 : vector<8x128xf32>
    %cst_24 = arith.constant 1.000000e+00 : f32
    %61 = vector.broadcast %cst_24 : f32 to vector<8x128xf32>
    %62 = arith.addf %61, %60 : vector<8x128xf32>
    %63 = arith.divf %61, %62 : vector<8x128xf32>
    %64 = vector.extract_strided_slice %51 {offsets = [0, 256], sizes = [8, 128], strides = [1, 1]} : vector<8x512xf32> to vector<8x128xf32>
    %65 = vector.extract_strided_slice %51 {offsets = [0, 384], sizes = [8, 128], strides = [1, 1]} : vector<8x512xf32> to vector<8x128xf32>
    %66 = math.tanh %65 : vector<8x128xf32>
    %67 = arith.mulf %57, %34 : vector<8x128xf32>
    %68 = arith.mulf %63, %66 : vector<8x128xf32>
    %69 = arith.addf %67, %68 : vector<8x128xf32>
    %70 = math.tanh %69 : vector<8x128xf32>
    %cst_25 = arith.constant 1.000000e+00 : f32
    %71 = vector.broadcast %cst_25 : f32 to vector<8x128xf32>
    %72 = arith.addf %70, %71 : vector<8x128xf32>
    %73 = arith.mulf %64, %72 : vector<8x128xf32>
    %74 = arith.index_cast %c1_i32 : i32 to index
    %c0_26 = arith.constant 0 : index
    %c0_27 = arith.constant 0 : index
    %75 = vector.load %arg6[%74, %c0_26, %c0_27] : memref<8x8x128xf32, #tpu.memory_space<vmem>>, vector<1x8x128xf32>
    %76 = vector.shape_cast %75 : vector<1x8x128xf32> to vector<8x128xf32>
    %77 = vector.shape_cast %73 : vector<8x128xf32> to vector<1x8x128xf32>
    tpu.vector_store %arg6[%74, %c0_26, %c0_27], %77 {strides = array<i32>} : memref<8x8x128xf32, #tpu.memory_space<vmem>>, vector<1x8x128xf32>,
    %c2_i32 = arith.constant 2 : i32
    %78 = arith.index_cast %c2_i32 : i32 to index
    %c0_28 = arith.constant 0 : index
    %c0_29 = arith.constant 0 : index
    %79 = vector.load %arg2[%78, %c0_28, %c0_29] : memref<8x8x4xbf16, #tpu.memory_space<vmem>>, vector<1x8x4xbf16>
    %80 = vector.shape_cast %79 : vector<1x8x4xbf16> to vector<8x4xbf16>
    %cst_30 = arith.constant dense<0.000000e+00> : vector<8x512xf32>
    %81 = tpu.matmul %80, %3, %cst_30 {dimension_numbers = #tpu.dot_dimension_numbers<[1], [0], [0], [1], [0, 0, 1, 1], [], []>} : vector<8x4xbf16>, vector<4x512xbf16>, vector<8x512xf32> -> vector<8x512xf32>
    %82 = arith.truncf %73 : vector<8x128xf32> to vector<8x128xbf16>
    %cst_31 = arith.constant dense<0.000000e+00> : vector<8x512xf32>
    %83 = tpu.matmul %82, %4, %cst_31 {dimension_numbers = #tpu.dot_dimension_numbers<[1], [0], [0], [1], [0, 0, 1, 1], [], []>} : vector<8x128xbf16>, vector<128x512xbf16>, vector<8x512xf32> -> vector<8x512xf32>
    %84 = arith.addf %81, %83 : vector<8x512xf32>
    %85 = vector.broadcast %5 : vector<1x512xf32> to vector<8x512xf32>
    %86 = arith.addf %84, %85 : vector<8x512xf32>
    %87 = vector.extract_strided_slice %86 {offsets = [0, 0], sizes = [8, 128], strides = [1, 1]} : vector<8x512xf32> to vector<8x128xf32>
    %88 = arith.negf %87 : vector<8x128xf32>
    %89 = math.exp %88 : vector<8x128xf32>
    %cst_32 = arith.constant 1.000000e+00 : f32
    %90 = vector.broadcast %cst_32 : f32 to vector<8x128xf32>
    %91 = arith.addf %90, %89 : vector<8x128xf32>
    %92 = arith.divf %90, %91 : vector<8x128xf32>
    %93 = vector.extract_strided_slice %86 {offsets = [0, 128], sizes = [8, 128], strides = [1, 1]} : vector<8x512xf32> to vector<8x128xf32>
    %94 = arith.negf %93 : vector<8x128xf32>
    %95 = math.exp %94 : vector<8x128xf32>
    %cst_33 = arith.constant 1.000000e+00 : f32
    %96 = vector.broadcast %cst_33 : f32 to vector<8x128xf32>
    %97 = arith.addf %96, %95 : vector<8x128xf32>
    %98 = arith.divf %96, %97 : vector<8x128xf32>
    %99 = vector.extract_strided_slice %86 {offsets = [0, 256], sizes = [8, 128], strides = [1, 1]} : vector<8x512xf32> to vector<8x128xf32>
    %100 = vector.extract_strided_slice %86 {offsets = [0, 384], sizes = [8, 128], strides = [1, 1]} : vector<8x512xf32> to vector<8x128xf32>
    %101 = math.tanh %100 : vector<8x128xf32>
    %102 = arith.mulf %92, %69 : vector<8x128xf32>
    %103 = arith.mulf %98, %101 : vector<8x128xf32>
    %104 = arith.addf %102, %103 : vector<8x128xf32>
    %105 = math.tanh %104 : vector<8x128xf32>
    %cst_34 = arith.constant 1.000000e+00 : f32
    %106 = vector.broadcast %cst_34 : f32 to vector<8x128xf32>
    %107 = arith.addf %105, %106 : vector<8x128xf32>
    %108 = arith.mulf %99, %107 : vector<8x128xf32>
    %109 = arith.index_cast %c2_i32 : i32 to index
    %c0_35 = arith.constant 0 : index
    %c0_36 = arith.constant 0 : index
    %110 = vector.load %arg6[%109, %c0_35, %c0_36] : memref<8x8x128xf32, #tpu.memory_space<vmem>>, vector<1x8x128xf32>
    %111 = vector.shape_cast %110 : vector<1x8x128xf32> to vector<8x128xf32>
    %112 = vector.shape_cast %108 : vector<8x128xf32> to vector<1x8x128xf32>
    tpu.vector_store %arg6[%109, %c0_35, %c0_36], %112 {strides = array<i32>} : memref<8x8x128xf32, #tpu.memory_space<vmem>>, vector<1x8x128xf32>,
    %c3_i32 = arith.constant 3 : i32
    %113 = arith.index_cast %c3_i32 : i32 to index
    %c0_37 = arith.constant 0 : index
    %c0_38 = arith.constant 0 : index
    %114 = vector.load %arg2[%113, %c0_37, %c0_38] : memref<8x8x4xbf16, #tpu.memory_space<vmem>>, vector<1x8x4xbf16>
    %115 = vector.shape_cast %114 : vector<1x8x4xbf16> to vector<8x4xbf16>
    %cst_39 = arith.constant dense<0.000000e+00> : vector<8x512xf32>
    %116 = tpu.matmul %115, %3, %cst_39 {dimension_numbers = #tpu.dot_dimension_numbers<[1], [0], [0], [1], [0, 0, 1, 1], [], []>} : vector<8x4xbf16>, vector<4x512xbf16>, vector<8x512xf32> -> vector<8x512xf32>
    %117 = arith.truncf %108 : vector<8x128xf32> to vector<8x128xbf16>
    %cst_40 = arith.constant dense<0.000000e+00> : vector<8x512xf32>
    %118 = tpu.matmul %117, %4, %cst_40 {dimension_numbers = #tpu.dot_dimension_numbers<[1], [0], [0], [1], [0, 0, 1, 1], [], []>} : vector<8x128xbf16>, vector<128x512xbf16>, vector<8x512xf32> -> vector<8x512xf32>
    %119 = arith.addf %116, %118 : vector<8x512xf32>
    %120 = vector.broadcast %5 : vector<1x512xf32> to vector<8x512xf32>
    %121 = arith.addf %119, %120 : vector<8x512xf32>
    %122 = vector.extract_strided_slice %121 {offsets = [0, 0], sizes = [8, 128], strides = [1, 1]} : vector<8x512xf32> to vector<8x128xf32>
    %123 = arith.negf %122 : vector<8x128xf32>
    %124 = math.exp %123 : vector<8x128xf32>
    %cst_41 = arith.constant 1.000000e+00 : f32
    %125 = vector.broadcast %cst_41 : f32 to vector<8x128xf32>
    %126 = arith.addf %125, %124 : vector<8x128xf32>
    %127 = arith.divf %125, %126 : vector<8x128xf32>
    %128 = vector.extract_strided_slice %121 {offsets = [0, 128], sizes = [8, 128], strides = [1, 1]} : vector<8x512xf32> to vector<8x128xf32>
    %129 = arith.negf %128 : vector<8x128xf32>
    %130 = math.exp %129 : vector<8x128xf32>
    %cst_42 = arith.constant 1.000000e+00 : f32
    %131 = vector.broadcast %cst_42 : f32 to vector<8x128xf32>
    %132 = arith.addf %131, %130 : vector<8x128xf32>
    %133 = arith.divf %131, %132 : vector<8x128xf32>
    %134 = vector.extract_strided_slice %121 {offsets = [0, 256], sizes = [8, 128], strides = [1, 1]} : vector<8x512xf32> to vector<8x128xf32>
    %135 = vector.extract_strided_slice %121 {offsets = [0, 384], sizes = [8, 128], strides = [1, 1]} : vector<8x512xf32> to vector<8x128xf32>
    %136 = math.tanh %135 : vector<8x128xf32>
    %137 = arith.mulf %127, %104 : vector<8x128xf32>
    %138 = arith.mulf %133, %136 : vector<8x128xf32>
    %139 = arith.addf %137, %138 : vector<8x128xf32>
    %140 = math.tanh %139 : vector<8x128xf32>
    %cst_43 = arith.constant 1.000000e+00 : f32
    %141 = vector.broadcast %cst_43 : f32 to vector<8x128xf32>
    %142 = arith.addf %140, %141 : vector<8x128xf32>
    %143 = arith.mulf %134, %142 : vector<8x128xf32>
    %144 = arith.index_cast %c3_i32 : i32 to index
    %c0_44 = arith.constant 0 : index
    %c0_45 = arith.constant 0 : index
    %145 = vector.load %arg6[%144, %c0_44, %c0_45] : memref<8x8x128xf32, #tpu.memory_space<vmem>>, vector<1x8x128xf32>
    %146 = vector.shape_cast %145 : vector<1x8x128xf32> to vector<8x128xf32>
    %147 = vector.shape_cast %143 : vector<8x128xf32> to vector<1x8x128xf32>
    tpu.vector_store %arg6[%144, %c0_44, %c0_45], %147 {strides = array<i32>} : memref<8x8x128xf32, #tpu.memory_space<vmem>>, vector<1x8x128xf32>,
    %c4_i32 = arith.constant 4 : i32
    %148 = arith.index_cast %c4_i32 : i32 to index
    %c0_46 = arith.constant 0 : index
    %c0_47 = arith.constant 0 : index
    %149 = vector.load %arg2[%148, %c0_46, %c0_47] : memref<8x8x4xbf16, #tpu.memory_space<vmem>>, vector<1x8x4xbf16>
    %150 = vector.shape_cast %149 : vector<1x8x4xbf16> to vector<8x4xbf16>
    %cst_48 = arith.constant dense<0.000000e+00> : vector<8x512xf32>
    %151 = tpu.matmul %150, %3, %cst_48 {dimension_numbers = #tpu.dot_dimension_numbers<[1], [0], [0], [1], [0, 0, 1, 1], [], []>} : vector<8x4xbf16>, vector<4x512xbf16>, vector<8x512xf32> -> vector<8x512xf32>
    %152 = arith.truncf %143 : vector<8x128xf32> to vector<8x128xbf16>
    %cst_49 = arith.constant dense<0.000000e+00> : vector<8x512xf32>
    %153 = tpu.matmul %152, %4, %cst_49 {dimension_numbers = #tpu.dot_dimension_numbers<[1], [0], [0], [1], [0, 0, 1, 1], [], []>} : vector<8x128xbf16>, vector<128x512xbf16>, vector<8x512xf32> -> vector<8x512xf32>
    %154 = arith.addf %151, %153 : vector<8x512xf32>
    %155 = vector.broadcast %5 : vector<1x512xf32> to vector<8x512xf32>
    %156 = arith.addf %154, %155 : vector<8x512xf32>
    %157 = vector.extract_strided_slice %156 {offsets = [0, 0], sizes = [8, 128], strides = [1, 1]} : vector<8x512xf32> to vector<8x128xf32>
    %158 = arith.negf %157 : vector<8x128xf32>
    %159 = math.exp %158 : vector<8x128xf32>
    %cst_50 = arith.constant 1.000000e+00 : f32
    %160 = vector.broadcast %cst_50 : f32 to vector<8x128xf32>
    %161 = arith.addf %160, %159 : vector<8x128xf32>
    %162 = arith.divf %160, %161 : vector<8x128xf32>
    %163 = vector.extract_strided_slice %156 {offsets = [0, 128], sizes = [8, 128], strides = [1, 1]} : vector<8x512xf32> to vector<8x128xf32>
    %164 = arith.negf %163 : vector<8x128xf32>
    %165 = math.exp %164 : vector<8x128xf32>
    %cst_51 = arith.constant 1.000000e+00 : f32
    %166 = vector.broadcast %cst_51 : f32 to vector<8x128xf32>
    %167 = arith.addf %166, %165 : vector<8x128xf32>
    %168 = arith.divf %166, %167 : vector<8x128xf32>
    %169 = vector.extract_strided_slice %156 {offsets = [0, 256], sizes = [8, 128], strides = [1, 1]} : vector<8x512xf32> to vector<8x128xf32>
    %170 = vector.extract_strided_slice %156 {offsets = [0, 384], sizes = [8, 128], strides = [1, 1]} : vector<8x512xf32> to vector<8x128xf32>
    %171 = math.tanh %170 : vector<8x128xf32>
    %172 = arith.mulf %162, %139 : vector<8x128xf32>
    %173 = arith.mulf %168, %171 : vector<8x128xf32>
    %174 = arith.addf %172, %173 : vector<8x128xf32>
    %175 = math.tanh %174 : vector<8x128xf32>
    %cst_52 = arith.constant 1.000000e+00 : f32
    %176 = vector.broadcast %cst_52 : f32 to vector<8x128xf32>
    %177 = arith.addf %175, %176 : vector<8x128xf32>
    %178 = arith.mulf %169, %177 : vector<8x128xf32>
    %179 = arith.index_cast %c4_i32 : i32 to index
    %c0_53 = arith.constant 0 : index
    %c0_54 = arith.constant 0 : index
    %180 = vector.load %arg6[%179, %c0_53, %c0_54] : memref<8x8x128xf32, #tpu.memory_space<vmem>>, vector<1x8x128xf32>
    %181 = vector.shape_cast %180 : vector<1x8x128xf32> to vector<8x128xf32>
    %182 = vector.shape_cast %178 : vector<8x128xf32> to vector<1x8x128xf32>
    tpu.vector_store %arg6[%179, %c0_53, %c0_54], %182 {strides = array<i32>} : memref<8x8x128xf32, #tpu.memory_space<vmem>>, vector<1x8x128xf32>,
    %c5_i32 = arith.constant 5 : i32
    %183 = arith.index_cast %c5_i32 : i32 to index
    %c0_55 = arith.constant 0 : index
    %c0_56 = arith.constant 0 : index
    %184 = vector.load %arg2[%183, %c0_55, %c0_56] : memref<8x8x4xbf16, #tpu.memory_space<vmem>>, vector<1x8x4xbf16>
    %185 = vector.shape_cast %184 : vector<1x8x4xbf16> to vector<8x4xbf16>
    %cst_57 = arith.constant dense<0.000000e+00> : vector<8x512xf32>
    %186 = tpu.matmul %185, %3, %cst_57 {dimension_numbers = #tpu.dot_dimension_numbers<[1], [0], [0], [1], [0, 0, 1, 1], [], []>} : vector<8x4xbf16>, vector<4x512xbf16>, vector<8x512xf32> -> vector<8x512xf32>
    %187 = arith.truncf %178 : vector<8x128xf32> to vector<8x128xbf16>
    %cst_58 = arith.constant dense<0.000000e+00> : vector<8x512xf32>
    %188 = tpu.matmul %187, %4, %cst_58 {dimension_numbers = #tpu.dot_dimension_numbers<[1], [0], [0], [1], [0, 0, 1, 1], [], []>} : vector<8x128xbf16>, vector<128x512xbf16>, vector<8x512xf32> -> vector<8x512xf32>
    %189 = arith.addf %186, %188 : vector<8x512xf32>
    %190 = vector.broadcast %5 : vector<1x512xf32> to vector<8x512xf32>
    %191 = arith.addf %189, %190 : vector<8x512xf32>
    %192 = vector.extract_strided_slice %191 {offsets = [0, 0], sizes = [8, 128], strides = [1, 1]} : vector<8x512xf32> to vector<8x128xf32>
    %193 = arith.negf %192 : vector<8x128xf32>
    %194 = math.exp %193 : vector<8x128xf32>
    %cst_59 = arith.constant 1.000000e+00 : f32
    %195 = vector.broadcast %cst_59 : f32 to vector<8x128xf32>
    %196 = arith.addf %195, %194 : vector<8x128xf32>
    %197 = arith.divf %195, %196 : vector<8x128xf32>
    %198 = vector.extract_strided_slice %191 {offsets = [0, 128], sizes = [8, 128], strides = [1, 1]} : vector<8x512xf32> to vector<8x128xf32>
    %199 = arith.negf %198 : vector<8x128xf32>
    %200 = math.exp %199 : vector<8x128xf32>
    %cst_60 = arith.constant 1.000000e+00 : f32
    %201 = vector.broadcast %cst_60 : f32 to vector<8x128xf32>
    %202 = arith.addf %201, %200 : vector<8x128xf32>
    %203 = arith.divf %201, %202 : vector<8x128xf32>
    %204 = vector.extract_strided_slice %191 {offsets = [0, 256], sizes = [8, 128], strides = [1, 1]} : vector<8x512xf32> to vector<8x128xf32>
    %205 = vector.extract_strided_slice %191 {offsets = [0, 384], sizes = [8, 128], strides = [1, 1]} : vector<8x512xf32> to vector<8x128xf32>
    %206 = math.tanh %205 : vector<8x128xf32>
    %207 = arith.mulf %197, %174 : vector<8x128xf32>
    %208 = arith.mulf %203, %206 : vector<8x128xf32>
    %209 = arith.addf %207, %208 : vector<8x128xf32>
    %210 = math.tanh %209 : vector<8x128xf32>
    %cst_61 = arith.constant 1.000000e+00 : f32
    %211 = vector.broadcast %cst_61 : f32 to vector<8x128xf32>
    %212 = arith.addf %210, %211 : vector<8x128xf32>
    %213 = arith.mulf %204, %212 : vector<8x128xf32>
    %214 = arith.index_cast %c5_i32 : i32 to index
    %c0_62 = arith.constant 0 : index
    %c0_63 = arith.constant 0 : index
    %215 = vector.load %arg6[%214, %c0_62, %c0_63] : memref<8x8x128xf32, #tpu.memory_space<vmem>>, vector<1x8x128xf32>
    %216 = vector.shape_cast %215 : vector<1x8x128xf32> to vector<8x128xf32>
    %217 = vector.shape_cast %213 : vector<8x128xf32> to vector<1x8x128xf32>
    tpu.vector_store %arg6[%214, %c0_62, %c0_63], %217 {strides = array<i32>} : memref<8x8x128xf32, #tpu.memory_space<vmem>>, vector<1x8x128xf32>,
    %c6_i32 = arith.constant 6 : i32
    %218 = arith.index_cast %c6_i32 : i32 to index
    %c0_64 = arith.constant 0 : index
    %c0_65 = arith.constant 0 : index
    %219 = vector.load %arg2[%218, %c0_64, %c0_65] : memref<8x8x4xbf16, #tpu.memory_space<vmem>>, vector<1x8x4xbf16>
    %220 = vector.shape_cast %219 : vector<1x8x4xbf16> to vector<8x4xbf16>
    %cst_66 = arith.constant dense<0.000000e+00> : vector<8x512xf32>
    %221 = tpu.matmul %220, %3, %cst_66 {dimension_numbers = #tpu.dot_dimension_numbers<[1], [0], [0], [1], [0, 0, 1, 1], [], []>} : vector<8x4xbf16>, vector<4x512xbf16>, vector<8x512xf32> -> vector<8x512xf32>
    %222 = arith.truncf %213 : vector<8x128xf32> to vector<8x128xbf16>
    %cst_67 = arith.constant dense<0.000000e+00> : vector<8x512xf32>
    %223 = tpu.matmul %222, %4, %cst_67 {dimension_numbers = #tpu.dot_dimension_numbers<[1], [0], [0], [1], [0, 0, 1, 1], [], []>} : vector<8x128xbf16>, vector<128x512xbf16>, vector<8x512xf32> -> vector<8x512xf32>
    %224 = arith.addf %221, %223 : vector<8x512xf32>
    %225 = vector.broadcast %5 : vector<1x512xf32> to vector<8x512xf32>
    %226 = arith.addf %224, %225 : vector<8x512xf32>
    %227 = vector.extract_strided_slice %226 {offsets = [0, 0], sizes = [8, 128], strides = [1, 1]} : vector<8x512xf32> to vector<8x128xf32>
    %228 = arith.negf %227 : vector<8x128xf32>
    %229 = math.exp %228 : vector<8x128xf32>
    %cst_68 = arith.constant 1.000000e+00 : f32
    %230 = vector.broadcast %cst_68 : f32 to vector<8x128xf32>
    %231 = arith.addf %230, %229 : vector<8x128xf32>
    %232 = arith.divf %230, %231 : vector<8x128xf32>
    %233 = vector.extract_strided_slice %226 {offsets = [0, 128], sizes = [8, 128], strides = [1, 1]} : vector<8x512xf32> to vector<8x128xf32>
    %234 = arith.negf %233 : vector<8x128xf32>
    %235 = math.exp %234 : vector<8x128xf32>
    %cst_69 = arith.constant 1.000000e+00 : f32
    %236 = vector.broadcast %cst_69 : f32 to vector<8x128xf32>
    %237 = arith.addf %236, %235 : vector<8x128xf32>
    %238 = arith.divf %236, %237 : vector<8x128xf32>
    %239 = vector.extract_strided_slice %226 {offsets = [0, 256], sizes = [8, 128], strides = [1, 1]} : vector<8x512xf32> to vector<8x128xf32>
    %240 = vector.extract_strided_slice %226 {offsets = [0, 384], sizes = [8, 128], strides = [1, 1]} : vector<8x512xf32> to vector<8x128xf32>
    %241 = math.tanh %240 : vector<8x128xf32>
    %242 = arith.mulf %232, %209 : vector<8x128xf32>
    %243 = arith.mulf %238, %241 : vector<8x128xf32>
    %244 = arith.addf %242, %243 : vector<8x128xf32>
    %245 = math.tanh %244 : vector<8x128xf32>
    %cst_70 = arith.constant 1.000000e+00 : f32
    %246 = vector.broadcast %cst_70 : f32 to vector<8x128xf32>
    %247 = arith.addf %245, %246 : vector<8x128xf32>
    %248 = arith.mulf %239, %247 : vector<8x128xf32>
    %249 = arith.index_cast %c6_i32 : i32 to index
    %c0_71 = arith.constant 0 : index
    %c0_72 = arith.constant 0 : index
    %250 = vector.load %arg6[%249, %c0_71, %c0_72] : memref<8x8x128xf32, #tpu.memory_space<vmem>>, vector<1x8x128xf32>
    %251 = vector.shape_cast %250 : vector<1x8x128xf32> to vector<8x128xf32>
    %252 = vector.shape_cast %248 : vector<8x128xf32> to vector<1x8x128xf32>
    tpu.vector_store %arg6[%249, %c0_71, %c0_72], %252 {strides = array<i32>} : memref<8x8x128xf32, #tpu.memory_space<vmem>>, vector<1x8x128xf32>,
    %c7_i32 = arith.constant 7 : i32
    %253 = arith.index_cast %c7_i32 : i32 to index
    %c0_73 = arith.constant 0 : index
    %c0_74 = arith.constant 0 : index
    %254 = vector.load %arg2[%253, %c0_73, %c0_74] : memref<8x8x4xbf16, #tpu.memory_space<vmem>>, vector<1x8x4xbf16>
    %255 = vector.shape_cast %254 : vector<1x8x4xbf16> to vector<8x4xbf16>
    %cst_75 = arith.constant dense<0.000000e+00> : vector<8x512xf32>
    %256 = tpu.matmul %255, %3, %cst_75 {dimension_numbers = #tpu.dot_dimension_numbers<[1], [0], [0], [1], [0, 0, 1, 1], [], []>} : vector<8x4xbf16>, vector<4x512xbf16>, vector<8x512xf32> -> vector<8x512xf32>
    %257 = arith.truncf %248 : vector<8x128xf32> to vector<8x128xbf16>
    %cst_76 = arith.constant dense<0.000000e+00> : vector<8x512xf32>
    %258 = tpu.matmul %257, %4, %cst_76 {dimension_numbers = #tpu.dot_dimension_numbers<[1], [0], [0], [1], [0, 0, 1, 1], [], []>} : vector<8x128xbf16>, vector<128x512xbf16>, vector<8x512xf32> -> vector<8x512xf32>
    %259 = arith.addf %256, %258 : vector<8x512xf32>
    %260 = vector.broadcast %5 : vector<1x512xf32> to vector<8x512xf32>
    %261 = arith.addf %259, %260 : vector<8x512xf32>
    %262 = vector.extract_strided_slice %261 {offsets = [0, 0], sizes = [8, 128], strides = [1, 1]} : vector<8x512xf32> to vector<8x128xf32>
    %263 = arith.negf %262 : vector<8x128xf32>
    %264 = math.exp %263 : vector<8x128xf32>
    %cst_77 = arith.constant 1.000000e+00 : f32
    %265 = vector.broadcast %cst_77 : f32 to vector<8x128xf32>
    %266 = arith.addf %265, %264 : vector<8x128xf32>
    %267 = arith.divf %265, %266 : vector<8x128xf32>
    %268 = vector.extract_strided_slice %261 {offsets = [0, 128], sizes = [8, 128], strides = [1, 1]} : vector<8x512xf32> to vector<8x128xf32>
    %269 = arith.negf %268 : vector<8x128xf32>
    %270 = math.exp %269 : vector<8x128xf32>
    %cst_78 = arith.constant 1.000000e+00 : f32
    %271 = vector.broadcast %cst_78 : f32 to vector<8x128xf32>
    %272 = arith.addf %271, %270 : vector<8x128xf32>
    %273 = arith.divf %271, %272 : vector<8x128xf32>
    %274 = vector.extract_strided_slice %261 {offsets = [0, 256], sizes = [8, 128], strides = [1, 1]} : vector<8x512xf32> to vector<8x128xf32>
    %275 = vector.extract_strided_slice %261 {offsets = [0, 384], sizes = [8, 128], strides = [1, 1]} : vector<8x512xf32> to vector<8x128xf32>
    %276 = math.tanh %275 : vector<8x128xf32>
    %277 = arith.mulf %267, %244 : vector<8x128xf32>
    %278 = arith.mulf %273, %276 : vector<8x128xf32>
    %279 = arith.addf %277, %278 : vector<8x128xf32>
    %280 = math.tanh %279 : vector<8x128xf32>
    %cst_79 = arith.constant 1.000000e+00 : f32
    %281 = vector.broadcast %cst_79 : f32 to vector<8x128xf32>
    %282 = arith.addf %280, %281 : vector<8x128xf32>
    %283 = arith.mulf %274, %282 : vector<8x128xf32>
    %284 = arith.index_cast %c7_i32 : i32 to index
    %c0_80 = arith.constant 0 : index
    %c0_81 = arith.constant 0 : index
    %285 = vector.load %arg6[%284, %c0_80, %c0_81] : memref<8x8x128xf32, #tpu.memory_space<vmem>>, vector<1x8x128xf32>
    %286 = vector.shape_cast %285 : vector<1x8x128xf32> to vector<8x128xf32>
    %287 = vector.shape_cast %283 : vector<8x128xf32> to vector<1x8x128xf32>
    tpu.vector_store %arg6[%284, %c0_80, %c0_81], %287 {strides = array<i32>} : memref<8x8x128xf32, #tpu.memory_space<vmem>>, vector<1x8x128xf32>,
    %c8_i32 = arith.constant 8 : i32
    %c0_82 = arith.constant 0 : index
    %c0_83 = arith.constant 0 : index
    %288 = vector.load %arg7[%c0_82, %c0_83] : memref<8x128xf32, #tpu.memory_space<vmem>>, vector<8x128xf32>
    tpu.vector_store %arg7[%c0_82, %c0_83], %283 {strides = array<i32>} : memref<8x128xf32, #tpu.memory_space<vmem>>, vector<8x128xf32>,
    %c0_84 = arith.constant 0 : index
    %c0_85 = arith.constant 0 : index
    %289 = vector.load %arg8[%c0_84, %c0_85] : memref<8x128xf32, #tpu.memory_space<vmem>>, vector<8x128xf32>
    tpu.vector_store %arg8[%c0_84, %c0_85], %279 {strides = array<i32>} : memref<8x128xf32, #tpu.memory_space<vmem>>, vector<8x128xf32>,
    return
  }
  func.func @transform_0(%arg0: i32, %arg1: i32) -> (i32, i32, i32) {
    %c0_i32 = arith.constant 0 : i32
    %c0_i32_0 = arith.constant 0 : i32
    return %arg1, %arg0, %c0_i32 : i32, i32, i32
  }
  func.func @transform_1(%arg0: i32, %arg1: i32) -> (i32, i32) {
    %c0_i32 = arith.constant 0 : i32
    %c0_i32_0 = arith.constant 0 : i32
    %c0_i32_1 = arith.constant 0 : i32
    return %c0_i32, %c0_i32_0 : i32, i32
  }
  func.func @transform_2(%arg0: i32, %arg1: i32) -> (i32, i32) {
    %c0_i32 = arith.constant 0 : i32
    %c0_i32_0 = arith.constant 0 : i32
    %c0_i32_1 = arith.constant 0 : i32
    return %c0_i32, %c0_i32_0 : i32, i32
  }
  func.func @transform_3(%arg0: i32, %arg1: i32) -> (i32, i32) {
    %c0_i32 = arith.constant 0 : i32
    %c0_i32_0 = arith.constant 0 : i32
    %c0_i32_1 = arith.constant 0 : i32
    return %c0_i32, %c0_i32_0 : i32, i32
  }
  func.func @transform_4(%arg0: i32, %arg1: i32) -> (i32, i32, i32) {
    %c0_i32 = arith.constant 0 : i32
    %c0_i32_0 = arith.constant 0 : i32
    return %arg1, %arg0, %c0_i32 : i32, i32, i32
  }
}

</mosaic_0001>

<bundles_post_ra>
// kernel: tpu_custom_call.1
= control target key start
LH: loop header
LB: loop body
LE: loop exit
PB: predicated region body
PF: predicated region fallthrough
CT: control target
= control target key end

     0   :  { %9 = vsyncpa [#allocation5], 0  ;;  %s2835_s0 = inlined_call_operand.vmem [shape: bf16[8,8,4], index: 0, kind: input, shape index: {}]   ;;  %s2836_s1 = inlined_call_operand.vmem [shape: bf16[4,512], index: 1, kind: input, shape index: {}]   ;;  %s2837_s2 = inlined_call_operand.vmem [shape: f32[1,512], index: 2, kind: input, shape index: {}]   ;;  %s2838_s3 = inlined_call_operand.hbm [shape: bf16[128,512], index: 3, kind: input, shape index: {}]   ;;  %s2839_s4 = inlined_call_operand.hbm [shape: f32[8,8,128], index: 4, kind: output, shape index: {}]  }
   0x1   :  { %10 = vsyncpa [#allocation6], 0  ;;  %s2186_s15 = smov [#allocation4]   ;;  %s2138_s19 = scalar_lea.hbm %s2838_s3, 4096 }
   0x2   :  { %s22_s16 = sshll.u32 %s2186_s15, 4  ;;  %p2139_p0 = scmp.ne.s32.totalorder %s2838_s3, %s2138_s19  ;;  %s23_s16 = int_to_ptr.vmem [resolvable:$true] %s22_s16 }
   0x3   :  { %p2142_p1 = scmp.lt.u32.totalorder %s2138_s19, %s2838_s3 }
   0x5   :  { %p2144_p2 = pnand %p2142_p1, %p2139_p0 }
   0x7   :  { %2147 = shalt.err (!%p2144_p2)
}
   0x8   :  { %s2148_s24 = scalar_lea.vmem %s23_s16, 4096  ;;  %p2153_p4 = scmp.lt.s32.totalorder %s23_s16, %s23_s16 }
   0x9   :  { %p2149_p3 = scmp.ne.s32.totalorder %s23_s16, %s2148_s24  ;;  %p2154_p5 = scmp.lt.s32.totalorder %s2148_s24, %s2148_s24 }
   0xb   :  { %p2155_p6 = por %p2154_p5, %p2153_p4 }
   0xd   :  { %p2156_p7 = pnand %p2155_p6, %p2149_p3 }
   0xf   :  { %2159 = shalt.err (!%p2156_p7)
}
  0x10   :  { %s2187_s25 = smov 256   ;;  %s2188_s26 = smov 16  }
  0x11   :  { %28 = dma.hbm_to_vmem [thread:$0]  %s2838_s3, 4096, %s23_s16, [#allocation5], %s2187_s25, %s2187_s25, %s2188_s26  }
  0x12   :  { %2182 = dma.done.wait [#allocation5], 4096  }
  0x13   :  { %2183 = vsyncadd [#allocation5], 4294963200  ;;  %v2189_v0 = vmov 0   ;;  %v2234_v1 = vld [vmem:[#allocation4 + $0x4] ss:$16 sps:$4 sm:$0xff]   ;;  %v324_v19 = vlaneseq  ;;  %vm341_vm0 = vcmask 1041408  }
  0x14   :  { %269 = vmatprep.mubr.bf16.mxu0 %v2189_v0  ;;  %310 = vmatprep.mubr.bf16.mxu1 %v2189_v0  ;;  %v2236_v2 = vld [vmem:[#allocation4] ss:$16 sps:$4 sm:$0xff]   ;;  %v2239_v3 = vld [vmem:[#allocation4 + $0x24] ss:$16 sps:$4 sm:$0xff]   ;;  %v2244_v5 = vld [vmem:[#allocation4 + $0xc] ss:$16 sps:$4 sm:$0xff]  }
  0x15   :  { %237 = vmatprep.subr.bf16.mxu0 %v2234_v1  ;;  %v2241_v4 = vld [vmem:[#allocation4 + $0x20] ss:$16 sps:$4 sm:$0xff]   ;;  %v2247_v6 = vld [vmem:[#allocation4 + $0x44] ss:$16 sps:$4 sm:$0xff]   ;;  %v2249_v7 = vld [vmem:[#allocation4 + $0x8] ss:$16 sps:$4 sm:$0xff]   ;;  %278 = vmatprep.subr.bf16.mxu1 %v2244_v5 }
  0x16   :  { %238 = vmatpush1.bf16.msra.mxu0 %v2236_v2  ;;  %279 = vmatpush1.bf16.msra.mxu1 %v2249_v7  ;;  %v2253_v8 = vld [vmem:[#allocation4 + $0x2c] ss:$16 sps:$4 sm:$0xff]   ;;  %v2256_v9 = vld [vmem:[#allocation4 + $0x40] ss:$16 sps:$4 sm:$0xff]   ;;  %v2258_v10 = vld [vmem:[#allocation4 + $0x64] ss:$16 sps:$4 sm:$0xff]  }
  0x17   :  { %239 = vmatprep.subr.bf16.mxu0 %v2239_v3  ;;  %v2260_v11 = vld [vmem:[#allocation4 + $0x28] ss:$16 sps:$4 sm:$0xff]   ;;  %280 = vmatprep.subr.bf16.mxu1 %v2253_v8  ;;  %v2264_v12 = vld [vmem:[#allocation4 + $0x4c] ss:$16 sps:$4 sm:$0xff]   ;;  %v2267_v13 = vld [vmem:[#allocation4 + $0x60] ss:$16 sps:$4 sm:$0xff]  }
  0x18   :  { %v2269_v14 = vld [vmem:[#allocation4 + $0x48] ss:$16 sps:$4 sm:$0xff]   ;;  %v2273_v15 = vld [vmem:[#allocation4 + $0x6c] ss:$16 sps:$4 sm:$0xff]   ;;  %v2276_v16 = vld [vmem:[#allocation4 + $0x84] ss:$16 sps:$4 sm:$0xff]  }
  0x19   :  { %v2190_v17 = vmov 1983009808   ;;  %v2279_v20 = vld [vmem:[#allocation4 + $0x68] ss:$16 sps:$4 sm:$0xff]   ;;  %v2282_v21 = vld [vmem:[#allocation4 + $0x80] ss:$16 sps:$4 sm:$0xff]  }
  0x1a   :  { %240 = vmatpush1.bf16.msra.mxu0 %v2241_v4  ;;  %281 = vmatpush1.bf16.msra.mxu1 %v2260_v11  ;;  %v322_v18 = vunpack.c.l.s4 %v2190_v17  ;;  %v2285_v22 = vld [vmem:[#allocation4 + $0x8c] ss:$16 sps:$4 sm:$0xff]   ;;  %v2288_v23 = vld [vmem:[#allocation4 + $0xa4] ss:$16 sps:$4 sm:$0xff]   ;;  %v2290_v25 = vshrl.u32 %v324_v19, 7  ;;  %v2191_v46 = vmov 0.0|0.0  }
  0x1b   :  { %241 = vmatprep.subr.bf16.mxu0 %v2247_v6  ;;  %282 = vmatprep.subr.bf16.mxu1 %v2264_v12  ;;  %v2293_v26 = vld [vmem:[#allocation4 + $0x88] ss:$16 sps:$4 sm:$0xff]   ;;  %v2296_v27 = vld [vmem:[#allocation4 + $0xa0] ss:$16 sps:$4 sm:$0xff]   ;;  %v2299_v28 = vld [vmem:[#allocation4 + $0xac] ss:$16 sps:$4 sm:$0xff]  }
  0x1c   :  { %v323_v24 = vunpack.c.0.s8 %v322_v18  ;;  %v2302_v29 = vld [vmem:[#allocation4 + $0xc4] ss:$16 sps:$4 sm:$0xff]   ;;  %v2309_v32 = vld [vmem:[#allocation4 + $0xa8] ss:$16 sps:$4 sm:$0xff]   ;;  %v2312_v33 = vld [vmem:[#allocation4 + $0xc0] ss:$16 sps:$4 sm:$0xff]  }
  0x1d   :  { %v39_v31 = vld [vmem:[%s2836_s1] sm:$0xff]  ;;  %v2315_v34 = vld [vmem:[#allocation4 + $0xcc] ss:$16 sps:$4 sm:$0xff]   ;;  %v2321_v38 = vld [vmem:[#allocation4 + $0xc8] ss:$16 sps:$4 sm:$0xff]   ;;  %vm337_vm1 = vcmask 31744  }
  0x1e   :  { %242 = vmatpush1.bf16.msra.mxu0 %v2256_v9  ;;  %283 = vmatpush1.bf16.msra.mxu1 %v2269_v14  ;;  %v326_v30 = vsub.s32 %v323_v24, %v2290_v25  ;;  %v2318_v35 = vld [vmem:[#allocation4 + $0xe4] ss:$16 sps:$4 sm:$0xff]   ;;  %v320_v37 = vcombine.high %v39_v31, %v39_v31  ;;  %v2324_v39 = vld [vmem:[#allocation4 + $0xe0] ss:$16 sps:$4 sm:$0xff]   ;;  %v2327_v40 = vld [vmem:[#allocation4 + $0xec] ss:$16 sps:$4 sm:$0xff]  }
  0x1f   :  { %243 = vmatprep.subr.bf16.mxu0 %v2258_v10  ;;  %284 = vmatprep.subr.bf16.mxu1 %v2273_v15  ;;  %v2333_v43 = vld [vmem:[#allocation4 + $0xe8] ss:$16 sps:$4 sm:$0xff]   ;;  %v75_v48 = vld [vmem:[%s2835_s0] sm:$0xf]  ;;  %v439_v53 = vsub.s32 0, %v2290_v25  ;;  %v443_v56 = vsub.s32 1, %v2290_v25 }
  0x20   :  { %v327_v36 = vrot.slane %v39_v31, %v326_v30  ;;  %v334_v42 = vrot.slane %v320_v37, %v326_v30  ;;  %v72_v55 = vld [vmem:[%s2837_s2] sm:$0xf] }
  0x21   :  { %v2402_v60 = vrot.slane %v72_v55, %v439_v53  ;;  %v2404_v62 = vrot.slane %v72_v55, %v443_v56  ;;  %v451_v56 = vsub.s32 3, %v2290_v25 }
  0x22   :  { %244 = vmatpush1.bf16.msra.mxu0 %v2267_v13  ;;  %285 = vmatpush1.bf16.msra.mxu1 %v2279_v20  ;;  %v2330_v41 = vcombine.high %v327_v36, %v327_v36  ;;  %v2340_v44 = vsel %vm341_vm0, %v327_v36, 0  ;;  %v2342_v45 = vcombine.high %v334_v42, %v334_v42  ;;  %v2348_v47 = vsel %vm341_vm0, %v334_v42, 0 }
  0x23   :  { %245 = vmatprep.subr.bf16.mxu0 %v2276_v16  ;;  %286 = vmatprep.subr.bf16.mxu1 %v2285_v22 }
  0x26   :  { %246 = vmatpush1.bf16.msra.mxu0 %v2282_v21  ;;  %287 = vmatpush1.bf16.msra.mxu1 %v2293_v26 }
  0x27   :  { %247 = vmatprep.subr.bf16.mxu0 %v2288_v23  ;;  %288 = vmatprep.subr.bf16.mxu1 %v2299_v28 }
  0x2a   :  { %248 = vmatpush1.bf16.msra.mxu0 %v2296_v27  ;;  %289 = vmatpush1.bf16.msra.mxu1 %v2309_v32 }
  0x2b   :  { %249 = vmatprep.subr.bf16.mxu0 %v2302_v29  ;;  %290 = vmatprep.subr.bf16.mxu1 %v2315_v34 }
  0x2e   :  { %250 = vmatpush1.bf16.msra.mxu0 %v2312_v33  ;;  %291 = vmatpush1.bf16.msra.mxu1 %v2321_v38 }
  0x2f   :  { %251 = vmatprep.subr.bf16.mxu0 %v2318_v35  ;;  %292 = vmatprep.subr.bf16.mxu1 %v2327_v40 }
  0x32   :  { %252 = vmatpush1.bf16.msra.mxu0 %v2324_v39  ;;  %293 = vmatpush1.bf16.msra.mxu1 %v2333_v43 }
  0x33   :  { %1897 = vmatprep.subr.msk.bf16.mxu0 %vm341_vm0, %v2330_v41  ;;  %1899 = vmatprep.subr.msk.bf16.mxu1 %vm341_vm0, %v2342_v45 }
  0x35   :  { %270 = vmatmul.mubr.bf16.vlgmr.msra.gmra.mrb[0].mxu0 %v2191_v46  ;;  %311 = vmatmul.mubr.bf16.vlgmr.msra.gmra.mrb[0].mxu1 %v2191_v46 }
  0x36   :  { %355 = vmatpush1.bf16.msra.mxu0 %v2340_v44  ;;  %386 = vmatprep.mubr.bf16.mxu0 %v2189_v0 }
  0x37   :  { %484 = vmatprep.subr.bf16.mxu0 %v2234_v1  ;;  %396 = vmatpush1.bf16.msra.mxu1 %v2348_v47 }
  0x38   :  { %427 = vmatprep.mubr.bf16.mxu1 %v2189_v0  ;;  %525 = vmatprep.subr.bf16.mxu1 %v2244_v5 }
  0x3d   :  { %1898 = vmatmul.mubr.msk.bf16.vlgmr.msra.gmra.mrb[4].mxu0 %vm337_vm1, %v75_v48  ;;  %1900 = vmatmul.mubr.msk.bf16.vlgmr.msra.gmra.mrb[4].mxu1 %vm337_vm1, %v75_v48 }
  0x3e   :  { %485 = vmatpush1.bf16.msra.mxu0 %v2236_v2  ;;  %516 = vmatprep.mubr.bf16.mxu0 %v2189_v0 }
  0x3f   :  { %486 = vmatprep.subr.bf16.mxu0 %v2239_v3  ;;  %526 = vmatpush1.bf16.msra.mxu1 %v2249_v7 }
  0x40   :  { %557 = vmatprep.mubr.bf16.mxu1 %v2189_v0  ;;  %527 = vmatprep.subr.bf16.mxu1 %v2253_v8 }
  0x42   :  { %487 = vmatpush1.bf16.msra.mxu0 %v2241_v4 }
  0x43   :  { %488 = vmatprep.subr.bf16.mxu0 %v2247_v6  ;;  %528 = vmatpush1.bf16.msra.mxu1 %v2260_v11 }
  0x44   :  { %529 = vmatprep.subr.bf16.mxu1 %v2264_v12 }
  0x46   :  { %489 = vmatpush1.bf16.msra.mxu0 %v2256_v9 }
  0x47   :  { %490 = vmatprep.subr.bf16.mxu0 %v2258_v10  ;;  %530 = vmatpush1.bf16.msra.mxu1 %v2269_v14 }
  0x48   :  { %531 = vmatprep.subr.bf16.mxu1 %v2273_v15 }
  0x4a   :  { %491 = vmatpush1.bf16.msra.mxu0 %v2267_v13 }
  0x4b   :  { %492 = vmatprep.subr.bf16.mxu0 %v2276_v16  ;;  %532 = vmatpush1.bf16.msra.mxu1 %v2279_v20 }
  0x4c   :  { %533 = vmatprep.subr.bf16.mxu1 %v2285_v22 }
  0x4e   :  { %493 = vmatpush1.bf16.msra.mxu0 %v2282_v21 }
  0x4f   :  { %494 = vmatprep.subr.bf16.mxu0 %v2288_v23  ;;  %534 = vmatpush1.bf16.msra.mxu1 %v2293_v26 }
  0x50   :  { %535 = vmatprep.subr.bf16.mxu1 %v2299_v28 }
  0x52   :  { %495 = vmatpush1.bf16.msra.mxu0 %v2296_v27 }
  0x53   :  { %496 = vmatprep.subr.bf16.mxu0 %v2302_v29  ;;  %536 = vmatpush1.bf16.msra.mxu1 %v2309_v32 }
  0x54   :  { %537 = vmatprep.subr.bf16.mxu1 %v2315_v34 }
  0x56   :  { %497 = vmatpush1.bf16.msra.mxu0 %v2312_v33 }
  0x57   :  { %498 = vmatprep.subr.bf16.mxu0 %v2318_v35  ;;  %538 = vmatpush1.bf16.msra.mxu1 %v2321_v38 }
  0x58   :  { %539 = vmatprep.subr.bf16.mxu1 %v2327_v40 }
  0x5a   :  { %499 = vmatpush1.bf16.msra.mxu0 %v2324_v39 }
  0x5b   :  { %1904 = vmatprep.subr.msk.bf16.mxu0 %vm341_vm0, %v2330_v41  ;;  %540 = vmatpush1.bf16.msra.mxu1 %v2333_v43 }
  0x5c   :  { %1906 = vmatprep.subr.msk.bf16.mxu1 %vm341_vm0, %v2342_v45 }
 0x108   :  { %v271_v49 = vpop.f32.mrb[0].mxu0  ;;  %v312_v54 = vpop.f32.mrb[0].mxu1 }
 0x109   :  { %v273_v50 = vpop.f32.mrb[1].mxu0  ;;  %v314_v57 = vpop.f32.mrb[1].mxu1 }
 0x10a   :  { %v275_v51 = vpop.f32.mrb[2].mxu0  ;;  %v316_v58 = vpop.f32.mrb[2].mxu1 }
 0x10b   :  { %v276_v52 = vpop.f32.mrb[3].mxu0  ;;  %v317_v59 = vpop.f32.mrb[3].mxu1 }
 0x110   :  { %v388_v61 = vpop.f32.mrb[4].mxu0  ;;  %v429_v31 = vpop.f32.mrb[4].mxu1 }
 0x111   :  { %v389_v63 = vadd.f32 %v388_v61, %v271_v49  ;;  %v390_v17 = vpop.f32.mrb[5].mxu0  ;;  %v430_v37 = vadd.f32 %v429_v31, %v312_v54  ;;  %v431_v42 = vpop.f32.mrb[5].mxu1  ;;  %v2409_v49 = vrot.slane %v72_v55, %v451_v56 }
 0x112   :  { %v391_v18 = vadd.f32 %v390_v17, %v273_v50  ;;  %v392_v19 = vpop.f32.mrb[6].mxu0  ;;  %v432_v48 = vadd.f32 %v431_v42, %v314_v57  ;;  %v433_v51 = vpop.f32.mrb[6].mxu1 }
 0x113   :  { %v457_v24 = vadd.f32 %v2402_v60, %v389_v63  ;;  %v393_v30 = vpop.f32.mrb[7].mxu0  ;;  %v434_v53 = vpop.f32.mrb[7].mxu1 }
 0x114   :  { %v458_v36 = vadd.f32 %v2404_v62, %v391_v18  ;;  %v460_v50 = vadd.f32 %v2409_v49, %v432_v48  ;;  %v447_v30 = vsub.s32 2, %v2290_v25  ;;  %v1903_v25 = vld [vmem:[%s2835_s0 + $0x4] sm:$0xf] }
 0x115   :  { %v1901_v46 = vmul.f32 -1.442695, %v457_v24 }
 0x116   :  { %v1902_v52 = vmul.f32 -1.442695, %v458_v36  ;;  %v2416_v31 = vrot.slane %v72_v55, %v447_v30 }
 0x117   :  { %2010 = vpow2.f32 %v1901_v46 }
 0x118   :  { %2012 = vpow2.f32 %v1902_v52  ;;  %v459_v42 = vadd.f32 %v2416_v31, %v430_v37 }
 0x119   :  { %2014 = vtanh.f32 %v460_v50 }
 0x121   :  { %v2011_v58 = vpop.eup %2010 }
 0x122   :  { %v2013_v59 = vpop.eup %2012  ;;  %v464_v61 = vadd.f32 1.0, %v2011_v58 }
 0x123   :  { %v470_v63 = vadd.f32 1.0, %v2013_v59  ;;  %v2015_v54 = vpop.eup %2014 }
 0x124   :  { %2016 = vrcp.f32 %v464_v61 }
 0x125   :  { %2018 = vrcp.f32 %v470_v63 }
 0x12e   :  { %v2017_v57 = vpop.eup %2016 }
 0x12f   :  { %v2019_v17 = vpop.eup %2018  ;;  %v474_v18 = vmul.f32 0.0, %v2017_v57 }
 0x130   :  { %v475_v19 = vmul.f32 %v2019_v17, %v2015_v54 }
 0x132   :  { %v2412_v24 = vadd.f32 %v475_v19, %v474_v18 }
 0x134   :  { %2020 = vtanh.f32 %v2412_v24 }
 0x13e   :  { %v2021_v36 = vpop.eup %2020 }
 0x13f   :  { %v478_v46 = vadd.f32 1.0, %v2021_v36 }
 0x141   :  { %v479_v48 = vmul.f32 %v478_v46, %v459_v42 }
 0x143   :  { %480 = vst [vmem:[#allocation7] sm:$0xff] %v479_v48  ;;  %v483_v51 = vpack.c.bf16 %v479_v48, %v479_v48 }
 0x145   :  { %517 = vmatmul.mubr.bf16.vlgmr.msra.gmra.mrb[8].mxu0 %v483_v51  ;;  %558 = vmatmul.mubr.bf16.vlgmr.msra.gmra.mrb[8].mxu1 %v483_v51 }
 0x146   :  { %570 = vmatpush1.bf16.msra.mxu0 %v2340_v44  ;;  %611 = vmatpush1.bf16.msra.mxu1 %v2348_v47 }
 0x147   :  { %601 = vmatprep.mubr.bf16.mxu0 %v2189_v0  ;;  %642 = vmatprep.mubr.bf16.mxu1 %v2189_v0 }
 0x148   :  { %679 = vmatprep.subr.bf16.mxu0 %v2234_v1  ;;  %720 = vmatprep.subr.bf16.mxu1 %v2244_v5 }
 0x14d   :  { %1905 = vmatmul.mubr.msk.bf16.vlgmr.msra.gmra.mrb[12].mxu0 %vm337_vm1, %v1903_v25  ;;  %1907 = vmatmul.mubr.msk.bf16.vlgmr.msra.gmra.mrb[12].mxu1 %vm337_vm1, %v1903_v25 }
 0x14e   :  { %680 = vmatpush1.bf16.msra.mxu0 %v2236_v2  ;;  %721 = vmatpush1.bf16.msra.mxu1 %v2249_v7 }
 0x14f   :  { %681 = vmatprep.subr.bf16.mxu0 %v2239_v3  ;;  %722 = vmatprep.subr.bf16.mxu1 %v2253_v8 }
 0x150   :  { %711 = vmatprep.mubr.bf16.mxu0 %v2189_v0  ;;  %752 = vmatprep.mubr.bf16.mxu1 %v2189_v0 }
 0x152   :  { %682 = vmatpush1.bf16.msra.mxu0 %v2241_v4  ;;  %723 = vmatpush1.bf16.msra.mxu1 %v2260_v11 }
 0x153   :  { %683 = vmatprep.subr.bf16.mxu0 %v2247_v6  ;;  %724 = vmatprep.subr.bf16.mxu1 %v2264_v12 }
 0x156   :  { %684 = vmatpush1.bf16.msra.mxu0 %v2256_v9  ;;  %725 = vmatpush1.bf16.msra.mxu1 %v2269_v14 }
 0x157   :  { %685 = vmatprep.subr.bf16.mxu0 %v2258_v10  ;;  %726 = vmatprep.subr.bf16.mxu1 %v2273_v15 }
 0x15a   :  { %686 = vmatpush1.bf16.msra.mxu0 %v2267_v13  ;;  %727 = vmatpush1.bf16.msra.mxu1 %v2279_v20 }
 0x15b   :  { %687 = vmatprep.subr.bf16.mxu0 %v2276_v16  ;;  %728 = vmatprep.subr.bf16.mxu1 %v2285_v22 }
 0x15e   :  { %688 = vmatpush1.bf16.msra.mxu0 %v2282_v21  ;;  %729 = vmatpush1.bf16.msra.mxu1 %v2293_v26 }
 0x15f   :  { %689 = vmatprep.subr.bf16.mxu0 %v2288_v23  ;;  %730 = vmatprep.subr.bf16.mxu1 %v2299_v28 }
 0x162   :  { %690 = vmatpush1.bf16.msra.mxu0 %v2296_v27  ;;  %731 = vmatpush1.bf16.msra.mxu1 %v2309_v32 }
 0x163   :  { %691 = vmatprep.subr.bf16.mxu0 %v2302_v29  ;;  %732 = vmatprep.subr.bf16.mxu1 %v2315_v34 }
 0x166   :  { %692 = vmatpush1.bf16.msra.mxu0 %v2312_v33  ;;  %733 = vmatpush1.bf16.msra.mxu1 %v2321_v38 }
 0x167   :  { %693 = vmatprep.subr.bf16.mxu0 %v2318_v35  ;;  %734 = vmatprep.subr.bf16.mxu1 %v2327_v40 }
 0x16a   :  { %694 = vmatpush1.bf16.msra.mxu0 %v2324_v39  ;;  %735 = vmatpush1.bf16.msra.mxu1 %v2333_v43 }
 0x16b   :  { %1911 = vmatprep.subr.msk.bf16.mxu0 %vm341_vm0, %v2330_v41  ;;  %1913 = vmatprep.subr.msk.bf16.mxu1 %vm341_vm0, %v2342_v45 }
 0x218   :  { %v518_v55 = vpop.f32.mrb[8].mxu0  ;;  %v559_v37 = vpop.f32.mrb[8].mxu1 }
 0x219   :  { %v520_v52 = vpop.f32.mrb[9].mxu0  ;;  %v561_v53 = vpop.f32.mrb[9].mxu1 }
 0x21a   :  { %v522_v56 = vpop.f32.mrb[10].mxu0  ;;  %v563_v50 = vpop.f32.mrb[10].mxu1 }
 0x21b   :  { %v523_v58 = vpop.f32.mrb[11].mxu0  ;;  %v564_v59 = vpop.f32.mrb[11].mxu1 }
 0x220   :  { %v603_v61 = vpop.f32.mrb[12].mxu0  ;;  %v644_v63 = vpop.f32.mrb[12].mxu1 }
 0x221   :  { %v604_v54 = vadd.f32 %v603_v61, %v518_v55  ;;  %v645_v57 = vadd.f32 %v644_v63, %v559_v37  ;;  %v605_v17 = vpop.f32.mrb[13].mxu0  ;;  %v646_v18 = vpop.f32.mrb[13].mxu1 }
 0x222   :  { %v606_v19 = vadd.f32 %v605_v17, %v520_v52  ;;  %v647_v30 = vadd.f32 %v646_v18, %v561_v53  ;;  %v607_v36 = vpop.f32.mrb[14].mxu0  ;;  %v648_v42 = vpop.f32.mrb[14].mxu1 }
 0x223   :  { %v651_v46 = vadd.f32 %v604_v54, %v2402_v60  ;;  %v608_v48 = vpop.f32.mrb[15].mxu0  ;;  %v649_v51 = vpop.f32.mrb[15].mxu1 }
 0x224   :  { %v652_v25 = vadd.f32 %v606_v19, %v2404_v62  ;;  %v654_v58 = vadd.f32 %v647_v30, %v2409_v49  ;;  %v653_v30 = vadd.f32 %v645_v57, %v2416_v31 }
 0x225   :  { %v1908_v56 = vmul.f32 -1.442695, %v651_v46 }
 0x226   :  { %v1909_v50 = vmul.f32 -1.442695, %v652_v25 }
 0x227   :  { %2022 = vpow2.f32 %v1908_v56 }
 0x228   :  { %2024 = vpow2.f32 %v1909_v50 }
 0x229   :  { %2026 = vtanh.f32 %v654_v58 }
 0x231   :  { %v2023_v55 = vpop.eup %2022 }
 0x232   :  { %v2025_v37 = vpop.eup %2024  ;;  %v658_v59 = vadd.f32 1.0, %v2023_v55 }
 0x233   :  { %v664_v61 = vadd.f32 1.0, %v2025_v37  ;;  %v2027_v52 = vpop.eup %2026 }
 0x234   :  { %2028 = vrcp.f32 %v658_v59 }
 0x235   :  { %2030 = vrcp.f32 %v664_v61 }
 0x23e   :  { %v2029_v53 = vpop.eup %2028 }
 0x23f   :  { %v2031_v63 = vpop.eup %2030  ;;  %v668_v54 = vmul.f32 %v2029_v53, %v2412_v24  ;;  %v1910_v24 = vld [vmem:[%s2835_s0 + $0x8] sm:$0xf] }
 0x240   :  { %v669_v17 = vmul.f32 %v2031_v63, %v2027_v52 }
 0x242   :  { %v2470_v18 = vadd.f32 %v669_v17, %v668_v54 }
 0x244   :  { %2032 = vtanh.f32 %v2470_v18 }
 0x24e   :  { %v2033_v19 = vpop.eup %2032 }
 0x24f   :  { %v672_v36 = vadd.f32 1.0, %v2033_v19 }
 0x251   :  { %v673_v42 = vmul.f32 %v672_v36, %v653_v30 }
 0x253   :  { %675 = vst [vmem:[#allocation7 + $0x8] sm:$0xff] %v673_v42  ;;  %v678_v46 = vpack.c.bf16 %v673_v42, %v673_v42 }
 0x255   :  { %712 = vmatmul.mubr.bf16.vlgmr.msra.gmra.mrb[16].mxu0 %v678_v46  ;;  %753 = vmatmul.mubr.bf16.vlgmr.msra.gmra.mrb[16].mxu1 %v678_v46 }
 0x256   :  { %765 = vmatpush1.bf16.msra.mxu0 %v2340_v44  ;;  %806 = vmatpush1.bf16.msra.mxu1 %v2348_v47 }
 0x257   :  { %796 = vmatprep.mubr.bf16.mxu0 %v2189_v0  ;;  %837 = vmatprep.mubr.bf16.mxu1 %v2189_v0 }
 0x258   :  { %874 = vmatprep.subr.bf16.mxu0 %v2234_v1  ;;  %915 = vmatprep.subr.bf16.mxu1 %v2244_v5 }
 0x25d   :  { %1912 = vmatmul.mubr.msk.bf16.vlgmr.msra.gmra.mrb[20].mxu0 %vm337_vm1, %v1910_v24  ;;  %1914 = vmatmul.mubr.msk.bf16.vlgmr.msra.gmra.mrb[20].mxu1 %vm337_vm1, %v1910_v24 }
 0x25e   :  { %875 = vmatpush1.bf16.msra.mxu0 %v2236_v2  ;;  %916 = vmatpush1.bf16.msra.mxu1 %v2249_v7 }
 0x25f   :  { %876 = vmatprep.subr.bf16.mxu0 %v2239_v3  ;;  %917 = vmatprep.subr.bf16.mxu1 %v2253_v8 }
 0x260   :  { %906 = vmatprep.mubr.bf16.mxu0 %v2189_v0  ;;  %947 = vmatprep.mubr.bf16.mxu1 %v2189_v0 }
 0x262   :  { %877 = vmatpush1.bf16.msra.mxu0 %v2241_v4  ;;  %918 = vmatpush1.bf16.msra.mxu1 %v2260_v11 }
 0x263   :  { %878 = vmatprep.subr.bf16.mxu0 %v2247_v6  ;;  %919 = vmatprep.subr.bf16.mxu1 %v2264_v12 }
 0x266   :  { %879 = vmatpush1.bf16.msra.mxu0 %v2256_v9  ;;  %920 = vmatpush1.bf16.msra.mxu1 %v2269_v14 }
 0x267   :  { %880 = vmatprep.subr.bf16.mxu0 %v2258_v10  ;;  %921 = vmatprep.subr.bf16.mxu1 %v2273_v15 }
 0x26a   :  { %881 = vmatpush1.bf16.msra.mxu0 %v2267_v13  ;;  %922 = vmatpush1.bf16.msra.mxu1 %v2279_v20 }
 0x26b   :  { %882 = vmatprep.subr.bf16.mxu0 %v2276_v16  ;;  %923 = vmatprep.subr.bf16.mxu1 %v2285_v22 }
 0x26e   :  { %883 = vmatpush1.bf16.msra.mxu0 %v2282_v21  ;;  %924 = vmatpush1.bf16.msra.mxu1 %v2293_v26 }
 0x26f   :  { %884 = vmatprep.subr.bf16.mxu0 %v2288_v23  ;;  %925 = vmatprep.subr.bf16.mxu1 %v2299_v28 }
 0x272   :  { %885 = vmatpush1.bf16.msra.mxu0 %v2296_v27  ;;  %926 = vmatpush1.bf16.msra.mxu1 %v2309_v32 }
 0x273   :  { %886 = vmatprep.subr.bf16.mxu0 %v2302_v29  ;;  %927 = vmatprep.subr.bf16.mxu1 %v2315_v34 }
 0x276   :  { %887 = vmatpush1.bf16.msra.mxu0 %v2312_v33  ;;  %928 = vmatpush1.bf16.msra.mxu1 %v2321_v38 }
 0x277   :  { %888 = vmatprep.subr.bf16.mxu0 %v2318_v35  ;;  %929 = vmatprep.subr.bf16.mxu1 %v2327_v40 }
 0x27a   :  { %889 = vmatpush1.bf16.msra.mxu0 %v2324_v39  ;;  %930 = vmatpush1.bf16.msra.mxu1 %v2333_v43 }
 0x27b   :  { %1918 = vmatprep.subr.msk.bf16.mxu0 %vm341_vm0, %v2330_v41  ;;  %1920 = vmatprep.subr.msk.bf16.mxu1 %vm341_vm0, %v2342_v45 }
 0x328   :  { %v713_v57 = vpop.f32.mrb[16].mxu0  ;;  %v754_v48 = vpop.f32.mrb[16].mxu1 }
 0x329   :  { %v715_v51 = vpop.f32.mrb[17].mxu0  ;;  %v756_v25 = vpop.f32.mrb[17].mxu1 }
 0x32a   :  { %v717_v56 = vpop.f32.mrb[18].mxu0  ;;  %v758_v50 = vpop.f32.mrb[18].mxu1 }
 0x32b   :  { %v718_v58 = vpop.f32.mrb[19].mxu0  ;;  %v759_v55 = vpop.f32.mrb[19].mxu1 }
 0x330   :  { %v798_v37 = vpop.f32.mrb[20].mxu0  ;;  %v839_v59 = vpop.f32.mrb[20].mxu1 }
 0x331   :  { %v799_v61 = vadd.f32 %v798_v37, %v713_v57  ;;  %v840_v52 = vadd.f32 %v839_v59, %v754_v48  ;;  %v800_v53 = vpop.f32.mrb[21].mxu0  ;;  %v841_v63 = vpop.f32.mrb[21].mxu1 }
 0x332   :  { %v801_v54 = vadd.f32 %v800_v53, %v715_v51  ;;  %v842_v17 = vadd.f32 %v841_v63, %v756_v25  ;;  %v802_v19 = vpop.f32.mrb[22].mxu0  ;;  %v843_v30 = vpop.f32.mrb[22].mxu1 }
 0x333   :  { %v846_v36 = vadd.f32 %v799_v61, %v2402_v60  ;;  %v803_v42 = vpop.f32.mrb[23].mxu0  ;;  %v844_v46 = vpop.f32.mrb[23].mxu1 }
 0x334   :  { %v847_v24 = vadd.f32 %v801_v54, %v2404_v62  ;;  %v849_v58 = vadd.f32 %v842_v17, %v2409_v49  ;;  %v848_v17 = vadd.f32 %v840_v52, %v2416_v31 }
 0x335   :  { %v1915_v56 = vmul.f32 -1.442695, %v846_v36 }
 0x336   :  { %v1916_v50 = vmul.f32 -1.442695, %v847_v24 }
 0x337   :  { %2034 = vpow2.f32 %v1915_v56 }
 0x338   :  { %2036 = vpow2.f32 %v1916_v50 }
 0x339   :  { %2038 = vtanh.f32 %v849_v58 }
 0x341   :  { %v2035_v57 = vpop.eup %2034 }
 0x342   :  { %v2037_v48 = vpop.eup %2036  ;;  %v853_v55 = vadd.f32 1.0, %v2035_v57 }
 0x343   :  { %v859_v37 = vadd.f32 1.0, %v2037_v48  ;;  %v2039_v51 = vpop.eup %2038 }
 0x344   :  { %2040 = vrcp.f32 %v853_v55 }
 0x345   :  { %2042 = vrcp.f32 %v859_v37 }
 0x34e   :  { %v2041_v25 = vpop.eup %2040 }
 0x34f   :  { %v2043_v59 = vpop.eup %2042  ;;  %v863_v61 = vmul.f32 %v2041_v25, %v2470_v18  ;;  %v1917_v18 = vld [vmem:[%s2835_s0 + $0xc] sm:$0xf] }
 0x350   :  { %v864_v53 = vmul.f32 %v2043_v59, %v2039_v51 }
 0x352   :  { %v2525_v63 = vadd.f32 %v864_v53, %v863_v61 }
 0x354   :  { %2044 = vtanh.f32 %v2525_v63 }
 0x35e   :  { %v2045_v54 = vpop.eup %2044 }
 0x35f   :  { %v867_v19 = vadd.f32 1.0, %v2045_v54 }
 0x361   :  { %v868_v30 = vmul.f32 %v867_v19, %v848_v17 }
 0x363   :  { %870 = vst [vmem:[#allocation7 + $0x10] sm:$0xff] %v868_v30  ;;  %v873_v36 = vpack.c.bf16 %v868_v30, %v868_v30 }
 0x365   :  { %907 = vmatmul.mubr.bf16.vlgmr.msra.gmra.mrb[24].mxu0 %v873_v36  ;;  %948 = vmatmul.mubr.bf16.vlgmr.msra.gmra.mrb[24].mxu1 %v873_v36 }
 0x366   :  { %960 = vmatpush1.bf16.msra.mxu0 %v2340_v44  ;;  %1001 = vmatpush1.bf16.msra.mxu1 %v2348_v47 }
 0x367   :  { %991 = vmatprep.mubr.bf16.mxu0 %v2189_v0  ;;  %1032 = vmatprep.mubr.bf16.mxu1 %v2189_v0 }
 0x368   :  { %1069 = vmatprep.subr.bf16.mxu0 %v2234_v1  ;;  %1110 = vmatprep.subr.bf16.mxu1 %v2244_v5 }
 0x36d   :  { %1919 = vmatmul.mubr.msk.bf16.vlgmr.msra.gmra.mrb[28].mxu0 %vm337_vm1, %v1917_v18  ;;  %1921 = vmatmul.mubr.msk.bf16.vlgmr.msra.gmra.mrb[28].mxu1 %vm337_vm1, %v1917_v18 }
 0x36e   :  { %1070 = vmatpush1.bf16.msra.mxu0 %v2236_v2  ;;  %1111 = vmatpush1.bf16.msra.mxu1 %v2249_v7 }
 0x36f   :  { %1071 = vmatprep.subr.bf16.mxu0 %v2239_v3  ;;  %1112 = vmatprep.subr.bf16.mxu1 %v2253_v8 }
 0x370   :  { %1101 = vmatprep.mubr.bf16.mxu0 %v2189_v0  ;;  %1142 = vmatprep.mubr.bf16.mxu1 %v2189_v0 }
 0x372   :  { %1072 = vmatpush1.bf16.msra.mxu0 %v2241_v4  ;;  %1113 = vmatpush1.bf16.msra.mxu1 %v2260_v11 }
 0x373   :  { %1073 = vmatprep.subr.bf16.mxu0 %v2247_v6  ;;  %1114 = vmatprep.subr.bf16.mxu1 %v2264_v12 }
 0x376   :  { %1074 = vmatpush1.bf16.msra.mxu0 %v2256_v9  ;;  %1115 = vmatpush1.bf16.msra.mxu1 %v2269_v14 }
 0x377   :  { %1075 = vmatprep.subr.bf16.mxu0 %v2258_v10  ;;  %1116 = vmatprep.subr.bf16.mxu1 %v2273_v15 }
 0x37a   :  { %1076 = vmatpush1.bf16.msra.mxu0 %v2267_v13  ;;  %1117 = vmatpush1.bf16.msra.mxu1 %v2279_v20 }
 0x37b   :  { %1077 = vmatprep.subr.bf16.mxu0 %v2276_v16  ;;  %1118 = vmatprep.subr.bf16.mxu1 %v2285_v22 }
 0x37e   :  { %1078 = vmatpush1.bf16.msra.mxu0 %v2282_v21  ;;  %1119 = vmatpush1.bf16.msra.mxu1 %v2293_v26 }
 0x37f   :  { %1079 = vmatprep.subr.bf16.mxu0 %v2288_v23  ;;  %1120 = vmatprep.subr.bf16.mxu1 %v2299_v28 }
 0x382   :  { %1080 = vmatpush1.bf16.msra.mxu0 %v2296_v27  ;;  %1121 = vmatpush1.bf16.msra.mxu1 %v2309_v32 }
 0x383   :  { %1081 = vmatprep.subr.bf16.mxu0 %v2302_v29  ;;  %1122 = vmatprep.subr.bf16.mxu1 %v2315_v34 }
 0x386   :  { %1082 = vmatpush1.bf16.msra.mxu0 %v2312_v33  ;;  %1123 = vmatpush1.bf16.msra.mxu1 %v2321_v38 }
 0x387   :  { %1083 = vmatprep.subr.bf16.mxu0 %v2318_v35  ;;  %1124 = vmatprep.subr.bf16.mxu1 %v2327_v40 }
 0x38a   :  { %1084 = vmatpush1.bf16.msra.mxu0 %v2324_v39  ;;  %1125 = vmatpush1.bf16.msra.mxu1 %v2333_v43 }
 0x38b   :  { %1925 = vmatprep.subr.msk.bf16.mxu0 %vm341_vm0, %v2330_v41  ;;  %1927 = vmatprep.subr.msk.bf16.mxu1 %vm341_vm0, %v2342_v45 }
 0x438   :  { %v908_v52 = vpop.f32.mrb[24].mxu0  ;;  %v949_v42 = vpop.f32.mrb[24].mxu1 }
 0x439   :  { %v910_v46 = vpop.f32.mrb[25].mxu0  ;;  %v951_v24 = vpop.f32.mrb[25].mxu1 }
 0x43a   :  { %v912_v56 = vpop.f32.mrb[26].mxu0  ;;  %v953_v50 = vpop.f32.mrb[26].mxu1 }
 0x43b   :  { %v913_v58 = vpop.f32.mrb[27].mxu0  ;;  %v954_v57 = vpop.f32.mrb[27].mxu1 }
 0x440   :  { %v993_v48 = vpop.f32.mrb[28].mxu0  ;;  %v1034_v55 = vpop.f32.mrb[28].mxu1 }
 0x441   :  { %v994_v37 = vadd.f32 %v993_v48, %v908_v52  ;;  %v1035_v51 = vadd.f32 %v1034_v55, %v949_v42  ;;  %v995_v25 = vpop.f32.mrb[29].mxu0  ;;  %v1036_v59 = vpop.f32.mrb[29].mxu1 }
 0x442   :  { %v996_v61 = vadd.f32 %v995_v25, %v910_v46  ;;  %v1037_v53 = vadd.f32 %v1036_v59, %v951_v24  ;;  %v997_v54 = vpop.f32.mrb[30].mxu0  ;;  %v1038_v17 = vpop.f32.mrb[30].mxu1 }
 0x443   :  { %v1041_v19 = vadd.f32 %v994_v37, %v2402_v60  ;;  %v998_v30 = vpop.f32.mrb[31].mxu0  ;;  %v1039_v36 = vpop.f32.mrb[31].mxu1 }
 0x444   :  { %v1042_v18 = vadd.f32 %v996_v61, %v2404_v62  ;;  %v1044_v58 = vadd.f32 %v1037_v53, %v2409_v49  ;;  %v1043_v53 = vadd.f32 %v1035_v51, %v2416_v31 }
 0x445   :  { %v1922_v56 = vmul.f32 -1.442695, %v1041_v19 }
 0x446   :  { %v1923_v50 = vmul.f32 -1.442695, %v1042_v18 }
 0x447   :  { %2046 = vpow2.f32 %v1922_v56 }
 0x448   :  { %2048 = vpow2.f32 %v1923_v50 }
 0x449   :  { %2050 = vtanh.f32 %v1044_v58 }
 0x451   :  { %v2047_v52 = vpop.eup %2046 }
 0x452   :  { %v2049_v42 = vpop.eup %2048  ;;  %v1048_v57 = vadd.f32 1.0, %v2047_v52 }
 0x453   :  { %v1054_v48 = vadd.f32 1.0, %v2049_v42  ;;  %v2051_v46 = vpop.eup %2050  ;;  %v2643_v42 = vld [vmem:[#allocation4 + $0x4] ss:$16 sps:$4 sm:$0xff]  }
 0x454   :  { %2052 = vrcp.f32 %v1048_v57  ;;  %v2646_v57 = vld [vmem:[#allocation4 + $0xc] ss:$16 sps:$4 sm:$0xff]  }
 0x455   :  { %2054 = vrcp.f32 %v1054_v48  ;;  %v1931_v48 = vld [vmem:[%s2835_s0 + $0x14] sm:$0xf] }
 0x45e   :  { %v2053_v24 = vpop.eup %2052 }
 0x45f   :  { %v2055_v55 = vpop.eup %2054  ;;  %v1058_v37 = vmul.f32 %v2053_v24, %v2525_v63  ;;  %v1924_v63 = vld [vmem:[%s2835_s0 + $0x10] sm:$0xf]  ;;  %v2657_v24 = vld [vmem:[#allocation4 + $0x8] ss:$16 sps:$4 sm:$0xff]  }
 0x460   :  { %v1059_v25 = vmul.f32 %v2055_v55, %v2051_v46  ;;  %v2654_v46 = vld [vmem:[#allocation4] ss:$16 sps:$4 sm:$0xff]   ;;  %v2660_v55 = vld [vmem:[#allocation4 + $0x24] ss:$16 sps:$4 sm:$0xff]  }
 0x462   :  { %v2580_v59 = vadd.f32 %v1059_v25, %v1058_v37  ;;  %v2663_v37 = vld [vmem:[#allocation4 + $0x2c] ss:$16 sps:$4 sm:$0xff]   ;;  %v2668_v25 = vld [vmem:[#allocation4 + $0x20] ss:$16 sps:$4 sm:$0xff]  }
 0x464   :  { %2056 = vtanh.f32 %v2580_v59 }
 0x46e   :  { %v2057_v61 = vpop.eup %2056 }
 0x46f   :  { %v1062_v54 = vadd.f32 1.0, %v2057_v61  ;;  %v2674_v61 = vld [vmem:[#allocation4 + $0x44] ss:$16 sps:$4 sm:$0xff]  }
 0x471   :  { %v1063_v17 = vmul.f32 %v1062_v54, %v1043_v53  ;;  %v2677_v53 = vld [vmem:[#allocation4 + $0x4c] ss:$16 sps:$4 sm:$0xff]   ;;  %v2680_v54 = vld [vmem:[#allocation4 + $0x40] ss:$16 sps:$4 sm:$0xff]  }
 0x473   :  { %1065 = vst [vmem:[#allocation7 + $0x18] sm:$0xff] %v1063_v17  ;;  %v1068_v19 = vpack.c.bf16 %v1063_v17, %v1063_v17  ;;  %v2683_v17 = vld [vmem:[#allocation4 + $0x48] ss:$16 sps:$4 sm:$0xff]  }
 0x475   :  { %1102 = vmatmul.mubr.bf16.vlgmr.msra.gmra.mrb[32].mxu0 %v1068_v19  ;;  %1143 = vmatmul.mubr.bf16.vlgmr.msra.gmra.mrb[32].mxu1 %v1068_v19  ;;  %v2686_v19 = vld [vmem:[#allocation4 + $0x64] ss:$16 sps:$4 sm:$0xff]  }
 0x476   :  { %1155 = vmatpush1.bf16.msra.mxu0 %v2340_v44  ;;  %1196 = vmatpush1.bf16.msra.mxu1 %v2348_v47 }
 0x477   :  { %1186 = vmatprep.mubr.bf16.mxu0 %v2189_v0  ;;  %1227 = vmatprep.mubr.bf16.mxu1 %v2189_v0 }
 0x478   :  { %1264 = vmatprep.subr.bf16.mxu0 %v2234_v1  ;;  %1305 = vmatprep.subr.bf16.mxu1 %v2244_v5 }
 0x47d   :  { %1926 = vmatmul.mubr.msk.bf16.vlgmr.msra.gmra.mrb[36].mxu0 %vm337_vm1, %v1924_v63  ;;  %1928 = vmatmul.mubr.msk.bf16.vlgmr.msra.gmra.mrb[36].mxu1 %vm337_vm1, %v1924_v63  ;;  %v2689_v63 = vld [vmem:[#allocation4 + $0x6c] ss:$16 sps:$4 sm:$0xff]  }
 0x47e   :  { %1265 = vmatpush1.bf16.msra.mxu0 %v2236_v2  ;;  %1306 = vmatpush1.bf16.msra.mxu1 %v2249_v7 }
 0x47f   :  { %1266 = vmatprep.subr.bf16.mxu0 %v2239_v3  ;;  %1307 = vmatprep.subr.bf16.mxu1 %v2253_v8 }
 0x480   :  { %1296 = vmatprep.mubr.bf16.mxu0 %v2189_v0  ;;  %1337 = vmatprep.mubr.bf16.mxu1 %v2189_v0 }
 0x482   :  { %1267 = vmatpush1.bf16.msra.mxu0 %v2241_v4  ;;  %1308 = vmatpush1.bf16.msra.mxu1 %v2260_v11 }
 0x483   :  { %1268 = vmatprep.subr.bf16.mxu0 %v2247_v6  ;;  %1309 = vmatprep.subr.bf16.mxu1 %v2264_v12 }
 0x486   :  { %1269 = vmatpush1.bf16.msra.mxu0 %v2256_v9  ;;  %1310 = vmatpush1.bf16.msra.mxu1 %v2269_v14 }
 0x487   :  { %1270 = vmatprep.subr.bf16.mxu0 %v2258_v10  ;;  %1311 = vmatprep.subr.bf16.mxu1 %v2273_v15 }
 0x48a   :  { %1271 = vmatpush1.bf16.msra.mxu0 %v2267_v13  ;;  %1312 = vmatpush1.bf16.msra.mxu1 %v2279_v20 }
 0x48b   :  { %1272 = vmatprep.subr.bf16.mxu0 %v2276_v16  ;;  %1313 = vmatprep.subr.bf16.mxu1 %v2285_v22 }
 0x48e   :  { %1273 = vmatpush1.bf16.msra.mxu0 %v2282_v21  ;;  %1314 = vmatpush1.bf16.msra.mxu1 %v2293_v26 }
 0x48f   :  { %1274 = vmatprep.subr.bf16.mxu0 %v2288_v23  ;;  %1315 = vmatprep.subr.bf16.mxu1 %v2299_v28 }
 0x492   :  { %1275 = vmatpush1.bf16.msra.mxu0 %v2296_v27  ;;  %1316 = vmatpush1.bf16.msra.mxu1 %v2309_v32 }
 0x493   :  { %1276 = vmatprep.subr.bf16.mxu0 %v2302_v29  ;;  %1317 = vmatprep.subr.bf16.mxu1 %v2315_v34 }
 0x496   :  { %1277 = vmatpush1.bf16.msra.mxu0 %v2312_v33  ;;  %1318 = vmatpush1.bf16.msra.mxu1 %v2321_v38 }
 0x497   :  { %1278 = vmatprep.subr.bf16.mxu0 %v2318_v35  ;;  %1319 = vmatprep.subr.bf16.mxu1 %v2327_v40 }
 0x49a   :  { %1279 = vmatpush1.bf16.msra.mxu0 %v2324_v39  ;;  %1320 = vmatpush1.bf16.msra.mxu1 %v2333_v43 }
 0x49b   :  { %1932 = vmatprep.subr.msk.bf16.mxu0 %vm341_vm0, %v2330_v41  ;;  %1934 = vmatprep.subr.msk.bf16.mxu1 %vm341_vm0, %v2342_v45 }
 0x548   :  { %v1103_v1 = vpop.f32.mrb[32].mxu0  ;;  %v1144_v2 = vpop.f32.mrb[32].mxu1 }
 0x549   :  { %v1105_v3 = vpop.f32.mrb[33].mxu0  ;;  %v1146_v4 = vpop.f32.mrb[33].mxu1 }
 0x54a   :  { %v1107_v5 = vpop.f32.mrb[34].mxu0  ;;  %v1148_v6 = vpop.f32.mrb[34].mxu1 }
 0x54b   :  { %v1108_v7 = vpop.f32.mrb[35].mxu0  ;;  %v1149_v8 = vpop.f32.mrb[35].mxu1  ;;  %v2704_v5 = vld [vmem:[#allocation4 + $0x80] ss:$16 sps:$4 sm:$0xff]   ;;  %v2707_v6 = vld [vmem:[#allocation4 + $0x88] ss:$16 sps:$4 sm:$0xff]  }
 0x54c   :  { %v2710_v7 = vld [vmem:[#allocation4 + $0xa4] ss:$16 sps:$4 sm:$0xff]   ;;  %v2713_v8 = vld [vmem:[#allocation4 + $0xac] ss:$16 sps:$4 sm:$0xff]  }
 0x550   :  { %v1188_v9 = vpop.f32.mrb[36].mxu0  ;;  %v1229_v10 = vpop.f32.mrb[36].mxu1 }
 0x551   :  { %v1189_v11 = vadd.f32 %v1188_v9, %v1103_v1  ;;  %v1230_v12 = vadd.f32 %v1229_v10, %v1144_v2  ;;  %v1190_v13 = vpop.f32.mrb[37].mxu0  ;;  %v1231_v14 = vpop.f32.mrb[37].mxu1  ;;  %v2692_v1 = vld [vmem:[#allocation4 + $0x60] ss:$16 sps:$4 sm:$0xff]   ;;  %v2695_v2 = vld [vmem:[#allocation4 + $0x68] ss:$16 sps:$4 sm:$0xff]  }
 0x552   :  { %v1191_v15 = vadd.f32 %v1190_v13, %v1105_v3  ;;  %v1232_v16 = vadd.f32 %v1231_v14, %v1146_v4  ;;  %v1192_v20 = vpop.f32.mrb[38].mxu0  ;;  %v1233_v21 = vpop.f32.mrb[38].mxu1  ;;  %v2698_v3 = vld [vmem:[#allocation4 + $0x84] ss:$16 sps:$4 sm:$0xff]   ;;  %v2701_v4 = vld [vmem:[#allocation4 + $0x8c] ss:$16 sps:$4 sm:$0xff]  }
 0x553   :  { %v1236_v22 = vadd.f32 %v1189_v11, %v2402_v60  ;;  %v1193_v23 = vpop.f32.mrb[39].mxu0  ;;  %v1234_v26 = vpop.f32.mrb[39].mxu1  ;;  %v1238_v56 = vadd.f32 %v1230_v12, %v2416_v31  ;;  %v2716_v9 = vld [vmem:[#allocation4 + $0xa0] ss:$16 sps:$4 sm:$0xff]   ;;  %v2719_v10 = vld [vmem:[#allocation4 + $0xa8] ss:$16 sps:$4 sm:$0xff]  }
 0x554   :  { %v1237_v27 = vadd.f32 %v1191_v15, %v2404_v62  ;;  %v1239_v32 = vadd.f32 %v1232_v16, %v2409_v49  ;;  %v2722_v11 = vld [vmem:[#allocation4 + $0xc4] ss:$16 sps:$4 sm:$0xff]   ;;  %v2725_v12 = vld [vmem:[#allocation4 + $0xcc] ss:$16 sps:$4 sm:$0xff]   ;;  %v2728_v13 = vld [vmem:[#allocation4 + $0xc0] ss:$16 sps:$4 sm:$0xff]  }
 0x555   :  { %v1929_v28 = vmul.f32 -1.442695, %v1236_v22  ;;  %v2731_v14 = vld [vmem:[#allocation4 + $0xc8] ss:$16 sps:$4 sm:$0xff]   ;;  %v2734_v15 = vld [vmem:[#allocation4 + $0xe4] ss:$16 sps:$4 sm:$0xff]  }
 0x556   :  { %v1930_v29 = vmul.f32 -1.442695, %v1237_v27  ;;  %v2737_v16 = vld [vmem:[#allocation4 + $0xec] ss:$16 sps:$4 sm:$0xff]   ;;  %v2740_v20 = vld [vmem:[#allocation4 + $0xe0] ss:$16 sps:$4 sm:$0xff]  }
 0x557   :  { %2058 = vpow2.f32 %v1929_v28  ;;  %v2743_v21 = vld [vmem:[#allocation4 + $0xe8] ss:$16 sps:$4 sm:$0xff]  }
 0x558   :  { %2060 = vpow2.f32 %v1930_v29 }
 0x559   :  { %2062 = vtanh.f32 %v1239_v32 }
 0x561   :  { %v2059_v33 = vpop.eup %2058 }
 0x562   :  { %v2061_v34 = vpop.eup %2060  ;;  %v1243_v35 = vadd.f32 1.0, %v2059_v33 }
 0x563   :  { %v1249_v38 = vadd.f32 1.0, %v2061_v34  ;;  %v2063_v39 = vpop.eup %2062 }
 0x564   :  { %2064 = vrcp.f32 %v1243_v35 }
 0x565   :  { %2066 = vrcp.f32 %v1249_v38 }
 0x56e   :  { %v2065_v40 = vpop.eup %2064 }
 0x56f   :  { %v2067_v43 = vpop.eup %2066  ;;  %v1253_v51 = vmul.f32 %v2065_v40, %v2580_v59  ;;  %v2671_v59 = vld [vmem:[#allocation4 + $0x28] ss:$16 sps:$4 sm:$0xff]  }
 0x570   :  { %v1254_v30 = vmul.f32 %v2067_v43, %v2063_v39 }
 0x572   :  { %v2635_v36 = vadd.f32 %v1254_v30, %v1253_v51 }
 0x574   :  { %2068 = vtanh.f32 %v2635_v36 }
 0x57e   :  { %v2069_v18 = vpop.eup %2068 }
 0x57f   :  { %v1257_v50 = vadd.f32 1.0, %v2069_v18 }
 0x581   :  { %v1258_v58 = vmul.f32 %v1257_v50, %v1238_v56 }
 0x583   :  { %1260 = vst [vmem:[#allocation7 + $0x20] sm:$0xff] %v1258_v58  ;;  %v1263_v52 = vpack.c.bf16 %v1258_v58, %v1258_v58 }
 0x585   :  { %1297 = vmatmul.mubr.bf16.vlgmr.msra.gmra.mrb[40].mxu0 %v1263_v52  ;;  %1338 = vmatmul.mubr.bf16.vlgmr.msra.gmra.mrb[40].mxu1 %v1263_v52 }
 0x586   :  { %1350 = vmatpush1.bf16.msra.mxu0 %v2340_v44  ;;  %1391 = vmatpush1.bf16.msra.mxu1 %v2348_v47 }
 0x587   :  { %1381 = vmatprep.mubr.bf16.mxu0 %v2189_v0  ;;  %1422 = vmatprep.mubr.bf16.mxu1 %v2189_v0 }
 0x588   :  { %1459 = vmatprep.subr.bf16.mxu0 %v2643_v42  ;;  %1500 = vmatprep.subr.bf16.mxu1 %v2646_v57 }
 0x58d   :  { %1933 = vmatmul.mubr.msk.bf16.vlgmr.msra.gmra.mrb[44].mxu0 %vm337_vm1, %v1931_v48  ;;  %1935 = vmatmul.mubr.msk.bf16.vlgmr.msra.gmra.mrb[44].mxu1 %vm337_vm1, %v1931_v48 }
 0x58e   :  { %1460 = vmatpush1.bf16.msra.mxu0 %v2654_v46  ;;  %1501 = vmatpush1.bf16.msra.mxu1 %v2657_v24 }
 0x58f   :  { %1461 = vmatprep.subr.bf16.mxu0 %v2660_v55  ;;  %1502 = vmatprep.subr.bf16.mxu1 %v2663_v37 }
 0x590   :  { %1491 = vmatprep.mubr.bf16.mxu0 %v2189_v0  ;;  %1532 = vmatprep.mubr.bf16.mxu1 %v2189_v0 }
 0x592   :  { %1462 = vmatpush1.bf16.msra.mxu0 %v2668_v25  ;;  %1503 = vmatpush1.bf16.msra.mxu1 %v2671_v59 }
 0x593   :  { %1463 = vmatprep.subr.bf16.mxu0 %v2674_v61  ;;  %1504 = vmatprep.subr.bf16.mxu1 %v2677_v53 }
 0x596   :  { %1464 = vmatpush1.bf16.msra.mxu0 %v2680_v54  ;;  %1505 = vmatpush1.bf16.msra.mxu1 %v2683_v17 }
 0x597   :  { %1465 = vmatprep.subr.bf16.mxu0 %v2686_v19  ;;  %1506 = vmatprep.subr.bf16.mxu1 %v2689_v63 }
 0x59a   :  { %1466 = vmatpush1.bf16.msra.mxu0 %v2692_v1  ;;  %1507 = vmatpush1.bf16.msra.mxu1 %v2695_v2 }
 0x59b   :  { %1467 = vmatprep.subr.bf16.mxu0 %v2698_v3  ;;  %1508 = vmatprep.subr.bf16.mxu1 %v2701_v4 }
 0x59e   :  { %1468 = vmatpush1.bf16.msra.mxu0 %v2704_v5  ;;  %1509 = vmatpush1.bf16.msra.mxu1 %v2707_v6 }
 0x59f   :  { %1469 = vmatprep.subr.bf16.mxu0 %v2710_v7  ;;  %1510 = vmatprep.subr.bf16.mxu1 %v2713_v8 }
 0x5a2   :  { %1470 = vmatpush1.bf16.msra.mxu0 %v2716_v9  ;;  %1511 = vmatpush1.bf16.msra.mxu1 %v2719_v10 }
 0x5a3   :  { %1471 = vmatprep.subr.bf16.mxu0 %v2722_v11  ;;  %1512 = vmatprep.subr.bf16.mxu1 %v2725_v12 }
 0x5a6   :  { %1472 = vmatpush1.bf16.msra.mxu0 %v2728_v13  ;;  %1513 = vmatpush1.bf16.msra.mxu1 %v2731_v14 }
 0x5a7   :  { %1473 = vmatprep.subr.bf16.mxu0 %v2734_v15  ;;  %1514 = vmatprep.subr.bf16.mxu1 %v2737_v16 }
 0x5aa   :  { %1474 = vmatpush1.bf16.msra.mxu0 %v2740_v20  ;;  %1515 = vmatpush1.bf16.msra.mxu1 %v2743_v21 }
 0x5ab   :  { %1939 = vmatprep.subr.msk.bf16.mxu0 %vm341_vm0, %v2330_v41  ;;  %1941 = vmatprep.subr.msk.bf16.mxu1 %vm341_vm0, %v2342_v45 }
 0x658   :  { %v1298_v22 = vpop.f32.mrb[40].mxu0  ;;  %v1339_v23 = vpop.f32.mrb[40].mxu1 }
 0x659   :  { %v1300_v26 = vpop.f32.mrb[41].mxu0  ;;  %v1341_v27 = vpop.f32.mrb[41].mxu1 }
 0x65a   :  { %v1302_v28 = vpop.f32.mrb[42].mxu0  ;;  %v1343_v29 = vpop.f32.mrb[42].mxu1 }
 0x65b   :  { %v1303_v32 = vpop.f32.mrb[43].mxu0  ;;  %v1344_v33 = vpop.f32.mrb[43].mxu1 }
 0x660   :  { %v1383_v34 = vpop.f32.mrb[44].mxu0  ;;  %v1424_v35 = vpop.f32.mrb[44].mxu1 }
 0x661   :  { %v1384_v38 = vadd.f32 %v1383_v34, %v1298_v22  ;;  %v1425_v39 = vadd.f32 %v1424_v35, %v1339_v23  ;;  %v1385_v40 = vpop.f32.mrb[45].mxu0  ;;  %v1426_v43 = vpop.f32.mrb[45].mxu1 }
 0x662   :  { %v1386_v51 = vadd.f32 %v1385_v40, %v1300_v26  ;;  %v1427_v30 = vadd.f32 %v1426_v43, %v1341_v27  ;;  %v1387_v18 = vpop.f32.mrb[46].mxu0  ;;  %v1428_v56 = vpop.f32.mrb[46].mxu1 }
 0x663   :  { %v1431_v50 = vadd.f32 %v1384_v38, %v2402_v60  ;;  %v1388_v58 = vpop.f32.mrb[47].mxu0  ;;  %v1429_v52 = vpop.f32.mrb[47].mxu1 }
 0x664   :  { %v1432_v48 = vadd.f32 %v1386_v51, %v2404_v62  ;;  %v1434_v32 = vadd.f32 %v1427_v30, %v2409_v49  ;;  %v1433_v30 = vadd.f32 %v1425_v39, %v2416_v31 }
 0x665   :  { %v1936_v28 = vmul.f32 -1.442695, %v1431_v50 }
 0x666   :  { %v1937_v29 = vmul.f32 -1.442695, %v1432_v48 }
 0x667   :  { %2070 = vpow2.f32 %v1936_v28 }
 0x668   :  { %2072 = vpow2.f32 %v1937_v29 }
 0x669   :  { %2074 = vtanh.f32 %v1434_v32  ;;  %v1945_v32 = vld [vmem:[%s2835_s0 + $0x1c] sm:$0xf] }
 0x671   :  { %v2071_v22 = vpop.eup %2070 }
 0x672   :  { %v2073_v23 = vpop.eup %2072  ;;  %v1438_v33 = vadd.f32 1.0, %v2071_v22 }
 0x673   :  { %v1444_v34 = vadd.f32 1.0, %v2073_v23  ;;  %v2075_v26 = vpop.eup %2074 }
 0x674   :  { %2076 = vrcp.f32 %v1438_v33 }
 0x675   :  { %2078 = vrcp.f32 %v1444_v34 }
 0x67e   :  { %v2077_v27 = vpop.eup %2076 }
 0x67f   :  { %v2079_v35 = vpop.eup %2078  ;;  %v1448_v38 = vmul.f32 %v2077_v27, %v2635_v36  ;;  %v1938_v36 = vld [vmem:[%s2835_s0 + $0x18] sm:$0xf]  ;;  %s2192_s0 = smov [#allocation7]  }
 0x680   :  { %v1449_v40 = vmul.f32 %v2079_v35, %v2075_v26  ;;  %s1853_s20 = sshll.u32 %s2192_s0, 4  ;;  %s1854_s20 = int_to_ptr.vmem [resolvable:$true] %s1853_s20 }
 0x681   :  { %s2160_s21 = scalar_lea.vmem %s1854_s20, 1024  ;;  %p2165_p9 = scmp.lt.s32.totalorder %s1854_s20, %s1854_s20 }
 0x682   :  { %v2754_v43 = vadd.f32 %v1449_v40, %v1448_v38  ;;  %p2161_p8 = scmp.ne.s32.totalorder %s1854_s20, %s2160_s21  ;;  %p2166_p10 = scmp.lt.s32.totalorder %s2160_s21, %s2160_s21 }
 0x684   :  { %2080 = vtanh.f32 %v2754_v43  ;;  %p2167_p11 = por %p2166_p10, %p2165_p9 }
 0x686   :  { %p2168_p12 = pnand %p2167_p11, %p2161_p8 }
 0x68e   :  { %v2081_v51 = vpop.eup %2080 }
 0x68f   :  { %v1452_v18 = vadd.f32 1.0, %v2081_v51 }
 0x691   :  { %v1453_v56 = vmul.f32 %v1452_v18, %v1433_v30 }
 0x693   :  { %1455 = vst [vmem:[#allocation7 + $0x28] sm:$0xff] %v1453_v56  ;;  %v1458_v50 = vpack.c.bf16 %v1453_v56, %v1453_v56 }
 0x695   :  { %1492 = vmatmul.mubr.bf16.vlgmr.msra.gmra.mrb[48].mxu0 %v1458_v50  ;;  %1533 = vmatmul.mubr.bf16.vlgmr.msra.gmra.mrb[48].mxu1 %v1458_v50 }
 0x696   :  { %1545 = vmatpush1.bf16.msra.mxu0 %v2340_v44  ;;  %1586 = vmatpush1.bf16.msra.mxu1 %v2348_v47 }
 0x697   :  { %1576 = vmatprep.mubr.bf16.mxu0 %v2189_v0  ;;  %1617 = vmatprep.mubr.bf16.mxu1 %v2189_v0 }
 0x698   :  { %1654 = vmatprep.subr.bf16.mxu0 %v2643_v42  ;;  %1695 = vmatprep.subr.bf16.mxu1 %v2646_v57 }
 0x69d   :  { %1940 = vmatmul.mubr.msk.bf16.vlgmr.msra.gmra.mrb[52].mxu0 %vm337_vm1, %v1938_v36  ;;  %1942 = vmatmul.mubr.msk.bf16.vlgmr.msra.gmra.mrb[52].mxu1 %vm337_vm1, %v1938_v36 }
 0x69e   :  { %1655 = vmatpush1.bf16.msra.mxu0 %v2654_v46  ;;  %1696 = vmatpush1.bf16.msra.mxu1 %v2657_v24 }
 0x69f   :  { %1656 = vmatprep.subr.bf16.mxu0 %v2660_v55  ;;  %1697 = vmatprep.subr.bf16.mxu1 %v2663_v37 }
 0x6a0   :  { %1686 = vmatprep.mubr.bf16.mxu0 %v2189_v0  ;;  %1727 = vmatprep.mubr.bf16.mxu1 %v2189_v0 }
 0x6a2   :  { %1657 = vmatpush1.bf16.msra.mxu0 %v2668_v25  ;;  %1698 = vmatpush1.bf16.msra.mxu1 %v2671_v59 }
 0x6a3   :  { %1658 = vmatprep.subr.bf16.mxu0 %v2674_v61  ;;  %1699 = vmatprep.subr.bf16.mxu1 %v2677_v53 }
 0x6a6   :  { %1659 = vmatpush1.bf16.msra.mxu0 %v2680_v54  ;;  %1700 = vmatpush1.bf16.msra.mxu1 %v2683_v17 }
 0x6a7   :  { %1660 = vmatprep.subr.bf16.mxu0 %v2686_v19  ;;  %1701 = vmatprep.subr.bf16.mxu1 %v2689_v63 }
 0x6aa   :  { %1661 = vmatpush1.bf16.msra.mxu0 %v2692_v1  ;;  %1702 = vmatpush1.bf16.msra.mxu1 %v2695_v2 }
 0x6ab   :  { %1662 = vmatprep.subr.bf16.mxu0 %v2698_v3  ;;  %1703 = vmatprep.subr.bf16.mxu1 %v2701_v4 }
 0x6ae   :  { %1663 = vmatpush1.bf16.msra.mxu0 %v2704_v5  ;;  %1704 = vmatpush1.bf16.msra.mxu1 %v2707_v6 }
 0x6af   :  { %1664 = vmatprep.subr.bf16.mxu0 %v2710_v7  ;;  %1705 = vmatprep.subr.bf16.mxu1 %v2713_v8 }
 0x6b2   :  { %1665 = vmatpush1.bf16.msra.mxu0 %v2716_v9  ;;  %1706 = vmatpush1.bf16.msra.mxu1 %v2719_v10 }
 0x6b3   :  { %1666 = vmatprep.subr.bf16.mxu0 %v2722_v11  ;;  %1707 = vmatprep.subr.bf16.mxu1 %v2725_v12 }
 0x6b6   :  { %1667 = vmatpush1.bf16.msra.mxu0 %v2728_v13  ;;  %1708 = vmatpush1.bf16.msra.mxu1 %v2731_v14 }
 0x6b7   :  { %1668 = vmatprep.subr.bf16.mxu0 %v2734_v15  ;;  %1709 = vmatprep.subr.bf16.mxu1 %v2737_v16 }
 0x6ba   :  { %1669 = vmatpush1.bf16.msra.mxu0 %v2740_v20  ;;  %1710 = vmatpush1.bf16.msra.mxu1 %v2743_v21 }
 0x6bb   :  { %1946 = vmatprep.subr.msk.bf16.mxu0 %vm341_vm0, %v2330_v41  ;;  %1948 = vmatprep.subr.msk.bf16.mxu1 %vm341_vm0, %v2342_v45 }
 0x768   :  { %v1493_v42 = vpop.f32.mrb[48].mxu0  ;;  %v1534_v57 = vpop.f32.mrb[48].mxu1 }
 0x769   :  { %v1495_v46 = vpop.f32.mrb[49].mxu0  ;;  %v1536_v24 = vpop.f32.mrb[49].mxu1 }
 0x76a   :  { %v1497_v55 = vpop.f32.mrb[50].mxu0  ;;  %v1538_v37 = vpop.f32.mrb[50].mxu1 }
 0x76b   :  { %v1498_v25 = vpop.f32.mrb[51].mxu0  ;;  %v1539_v59 = vpop.f32.mrb[51].mxu1 }
 0x770   :  { %v1578_v61 = vpop.f32.mrb[52].mxu0  ;;  %v1619_v53 = vpop.f32.mrb[52].mxu1 }
 0x771   :  { %v1579_v54 = vadd.f32 %v1578_v61, %v1493_v42  ;;  %v1620_v17 = vadd.f32 %v1619_v53, %v1534_v57  ;;  %v1580_v19 = vpop.f32.mrb[53].mxu0  ;;  %v1621_v63 = vpop.f32.mrb[53].mxu1 }
 0x772   :  { %v1581_v1 = vadd.f32 %v1580_v19, %v1495_v46  ;;  %v1622_v2 = vadd.f32 %v1621_v63, %v1536_v24  ;;  %v1582_v41 = vpop.f32.mrb[54].mxu0  ;;  %v1623_v3 = vpop.f32.mrb[54].mxu1 }
 0x773   :  { %v1626_v45 = vadd.f32 %v1579_v54, %v2402_v60  ;;  %v1583_v4 = vpop.f32.mrb[55].mxu0  ;;  %v1624_v5 = vpop.f32.mrb[55].mxu1  ;;  %v1628_v52 = vadd.f32 %v1620_v17, %v2416_v31 }
 0x774   :  { %v1627_v6 = vadd.f32 %v1581_v1, %v2404_v62  ;;  %v1629_v9 = vadd.f32 %v1622_v2, %v2409_v49 }
 0x775   :  { %v1943_v7 = vmul.f32 -1.442695, %v1626_v45 }
 0x776   :  { %v1944_v8 = vmul.f32 -1.442695, %v1627_v6 }
 0x777   :  { %2082 = vpow2.f32 %v1943_v7 }
 0x778   :  { %2084 = vpow2.f32 %v1944_v8 }
 0x779   :  { %2086 = vtanh.f32 %v1629_v9 }
 0x781   :  { %v2083_v10 = vpop.eup %2082 }
 0x782   :  { %v2085_v11 = vpop.eup %2084  ;;  %v1633_v12 = vadd.f32 1.0, %v2083_v10 }
 0x783   :  { %v1639_v13 = vadd.f32 1.0, %v2085_v11  ;;  %v2087_v14 = vpop.eup %2086 }
 0x784   :  { %2088 = vrcp.f32 %v1633_v12 }
 0x785   :  { %2090 = vrcp.f32 %v1639_v13 }
 0x78e   :  { %v2089_v15 = vpop.eup %2088 }
 0x78f   :  { %v2091_v16 = vpop.eup %2090  ;;  %v1643_v20 = vmul.f32 %v2089_v15, %v2754_v43 }
 0x790   :  { %v1644_v21 = vmul.f32 %v2091_v16, %v2087_v14 }
 0x792   :  { %v1645_v39 = vadd.f32 %v1644_v21, %v1643_v20 }
 0x794   :  { %2092 = vtanh.f32 %v1645_v39 }
 0x79e   :  { %v2093_v58 = vpop.eup %2092 }
 0x79f   :  { %v1647_v48 = vadd.f32 1.0, %v2093_v58 }
 0x7a1   :  { %v1648_v28 = vmul.f32 %v1647_v48, %v1628_v52 }
 0x7a3   :  { %1650 = vst [vmem:[#allocation7 + $0x30] sm:$0xff] %v1648_v28  ;;  %v1653_v29 = vpack.c.bf16 %v1648_v28, %v1648_v28 }
 0x7a5   :  { %1687 = vmatmul.mubr.bf16.vlgmr.msra.gmra.mrb[56].mxu0 %v1653_v29  ;;  %1728 = vmatmul.mubr.bf16.vlgmr.msra.gmra.mrb[56].mxu1 %v1653_v29 }
 0x7a6   :  { %1740 = vmatpush1.bf16.msra.mxu0 %v2340_v44  ;;  %1781 = vmatpush1.bf16.msra.mxu1 %v2348_v47 }
 0x7a7   :  { %1771 = vmatprep.mubr.bf16.mxu0 %v2189_v0  ;;  %1812 = vmatprep.mubr.bf16.mxu1 %v2189_v0 }
 0x7ad   :  { %1947 = vmatmul.mubr.msk.bf16.vlgmr.msra.gmra.mrb[60].mxu0 %vm337_vm1, %v1945_v32  ;;  %1949 = vmatmul.mubr.msk.bf16.vlgmr.msra.gmra.mrb[60].mxu1 %vm337_vm1, %v1945_v32 }
 0x878   :  { %v1688_v22 = vpop.f32.mrb[56].mxu0  ;;  %v1729_v23 = vpop.f32.mrb[56].mxu1 }
 0x879   :  { %v1690_v33 = vpop.f32.mrb[57].mxu0  ;;  %v1731_v34 = vpop.f32.mrb[57].mxu1 }
 0x87a   :  { %v1692_v26 = vpop.f32.mrb[58].mxu0  ;;  %v1733_v44 = vpop.f32.mrb[58].mxu1 }
 0x87b   :  { %v1693_v27 = vpop.f32.mrb[59].mxu0  ;;  %v1734_v47 = vpop.f32.mrb[59].mxu1 }
 0x880   :  { %v1773_v35 = vpop.f32.mrb[60].mxu0  ;;  %v1814_v38 = vpop.f32.mrb[60].mxu1 }
 0x881   :  { %v1774_v40 = vadd.f32 %v1773_v35, %v1688_v22  ;;  %v1815_v0 = vadd.f32 %v1814_v38, %v1729_v23  ;;  %v1775_v43 = vpop.f32.mrb[61].mxu0  ;;  %v1816_v51 = vpop.f32.mrb[61].mxu1 }
 0x882   :  { %v1776_v30 = vadd.f32 %v1775_v43, %v1690_v33  ;;  %v1817_v18 = vadd.f32 %v1816_v51, %v1731_v34  ;;  %v1777_v56 = vpop.f32.mrb[62].mxu0  ;;  %v1818_v50 = vpop.f32.mrb[62].mxu1 }
 0x883   :  { %v1821_v36 = vadd.f32 %v1774_v40, %v2402_v60  ;;  %v1778_v42 = vpop.f32.mrb[63].mxu0  ;;  %v1819_v57 = vpop.f32.mrb[63].mxu1  ;;  %v1823_v2 = vadd.f32 %v1815_v0, %v2416_v31 }
 0x884   :  { %v1822_v46 = vadd.f32 %v1776_v30, %v2404_v62  ;;  %v1824_v37 = vadd.f32 %v1817_v18, %v2409_v49 }
 0x885   :  { %v1950_v24 = vmul.f32 -1.442695, %v1821_v36 }
 0x886   :  { %v1951_v55 = vmul.f32 -1.442695, %v1822_v46 }
 0x887   :  { %2094 = vpow2.f32 %v1950_v24 }
 0x888   :  { %2096 = vpow2.f32 %v1951_v55 }
 0x889   :  { %2098 = vtanh.f32 %v1824_v37 }
 0x891   :  { %v2095_v25 = vpop.eup %2094 }
 0x892   :  { %v2097_v59 = vpop.eup %2096  ;;  %v1828_v61 = vadd.f32 1.0, %v2095_v25 }
 0x893   :  { %v1834_v53 = vadd.f32 1.0, %v2097_v59  ;;  %v2099_v54 = vpop.eup %2098 }
 0x894   :  { %2100 = vrcp.f32 %v1828_v61 }
 0x895   :  { %2102 = vrcp.f32 %v1834_v53 }
 0x89e   :  { %v2101_v17 = vpop.eup %2100 }
 0x89f   :  { %v2103_v60 = vpop.eup %2102  ;;  %v1838_v19 = vmul.f32 %v2101_v17, %v1645_v39 }
 0x8a0   :  { %v1839_v63 = vmul.f32 %v2103_v60, %v2099_v54 }
 0x8a2   :  { %v1840_v1 = vadd.f32 %v1839_v63, %v1838_v19 }
 0x8a4   :  { %2104 = vtanh.f32 %v1840_v1 }
 0x8ae   :  { %v2105_v62 = vpop.eup %2104 }
 0x8af   :  { %v1842_v49 = vadd.f32 1.0, %v2105_v62 }
 0x8b1   :  { %v1843_v41 = vmul.f32 %v1842_v49, %v1823_v2 }
 0x8b3   :  { %1845 = vst [vmem:[#allocation7 + $0x38] sm:$0xff] %v1843_v41 }
 0x8b4   :  { %2171 = shalt.err (!%p2168_p12)
}
 0x8b5   :  { %s2172_s24 = scalar_lea.hbm %s2839_s4, 1024 }
 0x8b6   :  { %p2173_p13 = scmp.ne.s32.totalorder %s2839_s4, %s2172_s24  ;;  %p2176_p0 = scmp.lt.u32.totalorder %s2172_s24, %s2839_s4 }
 0x8b8   :  { %p2178_p1 = pnand %p2176_p0, %p2173_p13 }
 0x8ba   :  { %2181 = shalt.err (!%p2178_p1)
}
 0x8bb   :  { %s2193_s3 = smov 128   ;;  %s2194_s29 = smov 8  }
 0x8bc   :  { %1859 = dma.vmem_to_hbm [thread:$0]  %s1854_s20, 1024, %s2839_s4, [#allocation6], %s2193_s3, %s2193_s3, %s2194_s29  }
 0x8bd   :  { %2184 = dma.done.wait [#allocation6], 1024  }
 0x8be   :  { %2185 = vsyncadd [#allocation6], 4294966272 }
 0x8bf   :  { %1863 = vsyncpa [#allocation5], 1 }
 0x8c0   :  { %1864 = vsyncpa [#allocation6], 1 }

// kernel: tpu_custom_call.1
= control target key start
LH: loop header
LB: loop body
LE: loop exit
PB: predicated region body
PF: predicated region fallthrough
CT: control target
= control target key end

     0   :  { %9 = vsyncpa [#allocation5], 0  ;;  %s2835_s0 = inlined_call_operand.vmem [shape: bf16[8,8,4], index: 0, kind: input, shape index: {}]   ;;  %s2836_s1 = inlined_call_operand.vmem [shape: bf16[4,512], index: 1, kind: input, shape index: {}]   ;;  %s2837_s2 = inlined_call_operand.vmem [shape: f32[1,512], index: 2, kind: input, shape index: {}]   ;;  %s2838_s3 = inlined_call_operand.hbm [shape: bf16[128,512], index: 3, kind: input, shape index: {}]   ;;  %s2839_s4 = inlined_call_operand.hbm [shape: f32[8,8,128], index: 4, kind: output, shape index: {}]  }
   0x1   :  { %10 = vsyncpa [#allocation6], 0  ;;  %s2186_s15 = smov [#allocation4]   ;;  %s2138_s19 = scalar_lea.hbm %s2838_s3, 4096 }
   0x2   :  { %s22_s16 = sshll.u32 %s2186_s15, 4  ;;  %p2139_p0 = scmp.ne.s32.totalorder %s2838_s3, %s2138_s19  ;;  %s23_s16 = int_to_ptr.vmem [resolvable:$true] %s22_s16 }
   0x3   :  { %p2142_p1 = scmp.lt.u32.totalorder %s2138_s19, %s2838_s3 }
   0x5   :  { %p2144_p2 = pnand %p2142_p1, %p2139_p0 }
   0x7   :  { %2147 = shalt.err (!%p2144_p2)
}
   0x8   :  { %s2148_s24 = scalar_lea.vmem %s23_s16, 4096  ;;  %p2153_p4 = scmp.lt.s32.totalorder %s23_s16, %s23_s16 }
   0x9   :  { %p2149_p3 = scmp.ne.s32.totalorder %s23_s16, %s2148_s24  ;;  %p2154_p5 = scmp.lt.s32.totalorder %s2148_s24, %s2148_s24 }
   0xb   :  { %p2155_p6 = por %p2154_p5, %p2153_p4 }
   0xd   :  { %p2156_p7 = pnand %p2155_p6, %p2149_p3 }
   0xf   :  { %2159 = shalt.err (!%p2156_p7)
}
  0x10   :  { %s2187_s25 = smov 256   ;;  %s2188_s26 = smov 16  }
  0x11   :  { %28 = dma.hbm_to_vmem [thread:$0]  %s2838_s3, 4096, %s23_s16, [#allocation5], %s2187_s25, %s2187_s25, %s2188_s26  }
  0x12   :  { %2182 = dma.done.wait [#allocation5], 4096  }
  0x13   :  { %2183 = vsyncadd [#allocation5], 4294963200  ;;  %v2189_v0 = vmov 0   ;;  %v2234_v1 = vld [vmem:[#allocation4 + $0x4] ss:$16 sps:$4 sm:$0xff]   ;;  %v324_v19 = vlaneseq  ;;  %vm341_vm0 = vcmask 1041408  }
  0x14   :  { %269 = vmatprep.mubr.bf16.mxu0 %v2189_v0  ;;  %310 = vmatprep.mubr.bf16.mxu1 %v2189_v0  ;;  %v2236_v2 = vld [vmem:[#allocation4] ss:$16 sps:$4 sm:$0xff]   ;;  %v2239_v3 = vld [vmem:[#allocation4 + $0x24] ss:$16 sps:$4 sm:$0xff]   ;;  %v2244_v5 = vld [vmem:[#allocation4 + $0xc] ss:$16 sps:$4 sm:$0xff]  }
  0x15   :  { %237 = vmatprep.subr.bf16.mxu0 %v2234_v1  ;;  %v2241_v4 = vld [vmem:[#allocation4 + $0x20] ss:$16 sps:$4 sm:$0xff]   ;;  %v2247_v6 = vld [vmem:[#allocation4 + $0x44] ss:$16 sps:$4 sm:$0xff]   ;;  %v2249_v7 = vld [vmem:[#allocation4 + $0x8] ss:$16 sps:$4 sm:$0xff]   ;;  %278 = vmatprep.subr.bf16.mxu1 %v2244_v5 }
  0x16   :  { %238 = vmatpush1.bf16.msra.mxu0 %v2236_v2  ;;  %279 = vmatpush1.bf16.msra.mxu1 %v2249_v7  ;;  %v2253_v8 = vld [vmem:[#allocation4 + $0x2c] ss:$16 sps:$4 sm:$0xff]   ;;  %v2256_v9 = vld [vmem:[#allocation4 + $0x40] ss:$16 sps:$4 sm:$0xff]   ;;  %v2258_v10 = vld [vmem:[#allocation4 + $0x64] ss:$16 sps:$4 sm:$0xff]  }
  0x17   :  { %239 = vmatprep.subr.bf16.mxu0 %v2239_v3  ;;  %v2260_v11 = vld [vmem:[#allocation4 + $0x28] ss:$16 sps:$4 sm:$0xff]   ;;  %280 = vmatprep.subr.bf16.mxu1 %v2253_v8  ;;  %v2264_v12 = vld [vmem:[#allocation4 + $0x4c] ss:$16 sps:$4 sm:$0xff]   ;;  %v2267_v13 = vld [vmem:[#allocation4 + $0x60] ss:$16 sps:$4 sm:$0xff]  }
  0x18   :  { %v2269_v14 = vld [vmem:[#allocation4 + $0x48] ss:$16 sps:$4 sm:$0xff]   ;;  %v2273_v15 = vld [vmem:[#allocation4 + $0x6c] ss:$16 sps:$4 sm:$0xff]   ;;  %v2276_v16 = vld [vmem:[#allocation4 + $0x84] ss:$16 sps:$4 sm:$0xff]  }
  0x19   :  { %v2190_v17 = vmov 1983009808   ;;  %v2279_v20 = vld [vmem:[#allocation4 + $0x68] ss:$16 sps:$4 sm:$0xff]   ;;  %v2282_v21 = vld [vmem:[#allocation4 + $0x80] ss:$16 sps:$4 sm:$0xff]  }
  0x1a   :  { %240 = vmatpush1.bf16.msra.mxu0 %v2241_v4  ;;  %281 = vmatpush1.bf16.msra.mxu1 %v2260_v11  ;;  %v322_v18 = vunpack.c.l.s4 %v2190_v17  ;;  %v2285_v22 = vld [vmem:[#allocation4 + $0x8c] ss:$16 sps:$4 sm:$0xff]   ;;  %v2288_v23 = vld [vmem:[#allocation4 + $0xa4] ss:$16 sps:$4 sm:$0xff]   ;;  %v2290_v25 = vshrl.u32 %v324_v19, 7  ;;  %v2191_v46 = vmov 0.0|0.0  }
  0x1b   :  { %241 = vmatprep.subr.bf16.mxu0 %v2247_v6  ;;  %282 = vmatprep.subr.bf16.mxu1 %v2264_v12  ;;  %v2293_v26 = vld [vmem:[#allocation4 + $0x88] ss:$16 sps:$4 sm:$0xff]   ;;  %v2296_v27 = vld [vmem:[#allocation4 + $0xa0] ss:$16 sps:$4 sm:$0xff]   ;;  %v2299_v28 = vld [vmem:[#allocation4 + $0xac] ss:$16 sps:$4 sm:$0xff]  }
  0x1c   :  { %v323_v24 = vunpack.c.0.s8 %v322_v18  ;;  %v2302_v29 = vld [vmem:[#allocation4 + $0xc4] ss:$16 sps:$4 sm:$0xff]   ;;  %v2309_v32 = vld [vmem:[#allocation4 + $0xa8] ss:$16 sps:$4 sm:$0xff]   ;;  %v2312_v33 = vld [vmem:[#allocation4 + $0xc0] ss:$16 sps:$4 sm:$0xff]  }
  0x1d   :  { %v39_v31 = vld [vmem:[%s2836_s1] sm:$0xff]  ;;  %v2315_v34 = vld [vmem:[#allocation4 + $0xcc] ss:$16 sps:$4 sm:$0xff]   ;;  %v2321_v38 = vld [vmem:[#allocation4 + $0xc8] ss:$16 sps:$4 sm:$0xff]   ;;  %vm337_vm1 = vcmask 31744  }
  0x1e   :  { %242 = vmatpush1.bf16.msra.mxu0 %v2256_v9  ;;  %283 = vmatpush1.bf16.msra.mxu1 %v2269_v14  ;;  %v326_v30 = vsub.s32 %v323_v24, %v2290_v25  ;;  %v2318_v35 = vld [vmem:[#allocation4 + $0xe4] ss:$16 sps:$4 sm:$0xff]   ;;  %v320_v37 = vcombine.high %v39_v31, %v39_v31  ;;  %v2324_v39 = vld [vmem:[#allocation4 + $0xe0] ss:$16 sps:$4 sm:$0xff]   ;;  %v2327_v40 = vld [vmem:[#allocation4 + $0xec] ss:$16 sps:$4 sm:$0xff]  }
  0x1f   :  { %243 = vmatprep.subr.bf16.mxu0 %v2258_v10  ;;  %284 = vmatprep.subr.bf16.mxu1 %v2273_v15  ;;  %v2333_v43 = vld [vmem:[#allocation4 + $0xe8] ss:$16 sps:$4 sm:$0xff]   ;;  %v75_v48 = vld [vmem:[%s2835_s0] sm:$0xf]  ;;  %v439_v53 = vsub.s32 0, %v2290_v25  ;;  %v443_v56 = vsub.s32 1, %v2290_v25 }
  0x20   :  { %v327_v36 = vrot.slane %v39_v31, %v326_v30  ;;  %v334_v42 = vrot.slane %v320_v37, %v326_v30  ;;  %v72_v55 = vld [vmem:[%s2837_s2] sm:$0xf] }
  0x21   :  { %v2402_v60 = vrot.slane %v72_v55, %v439_v53  ;;  %v2404_v62 = vrot.slane %v72_v55, %v443_v56  ;;  %v451_v56 = vsub.s32 3, %v2290_v25 }
  0x22   :  { %244 = vmatpush1.bf16.msra.mxu0 %v2267_v13  ;;  %285 = vmatpush1.bf16.msra.mxu1 %v2279_v20  ;;  %v2330_v41 = vcombine.high %v327_v36, %v327_v36  ;;  %v2340_v44 = vsel %vm341_vm0, %v327_v36, 0  ;;  %v2342_v45 = vcombine.high %v334_v42, %v334_v42  ;;  %v2348_v47 = vsel %vm341_vm0, %v334_v42, 0 }
  0x23   :  { %245 = vmatprep.subr.bf16.mxu0 %v2276_v16  ;;  %286 = vmatprep.subr.bf16.mxu1 %v2285_v22 }
  0x26   :  { %246 = vmatpush1.bf16.msra.mxu0 %v2282_v21  ;;  %287 = vmatpush1.bf16.msra.mxu1 %v2293_v26 }
  0x27   :  { %247 = vmatprep.subr.bf16.mxu0 %v2288_v23  ;;  %288 = vmatprep.subr.bf16.mxu1 %v2299_v28 }
  0x2a   :  { %248 = vmatpush1.bf16.msra.mxu0 %v2296_v27  ;;  %289 = vmatpush1.bf16.msra.mxu1 %v2309_v32 }
  0x2b   :  { %249 = vmatprep.subr.bf16.mxu0 %v2302_v29  ;;  %290 = vmatprep.subr.bf16.mxu1 %v2315_v34 }
  0x2e   :  { %250 = vmatpush1.bf16.msra.mxu0 %v2312_v33  ;;  %291 = vmatpush1.bf16.msra.mxu1 %v2321_v38 }
  0x2f   :  { %251 = vmatprep.subr.bf16.mxu0 %v2318_v35  ;;  %292 = vmatprep.subr.bf16.mxu1 %v2327_v40 }
  0x32   :  { %252 = vmatpush1.bf16.msra.mxu0 %v2324_v39  ;;  %293 = vmatpush1.bf16.msra.mxu1 %v2333_v43 }
  0x33   :  { %1897 = vmatprep.subr.msk.bf16.mxu0 %vm341_vm0, %v2330_v41  ;;  %1899 = vmatprep.subr.msk.bf16.mxu1 %vm341_vm0, %v2342_v45 }
  0x35   :  { %270 = vmatmul.mubr.bf16.vlgmr.msra.gmra.mrb[0].mxu0 %v2191_v46  ;;  %311 = vmatmul.mubr.bf16.vlgmr.msra.gmra.mrb[0].mxu1 %v2191_v46 }
  0x36   :  { %355 = vmatpush1.bf16.msra.mxu0 %v2340_v44  ;;  %386 = vmatprep.mubr.bf16.mxu0 %v2189_v0 }
  0x37   :  { %484 = vmatprep.subr.bf16.mxu0 %v2234_v1  ;;  %396 = vmatpush1.bf16.msra.mxu1 %v2348_v47 }
  0x38   :  { %427 = vmatprep.mubr.bf16.mxu1 %v2189_v0  ;;  %525 = vmatprep.subr.bf16.mxu1 %v2244_v5 }
  0x3d   :  { %1898 = vmatmul.mubr.msk.bf16.vlgmr.msra.gmra.mrb[4].mxu0 %vm337_vm1, %v75_v48  ;;  %1900 = vmatmul.mubr.msk.bf16.vlgmr.msra.gmra.mrb[4].mxu1 %vm337_vm1, %v75_v48 }
  0x3e   :  { %485 = vmatpush1.bf16.msra.mxu0 %v2236_v2  ;;  %516 = vmatprep.mubr.bf16.mxu0 %v2189_v0 }
  0x3f   :  { %486 = vmatprep.subr.bf16.mxu0 %v2239_v3  ;;  %526 = vmatpush1.bf16.msra.mxu1 %v2249_v7 }
  0x40   :  { %557 = vmatprep.mubr.bf16.mxu1 %v2189_v0  ;;  %527 = vmatprep.subr.bf16.mxu1 %v2253_v8 }
  0x42   :  { %487 = vmatpush1.bf16.msra.mxu0 %v2241_v4 }
  0x43   :  { %488 = vmatprep.subr.bf16.mxu0 %v2247_v6  ;;  %528 = vmatpush1.bf16.msra.mxu1 %v2260_v11 }
  0x44   :  { %529 = vmatprep.subr.bf16.mxu1 %v2264_v12 }
  0x46   :  { %489 = vmatpush1.bf16.msra.mxu0 %v2256_v9 }
  0x47   :  { %490 = vmatprep.subr.bf16.mxu0 %v2258_v10  ;;  %530 = vmatpush1.bf16.msra.mxu1 %v2269_v14 }
  0x48   :  { %531 = vmatprep.subr.bf16.mxu1 %v2273_v15 }
  0x4a   :  { %491 = vmatpush1.bf16.msra.mxu0 %v2267_v13 }
  0x4b   :  { %492 = vmatprep.subr.bf16.mxu0 %v2276_v16  ;;  %532 = vmatpush1.bf16.msra.mxu1 %v2279_v20 }
  0x4c   :  { %533 = vmatprep.subr.bf16.mxu1 %v2285_v22 }
  0x4e   :  { %493 = vmatpush1.bf16.msra.mxu0 %v2282_v21 }
  0x4f   :  { %494 = vmatprep.subr.bf16.mxu0 %v2288_v23  ;;  %534 = vmatpush1.bf16.msra.mxu1 %v2293_v26 }
  0x50   :  { %535 = vmatprep.subr.bf16.mxu1 %v2299_v28 }
  0x52   :  { %495 = vmatpush1.bf16.msra.mxu0 %v2296_v27 }
  0x53   :  { %496 = vmatprep.subr.bf16.mxu0 %v2302_v29  ;;  %536 = vmatpush1.bf16.msra.mxu1 %v2309_v32 }
  0x54   :  { %537 = vmatprep.subr.bf16.mxu1 %v2315_v34 }
  0x56   :  { %497 = vmatpush1.bf16.msra.mxu0 %v2312_v33 }
  0x57   :  { %498 = vmatprep.subr.bf16.mxu0 %v2318_v35  ;;  %538 = vmatpush1.bf16.msra.mxu1 %v2321_v38 }
  0x58   :  { %539 = vmatprep.subr.bf16.mxu1 %v2327_v40 }
  0x5a   :  { %499 = vmatpush1.bf16.msra.mxu0 %v2324_v39 }
  0x5b   :  { %1904 = vmatprep.subr.msk.bf16.mxu0 %vm341_vm0, %v2330_v41  ;;  %540 = vmatpush1.bf16.msra.mxu1 %v2333_v43 }
  0x5c   :  { %1906 = vmatprep.subr.msk.bf16.mxu1 %vm341_vm0, %v2342_v45 }
 0x108   :  { %v271_v49 = vpop.f32.mrb[0].mxu0  ;;  %v312_v54 = vpop.f32.mrb[0].mxu1 }
 0x109   :  { %v273_v50 = vpop.f32.mrb[1].mxu0  ;;  %v314_v57 = vpop.f32.mrb[1].mxu1 }
 0x10a   :  { %v275_v51 = vpop.f32.mrb[2].mxu0  ;;  %v316_v58 = vpop.f32.mrb[2].mxu1 }
 0x10b   :  { %v276_v52 = vpop.f32.mrb[3].mxu0  ;;  %v317_v59 = vpop.f32.mrb[3].mxu1 }
 0x110   :  { %v388_v61 = vpop.f32.mrb[4].mxu0  ;;  %v429_v31 = vpop.f32.mrb[4].mxu1 }
 0x111   :  { %v389_v63 = vadd.f32 %v388_v61, %v271_v49  ;;  %v390_v17 = vpop.f32.mrb[5].mxu0  ;;  %v430_v37 = vadd.f32 %v429_v31, %v312_v54  ;;  %v431_v42 = vpop.f32.mrb[5].mxu1  ;;  %v2409_v49 = vrot.slane %v72_v55, %v451_v56 }
 0x112   :  { %v391_v18 = vadd.f32 %v390_v17, %v273_v50  ;;  %v392_v19 = vpop.f32.mrb[6].mxu0  ;;  %v432_v48 = vadd.f32 %v431_v42, %v314_v57  ;;  %v433_v51 = vpop.f32.mrb[6].mxu1 }
 0x113   :  { %v457_v24 = vadd.f32 %v2402_v60, %v389_v63  ;;  %v393_v30 = vpop.f32.mrb[7].mxu0  ;;  %v434_v53 = vpop.f32.mrb[7].mxu1 }
 0x114   :  { %v458_v36 = vadd.f32 %v2404_v62, %v391_v18  ;;  %v460_v50 = vadd.f32 %v2409_v49, %v432_v48  ;;  %v447_v30 = vsub.s32 2, %v2290_v25  ;;  %v1903_v25 = vld [vmem:[%s2835_s0 + $0x4] sm:$0xf] }
 0x115   :  { %v1901_v46 = vmul.f32 -1.442695, %v457_v24 }
 0x116   :  { %v1902_v52 = vmul.f32 -1.442695, %v458_v36  ;;  %v2416_v31 = vrot.slane %v72_v55, %v447_v30 }
 0x117   :  { %2010 = vpow2.f32 %v1901_v46 }
 0x118   :  { %2012 = vpow2.f32 %v1902_v52  ;;  %v459_v42 = vadd.f32 %v2416_v31, %v430_v37 }
 0x119   :  { %2014 = vtanh.f32 %v460_v50 }
 0x121   :  { %v2011_v58 = vpop.eup %2010 }
 0x122   :  { %v2013_v59 = vpop.eup %2012  ;;  %v464_v61 = vadd.f32 1.0, %v2011_v58 }
 0x123   :  { %v470_v63 = vadd.f32 1.0, %v2013_v59  ;;  %v2015_v54 = vpop.eup %2014 }
 0x124   :  { %2016 = vrcp.f32 %v464_v61 }
 0x125   :  { %2018 = vrcp.f32 %v470_v63 }
 0x12e   :  { %v2017_v57 = vpop.eup %2016 }
 0x12f   :  { %v2019_v17 = vpop.eup %2018  ;;  %v474_v18 = vmul.f32 0.0, %v2017_v57 }
 0x130   :  { %v475_v19 = vmul.f32 %v2019_v17, %v2015_v54 }
 0x132   :  { %v2412_v24 = vadd.f32 %v475_v19, %v474_v18 }
 0x134   :  { %2020 = vtanh.f32 %v2412_v24 }
 0x13e   :  { %v2021_v36 = vpop.eup %2020 }
 0x13f   :  { %v478_v46 = vadd.f32 1.0, %v2021_v36 }
 0x141   :  { %v479_v48 = vmul.f32 %v478_v46, %v459_v42 }
 0x143   :  { %480 = vst [vmem:[#allocation7] sm:$0xff] %v479_v48  ;;  %v483_v51 = vpack.c.bf16 %v479_v48, %v479_v48 }
 0x145   :  { %517 = vmatmul.mubr.bf16.vlgmr.msra.gmra.mrb[8].mxu0 %v483_v51  ;;  %558 = vmatmul.mubr.bf16.vlgmr.msra.gmra.mrb[8].mxu1 %v483_v51 }
 0x146   :  { %570 = vmatpush1.bf16.msra.mxu0 %v2340_v44  ;;  %611 = vmatpush1.bf16.msra.mxu1 %v2348_v47 }
 0x147   :  { %601 = vmatprep.mubr.bf16.mxu0 %v2189_v0  ;;  %642 = vmatprep.mubr.bf16.mxu1 %v2189_v0 }
 0x148   :  { %679 = vmatprep.subr.bf16.mxu0 %v2234_v1  ;;  %720 = vmatprep.subr.bf16.mxu1 %v2244_v5 }
 0x14d   :  { %1905 = vmatmul.mubr.msk.bf16.vlgmr.msra.gmra.mrb[12].mxu0 %vm337_vm1, %v1903_v25  ;;  %1907 = vmatmul.mubr.msk.bf16.vlgmr.msra.gmra.mrb[12].mxu1 %vm337_vm1, %v1903_v25 }
 0x14e   :  { %680 = vmatpush1.bf16.msra.mxu0 %v2236_v2  ;;  %721 = vmatpush1.bf16.msra.mxu1 %v2249_v7 }
 0x14f   :  { %681 = vmatprep.subr.bf16.mxu0 %v2239_v3  ;;  %722 = vmatprep.subr.bf16.mxu1 %v2253_v8 }
 0x150   :  { %711 = vmatprep.mubr.bf16.mxu0 %v2189_v0  ;;  %752 = vmatprep.mubr.bf16.mxu1 %v2189_v0 }
 0x152   :  { %682 = vmatpush1.bf16.msra.mxu0 %v2241_v4  ;;  %723 = vmatpush1.bf16.msra.mxu1 %v2260_v11 }
 0x153   :  { %683 = vmatprep.subr.bf16.mxu0 %v2247_v6  ;;  %724 = vmatprep.subr.bf16.mxu1 %v2264_v12 }
 0x156   :  { %684 = vmatpush1.bf16.msra.mxu0 %v2256_v9  ;;  %725 = vmatpush1.bf16.msra.mxu1 %v2269_v14 }
 0x157   :  { %685 = vmatprep.subr.bf16.mxu0 %v2258_v10  ;;  %726 = vmatprep.subr.bf16.mxu1 %v2273_v15 }
 0x15a   :  { %686 = vmatpush1.bf16.msra.mxu0 %v2267_v13  ;;  %727 = vmatpush1.bf16.msra.mxu1 %v2279_v20 }
 0x15b   :  { %687 = vmatprep.subr.bf16.mxu0 %v2276_v16  ;;  %728 = vmatprep.subr.bf16.mxu1 %v2285_v22 }
 0x15e   :  { %688 = vmatpush1.bf16.msra.mxu0 %v2282_v21  ;;  %729 = vmatpush1.bf16.msra.mxu1 %v2293_v26 }
 0x15f   :  { %689 = vmatprep.subr.bf16.mxu0 %v2288_v23  ;;  %730 = vmatprep.subr.bf16.mxu1 %v2299_v28 }
 0x162   :  { %690 = vmatpush1.bf16.msra.mxu0 %v2296_v27  ;;  %731 = vmatpush1.bf16.msra.mxu1 %v2309_v32 }
 0x163   :  { %691 = vmatprep.subr.bf16.mxu0 %v2302_v29  ;;  %732 = vmatprep.subr.bf16.mxu1 %v2315_v34 }
 0x166   :  { %692 = vmatpush1.bf16.msra.mxu0 %v2312_v33  ;;  %733 = vmatpush1.bf16.msra.mxu1 %v2321_v38 }
 0x167   :  { %693 = vmatprep.subr.bf16.mxu0 %v2318_v35  ;;  %734 = vmatprep.subr.bf16.mxu1 %v2327_v40 }
 0x16a   :  { %694 = vmatpush1.bf16.msra.mxu0 %v2324_v39  ;;  %735 = vmatpush1.bf16.msra.mxu1 %v2333_v43 }
 0x16b   :  { %1911 = vmatprep.subr.msk.bf16.mxu0 %vm341_vm0, %v2330_v41  ;;  %1913 = vmatprep.subr.msk.bf16.mxu1 %vm341_vm0, %v2342_v45 }
 0x218   :  { %v518_v55 = vpop.f32.mrb[8].mxu0  ;;  %v559_v37 = vpop.f32.mrb[8].mxu1 }
 0x219   :  { %v520_v52 = vpop.f32.mrb[9].mxu0  ;;  %v561_v53 = vpop.f32.mrb[9].mxu1 }
 0x21a   :  { %v522_v56 = vpop.f32.mrb[10].mxu0  ;;  %v563_v50 = vpop.f32.mrb[10].mxu1 }
 0x21b   :  { %v523_v58 = vpop.f32.mrb[11].mxu0  ;;  %v564_v59 = vpop.f32.mrb[11].mxu1 }
 0x220   :  { %v603_v61 = vpop.f32.mrb[12].mxu0  ;;  %v644_v63 = vpop.f32.mrb[12].mxu1 }
 0x221   :  { %v604_v54 = vadd.f32 %v603_v61, %v518_v55  ;;  %v645_v57 = vadd.f32 %v644_v63, %v559_v37  ;;  %v605_v17 = vpop.f32.mrb[13].mxu0  ;;  %v646_v18 = vpop.f32.mrb[13].mxu1 }
 0x222   :  { %v606_v19 = vadd.f32 %v605_v17, %v520_v52  ;;  %v647_v30 = vadd.f32 %v646_v18, %v561_v53  ;;  %v607_v36 = vpop.f32.mrb[14].mxu0  ;;  %v648_v42 = vpop.f32.mrb[14].mxu1 }
 0x223   :  { %v651_v46 = vadd.f32 %v604_v54, %v2402_v60  ;;  %v608_v48 = vpop.f32.mrb[15].mxu0  ;;  %v649_v51 = vpop.f32.mrb[15].mxu1 }
 0x224   :  { %v652_v25 = vadd.f32 %v606_v19, %v2404_v62  ;;  %v654_v58 = vadd.f32 %v647_v30, %v2409_v49  ;;  %v653_v30 = vadd.f32 %v645_v57, %v2416_v31 }
 0x225   :  { %v1908_v56 = vmul.f32 -1.442695, %v651_v46 }
 0x226   :  { %v1909_v50 = vmul.f32 -1.442695, %v652_v25 }
 0x227   :  { %2022 = vpow2.f32 %v1908_v56 }
 0x228   :  { %2024 = vpow2.f32 %v1909_v50 }
 0x229   :  { %2026 = vtanh.f32 %v654_v58 }
 0x231   :  { %v2023_v55 = vpop.eup %2022 }
 0x232   :  { %v2025_v37 = vpop.eup %2024  ;;  %v658_v59 = vadd.f32 1.0, %v2023_v55 }
 0x233   :  { %v664_v61 = vadd.f32 1.0, %v2025_v37  ;;  %v2027_v52 = vpop.eup %2026 }
 0x234   :  { %2028 = vrcp.f32 %v658_v59 }
 0x235   :  { %2030 = vrcp.f32 %v664_v61 }
 0x23e   :  { %v2029_v53 = vpop.eup %2028 }
 0x23f   :  { %v2031_v63 = vpop.eup %2030  ;;  %v668_v54 = vmul.f32 %v2029_v53, %v2412_v24  ;;  %v1910_v24 = vld [vmem:[%s2835_s0 + $0x8] sm:$0xf] }
 0x240   :  { %v669_v17 = vmul.f32 %v2031_v63, %v2027_v52 }
 0x242   :  { %v2470_v18 = vadd.f32 %v669_v17, %v668_v54 }
 0x244   :  { %2032 = vtanh.f32 %v2470_v18 }
 0x24e   :  { %v2033_v19 = vpop.eup %2032 }
 0x24f   :  { %v672_v36 = vadd.f32 1.0, %v2033_v19 }
 0x251   :  { %v673_v42 = vmul.f32 %v672_v36, %v653_v30 }
 0x253   :  { %675 = vst [vmem:[#allocation7 + $0x8] sm:$0xff] %v673_v42  ;;  %v678_v46 = vpack.c.bf16 %v673_v42, %v673_v42 }
 0x255   :  { %712 = vmatmul.mubr.bf16.vlgmr.msra.gmra.mrb[16].mxu0 %v678_v46  ;;  %753 = vmatmul.mubr.bf16.vlgmr.msra.gmra.mrb[16].mxu1 %v678_v46 }
 0x256   :  { %765 = vmatpush1.bf16.msra.mxu0 %v2340_v44  ;;  %806 = vmatpush1.bf16.msra.mxu1 %v2348_v47 }
 0x257   :  { %796 = vmatprep.mubr.bf16.mxu0 %v2189_v0  ;;  %837 = vmatprep.mubr.bf16.mxu1 %v2189_v0 }
 0x258   :  { %874 = vmatprep.subr.bf16.mxu0 %v2234_v1  ;;  %915 = vmatprep.subr.bf16.mxu1 %v2244_v5 }
 0x25d   :  { %1912 = vmatmul.mubr.msk.bf16.vlgmr.msra.gmra.mrb[20].mxu0 %vm337_vm1, %v1910_v24  ;;  %1914 = vmatmul.mubr.msk.bf16.vlgmr.msra.gmra.mrb[20].mxu1 %vm337_vm1, %v1910_v24 }
 0x25e   :  { %875 = vmatpush1.bf16.msra.mxu0 %v2236_v2  ;;  %916 = vmatpush1.bf16.msra.mxu1 %v2249_v7 }
 0x25f   :  { %876 = vmatprep.subr.bf16.mxu0 %v2239_v3  ;;  %917 = vmatprep.subr.bf16.mxu1 %v2253_v8 }
 0x260   :  { %906 = vmatprep.mubr.bf16.mxu0 %v2189_v0  ;;  %947 = vmatprep.mubr.bf16.mxu1 %v2189_v0 }
 0x262   :  { %877 = vmatpush1.bf16.msra.mxu0 %v2241_v4  ;;  %918 = vmatpush1.bf16.msra.mxu1 %v2260_v11 }
 0x263   :  { %878 = vmatprep.subr.bf16.mxu0 %v2247_v6  ;;  %919 = vmatprep.subr.bf16.mxu1 %v2264_v12 }
 0x266   :  { %879 = vmatpush1.bf16.msra.mxu0 %v2256_v9  ;;  %920 = vmatpush1.bf16.msra.mxu1 %v2269_v14 }
 0x267   :  { %880 = vmatprep.subr.bf16.mxu0 %v2258_v10  ;;  %921 = vmatprep.subr.bf16.mxu1 %v2273_v15 }
 0x26a   :  { %881 = vmatpush1.bf16.msra.mxu0 %v2267_v13  ;;  %922 = vmatpush1.bf16.msra.mxu1 %v2279_v20 }
 0x26b   :  { %882 = vmatprep.subr.bf16.mxu0 %v2276_v16  ;;  %923 = vmatprep.subr.bf16.mxu1 %v2285_v22 }
 0x26e   :  { %883 = vmatpush1.bf16.msra.mxu0 %v2282_v21  ;;  %924 = vmatpush1.bf16.msra.mxu1 %v2293_v26 }
 0x26f   :  { %884 = vmatprep.subr.bf16.mxu0 %v2288_v23  ;;  %925 = vmatprep.subr.bf16.mxu1 %v2299_v28 }
 0x272   :  { %885 = vmatpush1.bf16.msra.mxu0 %v2296_v27  ;;  %926 = vmatpush1.bf16.msra.mxu1 %v2309_v32 }
 0x273   :  { %886 = vmatprep.subr.bf16.mxu0 %v2302_v29  ;;  %927 = vmatprep.subr.bf16.mxu1 %v2315_v34 }
 0x276   :  { %887 = vmatpush1.bf16.msra.mxu0 %v2312_v33  ;;  %928 = vmatpush1.bf16.msra.mxu1 %v2321_v38 }
 0x277   :  { %888 = vmatprep.subr.bf16.mxu0 %v2318_v35  ;;  %929 = vmatprep.subr.bf16.mxu1 %v2327_v40 }
 0x27a   :  { %889 = vmatpush1.bf16.msra.mxu0 %v2324_v39  ;;  %930 = vmatpush1.bf16.msra.mxu1 %v2333_v43 }
 0x27b   :  { %1918 = vmatprep.subr.msk.bf16.mxu0 %vm341_vm0, %v2330_v41  ;;  %1920 = vmatprep.subr.msk.bf16.mxu1 %vm341_vm0, %v2342_v45 }
 0x328   :  { %v713_v57 = vpop.f32.mrb[16].mxu0  ;;  %v754_v48 = vpop.f32.mrb[16].mxu1 }
 0x329   :  { %v715_v51 = vpop.f32.mrb[17].mxu0  ;;  %v756_v25 = vpop.f32.mrb[17].mxu1 }
 0x32a   :  { %v717_v56 = vpop.f32.mrb[18].mxu0  ;;  %v758_v50 = vpop.f32.mrb[18].mxu1 }
 0x32b   :  { %v718_v58 = vpop.f32.mrb[19].mxu0  ;;  %v759_v55 = vpop.f32.mrb[19].mxu1 }
 0x330   :  { %v798_v37 = vpop.f32.mrb[20].mxu0  ;;  %v839_v59 = vpop.f32.mrb[20].mxu1 }
 0x331   :  { %v799_v61 = vadd.f32 %v798_v37, %v713_v57  ;;  %v840_v52 = vadd.f32 %v839_v59, %v754_v48  ;;  %v800_v53 = vpop.f32.mrb[21].mxu0  ;;  %v841_v63 = vpop.f32.mrb[21].mxu1 }
 0x332   :  { %v801_v54 = vadd.f32 %v800_v53, %v715_v51  ;;  %v842_v17 = vadd.f32 %v841_v63, %v756_v25  ;;  %v802_v19 = vpop.f32.mrb[22].mxu0  ;;  %v843_v30 = vpop.f32.mrb[22].mxu1 }
 0x333   :  { %v846_v36 = vadd.f32 %v799_v61, %v2402_v60  ;;  %v803_v42 = vpop.f32.mrb[23].mxu0  ;;  %v844_v46 = vpop.f32.mrb[23].mxu1 }
 0x334   :  { %v847_v24 = vadd.f32 %v801_v54, %v2404_v62  ;;  %v849_v58 = vadd.f32 %v842_v17, %v2409_v49  ;;  %v848_v17 = vadd.f32 %v840_v52, %v2416_v31 }
 0x335   :  { %v1915_v56 = vmul.f32 -1.442695, %v846_v36 }
 0x336   :  { %v1916_v50 = vmul.f32 -1.442695, %v847_v24 }
 0x337   :  { %2034 = vpow2.f32 %v1915_v56 }
 0x338   :  { %2036 = vpow2.f32 %v1916_v50 }
 0x339   :  { %2038 = vtanh.f32 %v849_v58 }
 0x341   :  { %v2035_v57 = vpop.eup %2034 }
 0x342   :  { %v2037_v48 = vpop.eup %2036  ;;  %v853_v55 = vadd.f32 1.0, %v2035_v57 }
 0x343   :  { %v859_v37 = vadd.f32 1.0, %v2037_v48  ;;  %v2039_v51 = vpop.eup %2038 }
 0x344   :  { %2040 = vrcp.f32 %v853_v55 }
 0x345   :  { %2042 = vrcp.f32 %v859_v37 }
 0x34e   :  { %v2041_v25 = vpop.eup %2040 }
 0x34f   :  { %v2043_v59 = vpop.eup %2042  ;;  %v863_v61 = vmul.f32 %v2041_v25, %v2470_v18  ;;  %v1917_v18 = vld [vmem:[%s2835_s0 + $0xc] sm:$0xf] }
 0x350   :  { %v864_v53 = vmul.f32 %v2043_v59, %v2039_v51 }
 0x352   :  { %v2525_v63 = vadd.f32 %v864_v53, %v863_v61 }
 0x354   :  { %2044 = vtanh.f32 %v2525_v63 }
 0x35e   :  { %v2045_v54 = vpop.eup %2044 }
 0x35f   :  { %v867_v19 = vadd.f32 1.0, %v2045_v54 }
 0x361   :  { %v868_v30 = vmul.f32 %v867_v19, %v848_v17 }
 0x363   :  { %870 = vst [vmem:[#allocation7 + $0x10] sm:$0xff] %v868_v30  ;;  %v873_v36 = vpack.c.bf16 %v868_v30, %v868_v30 }
 0x365   :  { %907 = vmatmul.mubr.bf16.vlgmr.msra.gmra.mrb[24].mxu0 %v873_v36  ;;  %948 = vmatmul.mubr.bf16.vlgmr.msra.gmra.mrb[24].mxu1 %v873_v36 }
 0x366   :  { %960 = vmatpush1.bf16.msra.mxu0 %v2340_v44  ;;  %1001 = vmatpush1.bf16.msra.mxu1 %v2348_v47 }
 0x367   :  { %991 = vmatprep.mubr.bf16.mxu0 %v2189_v0  ;;  %1032 = vmatprep.mubr.bf16.mxu1 %v2189_v0 }
 0x368   :  { %1069 = vmatprep.subr.bf16.mxu0 %v2234_v1  ;;  %1110 = vmatprep.subr.bf16.mxu1 %v2244_v5 }
 0x36d   :  { %1919 = vmatmul.mubr.msk.bf16.vlgmr.msra.gmra.mrb[28].mxu0 %vm337_vm1, %v1917_v18  ;;  %1921 = vmatmul.mubr.msk.bf16.vlgmr.msra.gmra.mrb[28].mxu1 %vm337_vm1, %v1917_v18 }
 0x36e   :  { %1070 = vmatpush1.bf16.msra.mxu0 %v2236_v2  ;;  %1111 = vmatpush1.bf16.msra.mxu1 %v2249_v7 }
 0x36f   :  { %1071 = vmatprep.subr.bf16.mxu0 %v2239_v3  ;;  %1112 = vmatprep.subr.bf16.mxu1 %v2253_v8 }
 0x370   :  { %1101 = vmatprep.mubr.bf16.mxu0 %v2189_v0  ;;  %1142 = vmatprep.mubr.bf16.mxu1 %v2189_v0 }
 0x372   :  { %1072 = vmatpush1.bf16.msra.mxu0 %v2241_v4  ;;  %1113 = vmatpush1.bf16.msra.mxu1 %v2260_v11 }
 0x373   :  { %1073 = vmatprep.subr.bf16.mxu0 %v2247_v6  ;;  %1114 = vmatprep.subr.bf16.mxu1 %v2264_v12 }
 0x376   :  { %1074 = vmatpush1.bf16.msra.mxu0 %v2256_v9  ;;  %1115 = vmatpush1.bf16.msra.mxu1 %v2269_v14 }
 0x377   :  { %1075 = vmatprep.subr.bf16.mxu0 %v2258_v10  ;;  %1116 = vmatprep.subr.bf16.mxu1 %v2273_v15 }
 0x37a   :  { %1076 = vmatpush1.bf16.msra.mxu0 %v2267_v13  ;;  %1117 = vmatpush1.bf16.msra.mxu1 %v2279_v20 }
 0x37b   :  { %1077 = vmatprep.subr.bf16.mxu0 %v2276_v16  ;;  %1118 = vmatprep.subr.bf16.mxu1 %v2285_v22 }
 0x37e   :  { %1078 = vmatpush1.bf16.msra.mxu0 %v2282_v21  ;;  %1119 = vmatpush1.bf16.msra.mxu1 %v2293_v26 }
 0x37f   :  { %1079 = vmatprep.subr.bf16.mxu0 %v2288_v23  ;;  %1120 = vmatprep.subr.bf16.mxu1 %v2299_v28 }
 0x382   :  { %1080 = vmatpush1.bf16.msra.mxu0 %v2296_v27  ;;  %1121 = vmatpush1.bf16.msra.mxu1 %v2309_v32 }
 0x383   :  { %1081 = vmatprep.subr.bf16.mxu0 %v2302_v29  ;;  %1122 = vmatprep.subr.bf16.mxu1 %v2315_v34 }
 0x386   :  { %1082 = vmatpush1.bf16.msra.mxu0 %v2312_v33  ;;  %1123 = vmatpush1.bf16.msra.mxu1 %v2321_v38 }
 0x387   :  { %1083 = vmatprep.subr.bf16.mxu0 %v2318_v35  ;;  %1124 = vmatprep.subr.bf16.mxu1 %v2327_v40 }
 0x38a   :  { %1084 = vmatpush1.bf16.msra.mxu0 %v2324_v39  ;;  %1125 = vmatpush1.bf16.msra.mxu1 %v2333_v43 }
 0x38b   :  { %1925 = vmatprep.subr.msk.bf16.mxu0 %vm341_vm0, %v2330_v41  ;;  %1927 = vmatprep.subr.msk.bf16.mxu1 %vm341_vm0, %v2342_v45 }
 0x438   :  { %v908_v52 = vpop.f32.mrb[24].mxu0  ;;  %v949_v42 = vpop.f32.mrb[24].mxu1 }
 0x439   :  { %v910_v46 = vpop.f32.mrb[25].mxu0  ;;  %v951_v24 = vpop.f32.mrb[25].mxu1 }
 0x43a   :  { %v912_v56 = vpop.f32.mrb[26].mxu0  ;;  %v953_v50 = vpop.f32.mrb[26].mxu1 }
 0x43b   :  { %v913_v58 = vpop.f32.mrb[27].mxu0  ;;  %v954_v57 = vpop.f32.mrb[27].mxu1 }
 0x440   :  { %v993_v48 = vpop.f32.mrb[28].mxu0  ;;  %v1034_v55 = vpop.f32.mrb[28].mxu1 }
 0x441   :  { %v994_v37 = vadd.f32 %v993_v48, %v908_v52  ;;  %v1035_v51 = vadd.f32 %v1034_v55, %v949_v42  ;;  %v995_v25 = vpop.f32.mrb[29].mxu0  ;;  %v1036_v59 = vpop.f32.mrb[29].mxu1 }
 0x442   :  { %v996_v61 = vadd.f32 %v995_v25, %v910_v46  ;;  %v1037_v53 = vadd.f32 %v1036_v59, %v951_v24  ;;  %v997_v54 = vpop.f32.mrb[30].mxu0  ;;  %v1038_v17 = vpop.f32.mrb[30].mxu1 }
 0x443   :  { %v1041_v19 = vadd.f32 %v994_v37, %v2402_v60  ;;  %v998_v30 = vpop.f32.mrb[31].mxu0  ;;  %v1039_v36 = vpop.f32.mrb[31].mxu1 }
 0x444   :  { %v1042_v18 = vadd.f32 %v996_v61, %v2404_v62  ;;  %v1044_v58 = vadd.f32 %v1037_v53, %v2409_v49  ;;  %v1043_v53 = vadd.f32 %v1035_v51, %v2416_v31 }
 0x445   :  { %v1922_v56 = vmul.f32 -1.442695, %v1041_v19 }
 0x446   :  { %v1923_v50 = vmul.f32 -1.442695, %v1042_v18 }
 0x447   :  { %2046 = vpow2.f32 %v1922_v56 }
 0x448   :  { %2048 = vpow2.f32 %v1923_v50 }
 0x449   :  { %2050 = vtanh.f32 %v1044_v58 }
 0x451   :  { %v2047_v52 = vpop.eup %2046 }
 0x452   :  { %v2049_v42 = vpop.eup %2048  ;;  %v1048_v57 = vadd.f32 1.0, %v2047_v52 }
 0x453   :  { %v1054_v48 = vadd.f32 1.0, %v2049_v42  ;;  %v2051_v46 = vpop.eup %2050  ;;  %v2643_v42 = vld [vmem:[#allocation4 + $0x4] ss:$16 sps:$4 sm:$0xff]  }
 0x454   :  { %2052 = vrcp.f32 %v1048_v57  ;;  %v2646_v57 = vld [vmem:[#allocation4 + $0xc] ss:$16 sps:$4 sm:$0xff]  }
 0x455   :  { %2054 = vrcp.f32 %v1054_v48  ;;  %v1931_v48 = vld [vmem:[%s2835_s0 + $0x14] sm:$0xf] }
 0x45e   :  { %v2053_v24 = vpop.eup %2052 }
 0x45f   :  { %v2055_v55 = vpop.eup %2054  ;;  %v1058_v37 = vmul.f32 %v2053_v24, %v2525_v63  ;;  %v1924_v63 = vld [vmem:[%s2835_s0 + $0x10] sm:$0xf]  ;;  %v2657_v24 = vld [vmem:[#allocation4 + $0x8] ss:$16 sps:$4 sm:$0xff]  }
 0x460   :  { %v1059_v25 = vmul.f32 %v2055_v55, %v2051_v46  ;;  %v2654_v46 = vld [vmem:[#allocation4] ss:$16 sps:$4 sm:$0xff]   ;;  %v2660_v55 = vld [vmem:[#allocation4 + $0x24] ss:$16 sps:$4 sm:$0xff]  }
 0x462   :  { %v2580_v59 = vadd.f32 %v1059_v25, %v1058_v37  ;;  %v2663_v37 = vld [vmem:[#allocation4 + $0x2c] ss:$16 sps:$4 sm:$0xff]   ;;  %v2668_v25 = vld [vmem:[#allocation4 + $0x20] ss:$16 sps:$4 sm:$0xff]  }
 0x464   :  { %2056 = vtanh.f32 %v2580_v59 }
 0x46e   :  { %v2057_v61 = vpop.eup %2056 }
 0x46f   :  { %v1062_v54 = vadd.f32 1.0, %v2057_v61  ;;  %v2674_v61 = vld [vmem:[#allocation4 + $0x44] ss:$16 sps:$4 sm:$0xff]  }
 0x471   :  { %v1063_v17 = vmul.f32 %v1062_v54, %v1043_v53  ;;  %v2677_v53 = vld [vmem:[#allocation4 + $0x4c] ss:$16 sps:$4 sm:$0xff]   ;;  %v2680_v54 = vld [vmem:[#allocation4 + $0x40] ss:$16 sps:$4 sm:$0xff]  }
 0x473   :  { %1065 = vst [vmem:[#allocation7 + $0x18] sm:$0xff] %v1063_v17  ;;  %v1068_v19 = vpack.c.bf16 %v1063_v17, %v1063_v17  ;;  %v2683_v17 = vld [vmem:[#allocation4 + $0x48] ss:$16 sps:$4 sm:$0xff]  }
 0x475   :  { %1102 = vmatmul.mubr.bf16.vlgmr.msra.gmra.mrb[32].mxu0 %v1068_v19  ;;  %1143 = vmatmul.mubr.bf16.vlgmr.msra.gmra.mrb[32].mxu1 %v1068_v19  ;;  %v2686_v19 = vld [vmem:[#allocation4 + $0x64] ss:$16 sps:$4 sm:$0xff]  }
 0x476   :  { %1155 = vmatpush1.bf16.msra.mxu0 %v2340_v44  ;;  %1196 = vmatpush1.bf16.msra.mxu1 %v2348_v47 }
 0x477   :  { %1186 = vmatprep.mubr.bf16.mxu0 %v2189_v0  ;;  %1227 = vmatprep.mubr.bf16.mxu1 %v2189_v0 }
 0x478   :  { %1264 = vmatprep.subr.bf16.mxu0 %v2234_v1  ;;  %1305 = vmatprep.subr.bf16.mxu1 %v2244_v5 }
 0x47d   :  { %1926 = vmatmul.mubr.msk.bf16.vlgmr.msra.gmra.mrb[36].mxu0 %vm337_vm1, %v1924_v63  ;;  %1928 = vmatmul.mubr.msk.bf16.vlgmr.msra.gmra.mrb[36].mxu1 %vm337_vm1, %v1924_v63  ;;  %v2689_v63 = vld [vmem:[#allocation4 + $0x6c] ss:$16 sps:$4 sm:$0xff]  }
 0x47e   :  { %1265 = vmatpush1.bf16.msra.mxu0 %v2236_v2  ;;  %1306 = vmatpush1.bf16.msra.mxu1 %v2249_v7 }
 0x47f   :  { %1266 = vmatprep.subr.bf16.mxu0 %v2239_v3  ;;  %1307 = vmatprep.subr.bf16.mxu1 %v2253_v8 }
 0x480   :  { %1296 = vmatprep.mubr.bf16.mxu0 %v2189_v0  ;;  %1337 = vmatprep.mubr.bf16.mxu1 %v2189_v0 }
 0x482   :  { %1267 = vmatpush1.bf16.msra.mxu0 %v2241_v4  ;;  %1308 = vmatpush1.bf16.msra.mxu1 %v2260_v11 }
 0x483   :  { %1268 = vmatprep.subr.bf16.mxu0 %v2247_v6  ;;  %1309 = vmatprep.subr.bf16.mxu1 %v2264_v12 }
 0x486   :  { %1269 = vmatpush1.bf16.msra.mxu0 %v2256_v9  ;;  %1310 = vmatpush1.bf16.msra.mxu1 %v2269_v14 }
 0x487   :  { %1270 = vmatprep.subr.bf16.mxu0 %v2258_v10  ;;  %1311 = vmatprep.subr.bf16.mxu1 %v2273_v15 }
 0x48a   :  { %1271 = vmatpush1.bf16.msra.mxu0 %v2267_v13  ;;  %1312 = vmatpush1.bf16.msra.mxu1 %v2279_v20 }
 0x48b   :  { %1272 = vmatprep.subr.bf16.mxu0 %v2276_v16  ;;  %1313 = vmatprep.subr.bf16.mxu1 %v2285_v22 }
 0x48e   :  { %1273 = vmatpush1.bf16.msra.mxu0 %v2282_v21  ;;  %1314 = vmatpush1.bf16.msra.mxu1 %v2293_v26 }
 0x48f   :  { %1274 = vmatprep.subr.bf16.mxu0 %v2288_v23  ;;  %1315 = vmatprep.subr.bf16.mxu1 %v2299_v28 }
 0x492   :  { %1275 = vmatpush1.bf16.msra.mxu0 %v2296_v27  ;;  %1316 = vmatpush1.bf16.msra.mxu1 %v2309_v32 }
 0x493   :  { %1276 = vmatprep.subr.bf16.mxu0 %v2302_v29  ;;  %1317 = vmatprep.subr.bf16.mxu1 %v2315_v34 }
 0x496   :  { %1277 = vmatpush1.bf16.msra.mxu0 %v2312_v33  ;;  %1318 = vmatpush1.bf16.msra.mxu1 %v2321_v38 }
 0x497   :  { %1278 = vmatprep.subr.bf16.mxu0 %v2318_v35  ;;  %1319 = vmatprep.subr.bf16.mxu1 %v2327_v40 }
 0x49a   :  { %1279 = vmatpush1.bf16.msra.mxu0 %v2324_v39  ;;  %1320 = vmatpush1.bf16.msra.mxu1 %v2333_v43 }
 0x49b   :  { %1932 = vmatprep.subr.msk.bf16.mxu0 %vm341_vm0, %v2330_v41  ;;  %1934 = vmatprep.subr.msk.bf16.mxu1 %vm341_vm0, %v2342_v45 }
 0x548   :  { %v1103_v1 = vpop.f32.mrb[32].mxu0  ;;  %v1144_v2 = vpop.f32.mrb[32].mxu1 }
 0x549   :  { %v1105_v3 = vpop.f32.mrb[33].mxu0  ;;  %v1146_v4 = vpop.f32.mrb[33].mxu1 }
 0x54a   :  { %v1107_v5 = vpop.f32.mrb[34].mxu0  ;;  %v1148_v6 = vpop.f32.mrb[34].mxu1 }
 0x54b   :  { %v1108_v7 = vpop.f32.mrb[35].mxu0  ;;  %v1149_v8 = vpop.f32.mrb[35].mxu1  ;;  %v2704_v5 = vld [vmem:[#allocation4 + $0x80] ss:$16 sps:$4 sm:$0xff]   ;;  %v2707_v6 = vld [vmem:[#allocation4 + $0x88] ss:$16 sps:$4 sm:$0xff]  }
 0x54c   :  { %v2710_v7 = vld [vmem:[#allocation4 + $0xa4] ss:$16 sps:$4 sm:$0xff]   ;;  %v2713_v8 = vld [vmem:[#allocation4 + $0xac] ss:$16 sps:$4 sm:$0xff]  }
 0x550   :  { %v1188_v9 = vpop.f32.mrb[36].mxu0  ;;  %v1229_v10 = vpop.f32.mrb[36].mxu1 }
 0x551   :  { %v1189_v11 = vadd.f32 %v1188_v9, %v1103_v1  ;;  %v1230_v12 = vadd.f32 %v1229_v10, %v1144_v2  ;;  %v1190_v13 = vpop.f32.mrb[37].mxu0  ;;  %v1231_v14 = vpop.f32.mrb[37].mxu1  ;;  %v2692_v1 = vld [vmem:[#allocation4 + $0x60] ss:$16 sps:$4 sm:$0xff]   ;;  %v2695_v2 = vld [vmem:[#allocation4 + $0x68] ss:$16 sps:$4 sm:$0xff]  }
 0x552   :  { %v1191_v15 = vadd.f32 %v1190_v13, %v1105_v3  ;;  %v1232_v16 = vadd.f32 %v1231_v14, %v1146_v4  ;;  %v1192_v20 = vpop.f32.mrb[38].mxu0  ;;  %v1233_v21 = vpop.f32.mrb[38].mxu1  ;;  %v2698_v3 = vld [vmem:[#allocation4 + $0x84] ss:$16 sps:$4 sm:$0xff]   ;;  %v2701_v4 = vld [vmem:[#allocation4 + $0x8c] ss:$16 sps:$4 sm:$0xff]  }
 0x553   :  { %v1236_v22 = vadd.f32 %v1189_v11, %v2402_v60  ;;  %v1193_v23 = vpop.f32.mrb[39].mxu0  ;;  %v1234_v26 = vpop.f32.mrb[39].mxu1  ;;  %v1238_v56 = vadd.f32 %v1230_v12, %v2416_v31  ;;  %v2716_v9 = vld [vmem:[#allocation4 + $0xa0] ss:$16 sps:$4 sm:$0xff]   ;;  %v2719_v10 = vld [vmem:[#allocation4 + $0xa8] ss:$16 sps:$4 sm:$0xff]  }
 0x554   :  { %v1237_v27 = vadd.f32 %v1191_v15, %v2404_v62  ;;  %v1239_v32 = vadd.f32 %v1232_v16, %v2409_v49  ;;  %v2722_v11 = vld [vmem:[#allocation4 + $0xc4] ss:$16 sps:$4 sm:$0xff]   ;;  %v2725_v12 = vld [vmem:[#allocation4 + $0xcc] ss:$16 sps:$4 sm:$0xff]   ;;  %v2728_v13 = vld [vmem:[#allocation4 + $0xc0] ss:$16 sps:$4 sm:$0xff]  }
 0x555   :  { %v1929_v28 = vmul.f32 -1.442695, %v1236_v22  ;;  %v2731_v14 = vld [vmem:[#allocation4 + $0xc8] ss:$16 sps:$4 sm:$0xff]   ;;  %v2734_v15 = vld [vmem:[#allocation4 + $0xe4] ss:$16 sps:$4 sm:$0xff]  }
 0x556   :  { %v1930_v29 = vmul.f32 -1.442695, %v1237_v27  ;;  %v2737_v16 = vld [vmem:[#allocation4 + $0xec] ss:$16 sps:$4 sm:$0xff]   ;;  %v2740_v20 = vld [vmem:[#allocation4 + $0xe0] ss:$16 sps:$4 sm:$0xff]  }
 0x557   :  { %2058 = vpow2.f32 %v1929_v28  ;;  %v2743_v21 = vld [vmem:[#allocation4 + $0xe8] ss:$16 sps:$4 sm:$0xff]  }
 0x558   :  { %2060 = vpow2.f32 %v1930_v29 }
 0x559   :  { %2062 = vtanh.f32 %v1239_v32 }
 0x561   :  { %v2059_v33 = vpop.eup %2058 }
 0x562   :  { %v2061_v34 = vpop.eup %2060  ;;  %v1243_v35 = vadd.f32 1.0, %v2059_v33 }
 0x563   :  { %v1249_v38 = vadd.f32 1.0, %v2061_v34  ;;  %v2063_v39 = vpop.eup %2062 }
 0x564   :  { %2064 = vrcp.f32 %v1243_v35 }
 0x565   :  { %2066 = vrcp.f32 %v1249_v38 }
 0x56e   :  { %v2065_v40 = vpop.eup %2064 }
 0x56f   :  { %v2067_v43 = vpop.eup %2066  ;;  %v1253_v51 = vmul.f32 %v2065_v40, %v2580_v59  ;;  %v2671_v59 = vld [vmem:[#allocation4 + $0x28] ss:$16 sps:$4 sm:$0xff]  }
 0x570   :  { %v1254_v30 = vmul.f32 %v2067_v43, %v2063_v39 }
 0x572   :  { %v2635_v36 = vadd.f32 %v1254_v30, %v1253_v51 }
 0x574   :  { %2068 = vtanh.f32 %v2635_v36 }
 0x57e   :  { %v2069_v18 = vpop.eup %2068 }
 0x57f   :  { %v1257_v50 = vadd.f32 1.0, %v2069_v18 }
 0x581   :  { %v1258_v58 = vmul.f32 %v1257_v50, %v1238_v56 }
 0x583   :  { %1260 = vst [vmem:[#allocation7 + $0x20] sm:$0xff] %v1258_v58  ;;  %v1263_v52 = vpack.c.bf16 %v1258_v58, %v1258_v58 }
 0x585   :  { %1297 = vmatmul.mubr.bf16.vlgmr.msra.gmra.mrb[40].mxu0 %v1263_v52  ;;  %1338 = vmatmul.mubr.bf16.vlgmr.msra.gmra.mrb[40].mxu1 %v1263_v52 }
 0x586   :  { %1350 = vmatpush1.bf16.msra.mxu0 %v2340_v44  ;;  %1391 = vmatpush1.bf16.msra.mxu1 %v2348_v47 }
 0x587   :  { %1381 = vmatprep.mubr.bf16.mxu0 %v2189_v0  ;;  %1422 = vmatprep.mubr.bf16.mxu1 %v2189_v0 }
 0x588   :  { %1459 = vmatprep.subr.bf16.mxu0 %v2643_v42  ;;  %1500 = vmatprep.subr.bf16.mxu1 %v2646_v57 }
 0x58d   :  { %1933 = vmatmul.mubr.msk.bf16.vlgmr.msra.gmra.mrb[44].mxu0 %vm337_vm1, %v1931_v48  ;;  %1935 = vmatmul.mubr.msk.bf16.vlgmr.msra.gmra.mrb[44].mxu1 %vm337_vm1, %v1931_v48 }
 0x58e   :  { %1460 = vmatpush1.bf16.msra.mxu0 %v2654_v46  ;;  %1501 = vmatpush1.bf16.msra.mxu1 %v2657_v24 }
 0x58f   :  { %1461 = vmatprep.subr.bf16.mxu0 %v2660_v55  ;;  %1502 = vmatprep.subr.bf16.mxu1 %v2663_v37 }
 0x590   :  { %1491 = vmatprep.mubr.bf16.mxu0 %v2189_v0  ;;  %1532 = vmatprep.mubr.bf16.mxu1 %v2189_v0 }
 0x592   :  { %1462 = vmatpush1.bf16.msra.mxu0 %v2668_v25  ;;  %1503 = vmatpush1.bf16.msra.mxu1 %v2671_v59 }
 0x593   :  { %1463 = vmatprep.subr.bf16.mxu0 %v2674_v61  ;;  %1504 = vmatprep.subr.bf16.mxu1 %v2677_v53 }
 0x596   :  { %1464 = vmatpush1.bf16.msra.mxu0 %v2680_v54  ;;  %1505 = vmatpush1.bf16.msra.mxu1 %v2683_v17 }
 0x597   :  { %1465 = vmatprep.subr.bf16.mxu0 %v2686_v19  ;;  %1506 = vmatprep.subr.bf16.mxu1 %v2689_v63 }
 0x59a   :  { %1466 = vmatpush1.bf16.msra.mxu0 %v2692_v1  ;;  %1507 = vmatpush1.bf16.msra.mxu1 %v2695_v2 }
 0x59b   :  { %1467 = vmatprep.subr.bf16.mxu0 %v2698_v3  ;;  %1508 = vmatprep.subr.bf16.mxu1 %v2701_v4 }
 0x59e   :  { %1468 = vmatpush1.bf16.msra.mxu0 %v2704_v5  ;;  %1509 = vmatpush1.bf16.msra.mxu1 %v2707_v6 }
 0x59f   :  { %1469 = vmatprep.subr.bf16.mxu0 %v2710_v7  ;;  %1510 = vmatprep.subr.bf16.mxu1 %v2713_v8 }
 0x5a2   :  { %1470 = vmatpush1.bf16.msra.mxu0 %v2716_v9  ;;  %1511 = vmatpush1.bf16.msra.mxu1 %v2719_v10 }
 0x5a3   :  { %1471 = vmatprep.subr.bf16.mxu0 %v2722_v11  ;;  %1512 = vmatprep.subr.bf16.mxu1 %v2725_v12 }
 0x5a6   :  { %1472 = vmatpush1.bf16.msra.mxu0 %v2728_v13  ;;  %1513 = vmatpush1.bf16.msra.mxu1 %v2731_v14 }
 0x5a7   :  { %1473 = vmatprep.subr.bf16.mxu0 %v2734_v15  ;;  %1514 = vmatprep.subr.bf16.mxu1 %v2737_v16 }
 0x5aa   :  { %1474 = vmatpush1.bf16.msra.mxu0 %v2740_v20  ;;  %1515 = vmatpush1.bf16.msra.mxu1 %v2743_v21 }
 0x5ab   :  { %1939 = vmatprep.subr.msk.bf16.mxu0 %vm341_vm0, %v2330_v41  ;;  %1941 = vmatprep.subr.msk.bf16.mxu1 %vm341_vm0, %v2342_v45 }
 0x658   :  { %v1298_v22 = vpop.f32.mrb[40].mxu0  ;;  %v1339_v23 = vpop.f32.mrb[40].mxu1 }
 0x659   :  { %v1300_v26 = vpop.f32.mrb[41].mxu0  ;;  %v1341_v27 = vpop.f32.mrb[41].mxu1 }
 0x65a   :  { %v1302_v28 = vpop.f32.mrb[42].mxu0  ;;  %v1343_v29 = vpop.f32.mrb[42].mxu1 }
 0x65b   :  { %v1303_v32 = vpop.f32.mrb[43].mxu0  ;;  %v1344_v33 = vpop.f32.mrb[43].mxu1 }
 0x660   :  { %v1383_v34 = vpop.f32.mrb[44].mxu0  ;;  %v1424_v35 = vpop.f32.mrb[44].mxu1 }
 0x661   :  { %v1384_v38 = vadd.f32 %v1383_v34, %v1298_v22  ;;  %v1425_v39 = vadd.f32 %v1424_v35, %v1339_v23  ;;  %v1385_v40 = vpop.f32.mrb[45].mxu0  ;;  %v1426_v43 = vpop.f32.mrb[45].mxu1 }
 0x662   :  { %v1386_v51 = vadd.f32 %v1385_v40, %v1300_v26  ;;  %v1427_v30 = vadd.f32 %v1426_v43, %v1341_v27  ;;  %v1387_v18 = vpop.f32.mrb[46].mxu0  ;;  %v1428_v56 = vpop.f32.mrb[46].mxu1 }
 0x663   :  { %v1431_v50 = vadd.f32 %v1384_v38, %v2402_v60  ;;  %v1388_v58 = vpop.f32.mrb[47].mxu0  ;;  %v1429_v52 = vpop.f32.mrb[47].mxu1 }
 0x664   :  { %v1432_v48 = vadd.f32 %v1386_v51, %v2404_v62  ;;  %v1434_v32 = vadd.f32 %v1427_v30, %v2409_v49  ;;  %v1433_v30 = vadd.f32 %v1425_v39, %v2416_v31 }
 0x665   :  { %v1936_v28 = vmul.f32 -1.442695, %v1431_v50 }
 0x666   :  { %v1937_v29 = vmul.f32 -1.442695, %v1432_v48 }
 0x667   :  { %2070 = vpow2.f32 %v1936_v28 }
 0x668   :  { %2072 = vpow2.f32 %v1937_v29 }
 0x669   :  { %2074 = vtanh.f32 %v1434_v32  ;;  %v1945_v32 = vld [vmem:[%s2835_s0 + $0x1c] sm:$0xf] }
 0x671   :  { %v2071_v22 = vpop.eup %2070 }
 0x672   :  { %v2073_v23 = vpop.eup %2072  ;;  %v1438_v33 = vadd.f32 1.0, %v2071_v22 }
 0x673   :  { %v1444_v34 = vadd.f32 1.0, %v2073_v23  ;;  %v2075_v26 = vpop.eup %2074 }
 0x674   :  { %2076 = vrcp.f32 %v1438_v33 }
 0x675   :  { %2078 = vrcp.f32 %v1444_v34 }
 0x67e   :  { %v2077_v27 = vpop.eup %2076 }
 0x67f   :  { %v2079_v35 = vpop.eup %2078  ;;  %v1448_v38 = vmul.f32 %v2077_v27, %v2635_v36  ;;  %v1938_v36 = vld [vmem:[%s2835_s0 + $0x18] sm:$0xf]  ;;  %s2192_s0 = smov [#allocation7]  }
 0x680   :  { %v1449_v40 = vmul.f32 %v2079_v35, %v2075_v26  ;;  %s1853_s20 = sshll.u32 %s2192_s0, 4  ;;  %s1854_s20 = int_to_ptr.vmem [resolvable:$true] %s1853_s20 }
 0x681   :  { %s2160_s21 = scalar_lea.vmem %s1854_s20, 1024  ;;  %p2165_p9 = scmp.lt.s32.totalorder %s1854_s20, %s1854_s20 }
 0x682   :  { %v2754_v43 = vadd.f32 %v1449_v40, %v1448_v38  ;;  %p2161_p8 = scmp.ne.s32.totalorder %s1854_s20, %s2160_s21  ;;  %p2166_p10 = scmp.lt.s32.totalorder %s2160_s21, %s2160_s21 }
 0x684   :  { %2080 = vtanh.f32 %v2754_v43  ;;  %p2167_p11 = por %p2166_p10, %p2165_p9 }
 0x686   :  { %p2168_p12 = pnand %p2167_p11, %p2161_p8 }
 0x68e   :  { %v2081_v51 = vpop.eup %2080 }
 0x68f   :  { %v1452_v18 = vadd.f32 1.0, %v2081_v51 }
 0x691   :  { %v1453_v56 = vmul.f32 %v1452_v18, %v1433_v30 }
 0x693   :  { %1455 = vst [vmem:[#allocation7 + $0x28] sm:$0xff] %v1453_v56  ;;  %v1458_v50 = vpack.c.bf16 %v1453_v56, %v1453_v56 }
 0x695   :  { %1492 = vmatmul.mubr.bf16.vlgmr.msra.gmra.mrb[48].mxu0 %v1458_v50  ;;  %1533 = vmatmul.mubr.bf16.vlgmr.msra.gmra.mrb[48].mxu1 %v1458_v50 }
 0x696   :  { %1545 = vmatpush1.bf16.msra.mxu0 %v2340_v44  ;;  %1586 = vmatpush1.bf16.msra.mxu1 %v2348_v47 }
 0x697   :  { %1576 = vmatprep.mubr.bf16.mxu0 %v2189_v0  ;;  %1617 = vmatprep.mubr.bf16.mxu1 %v2189_v0 }
 0x698   :  { %1654 = vmatprep.subr.bf16.mxu0 %v2643_v42  ;;  %1695 = vmatprep.subr.bf16.mxu1 %v2646_v57 }
 0x69d   :  { %1940 = vmatmul.mubr.msk.bf16.vlgmr.msra.gmra.mrb[52].mxu0 %vm337_vm1, %v1938_v36  ;;  %1942 = vmatmul.mubr.msk.bf16.vlgmr.msra.gmra.mrb[52].mxu1 %vm337_vm1, %v1938_v36 }
 0x69e   :  { %1655 = vmatpush1.bf16.msra.mxu0 %v2654_v46  ;;  %1696 = vmatpush1.bf16.msra.mxu1 %v2657_v24 }
 0x69f   :  { %1656 = vmatprep.subr.bf16.mxu0 %v2660_v55  ;;  %1697 = vmatprep.subr.bf16.mxu1 %v2663_v37 }
 0x6a0   :  { %1686 = vmatprep.mubr.bf16.mxu0 %v2189_v0  ;;  %1727 = vmatprep.mubr.bf16.mxu1 %v2189_v0 }
 0x6a2   :  { %1657 = vmatpush1.bf16.msra.mxu0 %v2668_v25  ;;  %1698 = vmatpush1.bf16.msra.mxu1 %v2671_v59 }
 0x6a3   :  { %1658 = vmatprep.subr.bf16.mxu0 %v2674_v61  ;;  %1699 = vmatprep.subr.bf16.mxu1 %v2677_v53 }
 0x6a6   :  { %1659 = vmatpush1.bf16.msra.mxu0 %v2680_v54  ;;  %1700 = vmatpush1.bf16.msra.mxu1 %v2683_v17 }
 0x6a7   :  { %1660 = vmatprep.subr.bf16.mxu0 %v2686_v19  ;;  %1701 = vmatprep.subr.bf16.mxu1 %v2689_v63 }
 0x6aa   :  { %1661 = vmatpush1.bf16.msra.mxu0 %v2692_v1  ;;  %1702 = vmatpush1.bf16.msra.mxu1 %v2695_v2 }
 0x6ab   :  { %1662 = vmatprep.subr.bf16.mxu0 %v2698_v3  ;;  %1703 = vmatprep.subr.bf16.mxu1 %v2701_v4 }
 0x6ae   :  { %1663 = vmatpush1.bf16.msra.mxu0 %v2704_v5  ;;  %1704 = vmatpush1.bf16.msra.mxu1 %v2707_v6 }
 0x6af   :  { %1664 = vmatprep.subr.bf16.mxu0 %v2710_v7  ;;  %1705 = vmatprep.subr.bf16.mxu1 %v2713_v8 }
 0x6b2   :  { %1665 = vmatpush1.bf16.msra.mxu0 %v2716_v9  ;;  %1706 = vmatpush1.bf16.msra.mxu1 %v2719_v10 }
 0x6b3   :  { %1666 = vmatprep.subr.bf16.mxu0 %v2722_v11  ;;  %1707 = vmatprep.subr.bf16.mxu1 %v2725_v12 }
 0x6b6   :  { %1667 = vmatpush1.bf16.msra.mxu0 %v2728_v13  ;;  %1708 = vmatpush1.bf16.msra.mxu1 %v2731_v14 }
 0x6b7   :  { %1668 = vmatprep.subr.bf16.mxu0 %v2734_v15  ;;  %1709 = vmatprep.subr.bf16.mxu1 %v2737_v16 }
 0x6ba   :  { %1669 = vmatpush1.bf16.msra.mxu0 %v2740_v20  ;;  %1710 = vmatpush1.bf16.msra.mxu1 %v2743_v21 }
 0x6bb   :  { %1946 = vmatprep.subr.msk.bf16.mxu0 %vm341_vm0, %v2330_v41  ;;  %1948 = vmatprep.subr.msk.bf16.mxu1 %vm341_vm0, %v2342_v45 }
 0x768   :  { %v1493_v42 = vpop.f32.mrb[48].mxu0  ;;  %v1534_v57 = vpop.f32.mrb[48].mxu1 }
 0x769   :  { %v1495_v46 = vpop.f32.mrb[49].mxu0  ;;  %v1536_v24 = vpop.f32.mrb[49].mxu1 }
 0x76a   :  { %v1497_v55 = vpop.f32.mrb[50].mxu0  ;;  %v1538_v37 = vpop.f32.mrb[50].mxu1 }
 0x76b   :  { %v1498_v25 = vpop.f32.mrb[51].mxu0  ;;  %v1539_v59 = vpop.f32.mrb[51].mxu1 }
 0x770   :  { %v1578_v61 = vpop.f32.mrb[52].mxu0  ;;  %v1619_v53 = vpop.f32.mrb[52].mxu1 }
 0x771   :  { %v1579_v54 = vadd.f32 %v1578_v61, %v1493_v42  ;;  %v1620_v17 = vadd.f32 %v1619_v53, %v1534_v57  ;;  %v1580_v19 = vpop.f32.mrb[53].mxu0  ;;  %v1621_v63 = vpop.f32.mrb[53].mxu1 }
 0x772   :  { %v1581_v1 = vadd.f32 %v1580_v19, %v1495_v46  ;;  %v1622_v2 = vadd.f32 %v1621_v63, %v1536_v24  ;;  %v1582_v41 = vpop.f32.mrb[54].mxu0  ;;  %v1623_v3 = vpop.f32.mrb[54].mxu1 }
 0x773   :  { %v1626_v45 = vadd.f32 %v1579_v54, %v2402_v60  ;;  %v1583_v4 = vpop.f32.mrb[55].mxu0  ;;  %v1624_v5 = vpop.f32.mrb[55].mxu1  ;;  %v1628_v52 = vadd.f32 %v1620_v17, %v2416_v31 }
 0x774   :  { %v1627_v6 = vadd.f32 %v1581_v1, %v2404_v62  ;;  %v1629_v9 = vadd.f32 %v1622_v2, %v2409_v49 }
 0x775   :  { %v1943_v7 = vmul.f32 -1.442695, %v1626_v45 }
 0x776   :  { %v1944_v8 = vmul.f32 -1.442695, %v1627_v6 }
 0x777   :  { %2082 = vpow2.f32 %v1943_v7 }
 0x778   :  { %2084 = vpow2.f32 %v1944_v8 }
 0x779   :  { %2086 = vtanh.f32 %v1629_v9 }
 0x781   :  { %v2083_v10 = vpop.eup %2082 }
 0x782   :  { %v2085_v11 = vpop.eup %2084  ;;  %v1633_v12 = vadd.f32 1.0, %v2083_v10 }
 0x783   :  { %v1639_v13 = vadd.f32 1.0, %v2085_v11  ;;  %v2087_v14 = vpop.eup %2086 }
 0x784   :  { %2088 = vrcp.f32 %v1633_v12 }
 0x785   :  { %2090 = vrcp.f32 %v1639_v13 }
 0x78e   :  { %v2089_v15 = vpop.eup %2088 }
 0x78f   :  { %v2091_v16 = vpop.eup %2090  ;;  %v1643_v20 = vmul.f32 %v2089_v15, %v2754_v43 }
 0x790   :  { %v1644_v21 = vmul.f32 %v2091_v16, %v2087_v14 }
 0x792   :  { %v1645_v39 = vadd.f32 %v1644_v21, %v1643_v20 }
 0x794   :  { %2092 = vtanh.f32 %v1645_v39 }
 0x79e   :  { %v2093_v58 = vpop.eup %2092 }
 0x79f   :  { %v1647_v48 = vadd.f32 1.0, %v2093_v58 }
 0x7a1   :  { %v1648_v28 = vmul.f32 %v1647_v48, %v1628_v52 }
 0x7a3   :  { %1650 = vst [vmem:[#allocation7 + $0x30] sm:$0xff] %v1648_v28  ;;  %v1653_v29 = vpack.c.bf16 %v1648_v28, %v1648_v28 }
 0x7a5   :  { %1687 = vmatmul.mubr.bf16.vlgmr.msra.gmra.mrb[56].mxu0 %v1653_v29  ;;  %1728 = vmatmul.mubr.bf16.vlgmr.msra.gmra.mrb[56].mxu1 %v1653_v29 }
 0x7a6   :  { %1740 = vmatpush1.bf16.msra.mxu0 %v2340_v44  ;;  %1781 = vmatpush1.bf16.msra.mxu1 %v2348_v47 }
 0x7a7   :  { %1771 = vmatprep.mubr.bf16.mxu0 %v2189_v0  ;;  %1812 = vmatprep.mubr.bf16.mxu1 %v2189_v0 }
 0x7ad   :  { %1947 = vmatmul.mubr.msk.bf16.vlgmr.msra.gmra.mrb[60].mxu0 %vm337_vm1, %v1945_v32  ;;  %1949 = vmatmul.mubr.msk.bf16.vlgmr.msra.gmra.mrb[60].mxu1 %vm337_vm1, %v1945_v32 }
 0x878   :  { %v1688_v22 = vpop.f32.mrb[56].mxu0  ;;  %v1729_v23 = vpop.f32.mrb[56].mxu1 }
 0x879   :  { %v1690_v33 = vpop.f32.mrb[57].mxu0  ;;  %v1731_v34 = vpop.f32.mrb[57].mxu1 }
 0x87a   :  { %v1692_v26 = vpop.f32.mrb[58].mxu0  ;;  %v1733_v44 = vpop.f32.mrb[58].mxu1 }
 0x87b   :  { %v1693_v27 = vpop.f32.mrb[59].mxu0  ;;  %v1734_v47 = vpop.f32.mrb[59].mxu1 }
 0x880   :  { %v1773_v35 = vpop.f32.mrb[60].mxu0  ;;  %v1814_v38 = vpop.f32.mrb[60].mxu1 }
 0x881   :  { %v1774_v40 = vadd.f32 %v1773_v35, %v1688_v22  ;;  %v1815_v0 = vadd.f32 %v1814_v38, %v1729_v23  ;;  %v1775_v43 = vpop.f32.mrb[61].mxu0  ;;  %v1816_v51 = vpop.f32.mrb[61].mxu1 }
 0x882   :  { %v1776_v30 = vadd.f32 %v1775_v43, %v1690_v33  ;;  %v1817_v18 = vadd.f32 %v1816_v51, %v1731_v34  ;;  %v1777_v56 = vpop.f32.mrb[62].mxu0  ;;  %v1818_v50 = vpop.f32.mrb[62].mxu1 }
 0x883   :  { %v1821_v36 = vadd.f32 %v1774_v40, %v2402_v60  ;;  %v1778_v42 = vpop.f32.mrb[63].mxu0  ;;  %v1819_v57 = vpop.f32.mrb[63].mxu1  ;;  %v1823_v2 = vadd.f32 %v1815_v0, %v2416_v31 }
 0x884   :  { %v1822_v46 = vadd.f32 %v1776_v30, %v2404_v62  ;;  %v1824_v37 = vadd.f32 %v1817_v18, %v2409_v49 }
 0x885   :  { %v1950_v24 = vmul.f32 -1.442695, %v1821_v36 }
 0x886   :  { %v1951_v55 = vmul.f32 -1.442695, %v1822_v46 }
 0x887   :  { %2094 = vpow2.f32 %v1950_v24 }
 0x888   :  { %2096 = vpow2.f32 %v1951_v55 }
 0x889   :  { %2098 = vtanh.f32 %v1824_v37 }
 0x891   :  { %v2095_v25 = vpop.eup %2094 }
 0x892   :  { %v2097_v59 = vpop.eup %2096  ;;  %v1828_v61 = vadd.f32 1.0, %v2095_v25 }
 0x893   :  { %v1834_v53 = vadd.f32 1.0, %v2097_v59  ;;  %v2099_v54 = vpop.eup %2098 }
 0x894   :  { %2100 = vrcp.f32 %v1828_v61 }
 0x895   :  { %2102 = vrcp.f32 %v1834_v53 }
 0x89e   :  { %v2101_v17 = vpop.eup %2100 }
 0x89f   :  { %v2103_v60 = vpop.eup %2102  ;;  %v1838_v19 = vmul.f32 %v2101_v17, %v1645_v39 }
 0x8a0   :  { %v1839_v63 = vmul.f32 %v2103_v60, %v2099_v54 }
 0x8a2   :  { %v1840_v1 = vadd.f32 %v1839_v63, %v1838_v19 }
 0x8a4   :  { %2104 = vtanh.f32 %v1840_v1 }
 0x8ae   :  { %v2105_v62 = vpop.eup %2104 }
 0x8af   :  { %v1842_v49 = vadd.f32 1.0, %v2105_v62 }
 0x8b1   :  { %v1843_v41 = vmul.f32 %v1842_v49, %v1823_v2 }
 0x8b3   :  { %1845 = vst [vmem:[#allocation7 + $0x38] sm:$0xff] %v1843_v41 }
 0x8b4   :  { %2171 = shalt.err (!%p2168_p12)
}
 0x8b5   :  { %s2172_s24 = scalar_lea.hbm %s2839_s4, 1024 }
 0x8b6   :  { %p2173_p13 = scmp.ne.s32.totalorder %s2839_s4, %s2172_s24  ;;  %p2176_p0 = scmp.lt.u32.totalorder %s2172_s24, %s2839_s4 }
 0x8b8   :  { %p2178_p1 = pnand %p2176_p0, %p2173_p13 }
 0x8ba   :  { %2181 = shalt.err (!%p2178_p1)
}
 0x8bb   :  { %s2193_s3 = smov 128   ;;  %s2194_s29 = smov 8  }
 0x8bc   :  { %1859 = dma.vmem_to_hbm [thread:$0]  %s1854_s20, 1024, %s2839_s4, [#allocation6], %s2193_s3, %s2193_s3, %s2194_s29  }
 0x8bd   :  { %2184 = dma.done.wait [#allocation6], 1024  }
 0x8be   :  { %2185 = vsyncadd [#allocation6], 4294966272 }
 0x8bf   :  { %1863 = vsyncpa [#allocation5], 1 }
 0x8c0   :  { %1864 = vsyncpa [#allocation6], 1 }

</bundles_post_ra>
